<compile_context>
chip_gen: v7x
topology: tpu7x:2x2x1
jax: 0.10.0
libtpu: 0.0.40
codegen_flags: <defaults>
</compile_context>

<pallas_src>
import functools

import numpy as np
import jax
import jax.numpy as jnp
from jax.experimental import pallas as pl
from jax.experimental.pallas import tpu as pltpu


def _round_up(x, m):
    return (x + m - 1) // m * m


_VMEM_CAP = None


def _vmem_capacity_bytes():
    """Physical per-core VMEM (generation aware), conservative fallback."""
    global _VMEM_CAP
    if _VMEM_CAP is None:
        try:
            _VMEM_CAP = int(pltpu.get_tpu_info().vmem_capacity_bytes)
        except Exception:
            _VMEM_CAP = 64 << 20          # assume the smallest (v7x per-TC)
    return _VMEM_CAP


def _pick_tile_and_vmem(n, w):
    """Pick the frames-per-stream row tile and the scoped-VMEM limit.

    Per frame row we pay ~16*w B of double-buffered stacked f32 input block plus
    ~40*w B of in-kernel f32/bf16 intermediates; the packed bf16 basis costs
    8*w*w B over two pipeline buffers.  Tile is as large as the budget allows
    (cap 1024) and then re-balanced so a trailing tile is never almost-empty
    (e.g. n=260 -> two 136-row tiles instead of 256 + 4).
    """
    budget = min(_vmem_capacity_bytes() * 3 // 4, 100 << 20)
    basis_bytes = 2 * (2 * w * w * 2)        # packed bf16 hi/lo basis, 2 buffers
    per_row = 56 * w                         # stacked input (2 bufs) + scratch
    tm_cap = (budget - basis_bytes - (4 << 20)) // per_row
    tm_cap = max(8, min(1024, (int(tm_cap) // 8) * 8))
    nb = -(-n // tm_cap)                     # balanced number of tiles
    tile = _round_up(-(-n // nb), 8)
    return tile, int(budget)


def _dft_basis_packed(w):
    """Packed Hann*real-DFT basis, bf16 hi/lo parts stacked into [2, W, W].

    Columns [0, W/2)  : hann[n]*cos(2*pi*n*k/W)  bins k=0..W/2-1       (Re)
    Column  W/2       : hann[n]*cos(pi*n)        Nyquist bin           (Re)
    Columns (W/2, W)  : -hann[n]*sin(2*pi*n*k/W) bins k=1..W/2-1       (Im)
    """
    half = w // 2
    n_i = np.arange(w, dtype=np.int64)[:, None]
    k_i = np.arange(half + 1, dtype=np.int64)[None, :]
    ang = 2.0 * np.pi * np.mod(n_i * k_i, w).astype(np.float64) / w
    hann = 0.5 * (1.0 - np.cos(2.0 * np.pi * np.arange(w, dtype=np.float64) / w))
    cos_m = hann[:, None] * np.cos(ang)          # [W, W/2+1]
    sin_m = hann[:, None] * np.sin(ang)
    basis = np.empty((w, w), dtype=np.float64)
    basis[:, :half] = cos_m[:, :half]            # Re, bins 0..W/2-1
    basis[:, half] = cos_m[:, half]              # Re, Nyquist bin
    basis[:, half + 1:] = -sin_m[:, 1:half]      # Im, bins 1..W/2-1
    b32 = jnp.asarray(basis, dtype=jnp.float32)
    b_hi = b32.astype(jnp.bfloat16)
    b_lo = (b32 - b_hi.astype(jnp.float32)).astype(jnp.bfloat16)
    return jnp.stack([b_hi, b_lo])               # [2, W, W] bf16


def _frame(x, n_fft, hop):
    """torch.stft(center=True, pad_mode='reflect') framing.  x: [B, T] -> [B, F, W].

    When hop | n_fft, frames are built from shifted static slices of the
    hop-chunked signal (no integer gather -> cheaper for XLA to fuse).
    """
    # TODO(synk): move framing into the kernel (manual DMA of the contiguous
    # (tm-1)*hop + W sample range per row tile from HBM, memory_space=pl.ANY) to
    # kill the W/hop HBM expansion of the materialized frames array - the
    # biggest remaining lever on v6e where the small-W scale is HBM-bound.
    b = x.shape[0]
    pad = n_fft // 2
    xp = jnp.pad(x, ((0, 0), (pad, pad)), mode="reflect")
    t = xp.shape[1]
    n_frames = 1 + (t - n_fft) // hop
    if n_fft % hop == 0:
        r = n_fft // hop
        n_chunks = n_frames - 1 + r
        y = xp[:, : n_chunks * hop].reshape(b, n_chunks, hop)
        frames = jnp.concatenate(
            [y[:, c:c + n_frames, :] for c in range(r)], axis=-1)
    else:
        idx = jnp.arange(n_frames)[:, None] * hop + jnp.arange(n_fft)[None, :]
        frames = xp[:, idx]
    return frames                                # [B, F, W]


def _mss_scale_kernel(fio_ref, basis_ref, out_ref, *, n_passes):
    """One row tile: windowed real-DFT of stacked (input, target) frames + partial MSE."""
    _, tm, w = fio_ref.shape
    half = w // 2

    # Stacked frames: rows [0, tm) = input, rows [tm, 2*tm) = target.  Merging the
    # leading dim into the 8-aligned sublane dim is a layout no-op and lets every
    # precision pass run as a single [2*tm, W] x [W, W] MXU matmul.
    x = fio_ref[...].reshape(2 * tm, w)          # f32

    b_hi = basis_ref[0]                          # [W, W] bf16 (hi part)
    b_lo = basis_ref[1]                          # [W, W] bf16 (lo part)

    x_hi = x.astype(jnp.bfloat16)
    r = jnp.dot(x_hi, b_hi, preferred_element_type=jnp.float32)
    if n_passes >= 2:
        # basis-lo correction (basis rounding dominates the error budget).
        r = r + jnp.dot(x_hi, b_lo, preferred_element_type=jnp.float32)
    if n_passes >= 3:
        # frame-lo correction: manual bf16_3x == Precision.HIGH accuracy.
        x_lo = (x - x_hi.astype(jnp.float32)).astype(jnp.bfloat16)
        r = r + jnp.dot(x_lo, b_hi, preferred_element_type=jnp.float32)

    re = r[:, :half]                             # Re bins 0..W/2-1 (lane-aligned)
    im = r[:, half:]                             # col 0 = Nyquist Re, cols 1.. = Im
    col = jax.lax.broadcasted_iota(jnp.int32, re.shape, 1)
    is_col0 = col == 0

    # Bins 1..W/2-1: sqrt(Re^2+Im^2); DC bin: |Re|; Nyquist bin: |packed im col 0|.
    mag = jnp.where(is_col0, jnp.abs(re), jnp.sqrt(re * re + im * im))
    nyq = jnp.where(is_col0, jnp.abs(im), 0.0)

    d = mag[:tm] - mag[tm:]                      # input vs target (padded rows -> 0)
    dn = nyq[:tm] - nyq[tm:]
    d2 = d * d + dn * dn

    # Lane-dense per-block partial sum; no cross-step accumulation / scalar RMW.
    out_ref[0] = jnp.sum(d2, axis=0, keepdims=True)      # (1, W/2)


def _mss_scale_partials(frames_io, basis, tile, vmem_limit, n_passes):
    _, n_pad, w = frames_io.shape
    half = w // 2
    nb = n_pad // tile
    grid_spec = pltpu.PrefetchScalarGridSpec(
        num_scalar_prefetch=0,
        grid=(nb,),
        in_specs=[
            pl.BlockSpec((2, tile, w), lambda i: (0, i, 0)),
            # Constant index_map -> the packed bf16 basis is DMA'd only once.
            # TODO(synk): single-buffer it (pipeline_mode=pl.Buffered(1)) for very
            # large W on v7x to halve the basis VMEM footprint.
            pl.BlockSpec((2, w, w), lambda i: (0, 0, 0)),
        ],
        out_specs=pl.BlockSpec((1, 1, half), lambda i: (i, 0, 0)),
    )
    return pl.pallas_call(
        functools.partial(_mss_scale_kernel, n_passes=n_passes),
        out_shape=jax.ShapeDtypeStruct((nb, 1, half), jnp.float32),
        grid_spec=grid_spec,
        compiler_params=pltpu.CompilerParams(
            # Independent row tiles.
            # TODO(synk): verify v7x splits this axis across both TensorCores
            # (pltpu.CORE_PARALLEL / pl.core_map); plain "parallel" is a no-op
            # on single-TC chips and unverified for the megacore split.
            dimension_semantics=("parallel",),
            vmem_limit_bytes=vmem_limit),
    )(frames_io, basis)


@functools.partial(jax.jit, static_argnums=(2, 3, 4))
def _multi_scale_fft_loss(inp, tgt, hop_sizes, window_sizes, n_passes):
    total = jnp.zeros((1,), dtype=jnp.float32)               # input.new_zeros(1)
    b = inp.shape[0]
    # torch.cat([input, target], dim=0): one framing / one STFT pass per scale.
    x_io = jnp.concatenate([inp, tgt], axis=0).astype(jnp.float32)   # [2B, T]
    for hop, w in zip(hop_sizes, window_sizes):
        k = w // 2 + 1
        basis = _dft_basis_packed(w)                          # hoisted by jit
        frames = _frame(x_io, w, hop)                         # [2B, F, W]
        n_frames = frames.shape[1]
        n = b * n_frames
        frames = frames.reshape(2, n, w)                      # [0]=input, [1]=target
        tile, vmem_limit = _pick_tile_and_vmem(n, w)
        n_pad = _round_up(n, tile)
        frames = jnp.pad(frames, ((0, 0), (0, n_pad - n), (0, 0)))
        partials = _mss_scale_partials(frames, basis, tile, vmem_limit, n_passes)
        # F.mse_loss: mean over the (B, K, F) magnitude tensor.
        total = total + jnp.sum(partials) / jnp.float32(b * n_frames * k)
    return total


def multi_scale_fft_loss(inp, tgt, hop_sizes, window_sizes, n_passes=3):
    """Mirrors MultiScaleFFTLoss.forward: returns (loss[1], {}).

    n_passes: 3 = manual bf16_3x (~Precision.HIGH, default); 2 drops the frame-lo
    MXU pass (faster on MXU-bound v5e / VALU-bound v6e when tolerance allows).
    """
    # TODO(synk): add a custom_vjp (epsilon inside the sqrt / padded-row mask)
    # before using this for training; sqrt(0) grads are NaN and Pallas TPU
    # autodiff of this kernel is not guaranteed to lower.
    loss = _multi_scale_fft_loss(inp, tgt, tuple(hop_sizes), tuple(window_sizes),
                                 int(n_passes))
    return loss, {}


def _reference_loss(inp, tgt, hop_sizes, window_sizes):
    # Pure-JAX reference (gather framing + rfft) for the correctness check.
    total = jnp.float32(0.0)
    for hop, w in zip(hop_sizes, window_sizes):
        pad = w // 2
        xi = jnp.pad(inp, ((0, 0), (pad, pad)), mode="reflect")
        xt = jnp.pad(tgt, ((0, 0), (pad, pad)), mode="reflect")
        n_frames = 1 + (xi.shape[1] - w) // hop
        idx = jnp.arange(n_frames)[:, None] * hop + jnp.arange(w)[None, :]
        hann = 0.5 * (1.0 - jnp.cos(2.0 * jnp.pi *
                                    jnp.arange(w, dtype=jnp.float32) / w))
        mi = jnp.abs(jnp.fft.rfft(xi[:, idx] * hann, axis=-1))
        mt = jnp.abs(jnp.fft.rfft(xt[:, idx] * hann, axis=-1))
        total = total + jnp.mean((mi - mt) ** 2)
    return total


if __name__ == "__main__":
    key = jax.random.PRNGKey(0)
    k1, k2 = jax.random.split(key)

    B, T = 2, 1024
    hop_sizes = [64, 128]
    window_sizes = [256, 512]

    inp = jax.random.normal(k1, (B, T), dtype=jnp.float32)
    tgt = inp + 0.1 * jax.random.normal(k2, (B, T), dtype=jnp.float32)

    loss, feats = multi_scale_fft_loss(inp, tgt, hop_sizes, window_sizes)
    loss = jax.block_until_ready(loss)

    ref = jax.block_until_ready(_reference_loss(inp, tgt, hop_sizes, window_sizes))
    np.testing.assert_allclose(np.asarray(loss)[0], np.asarray(ref),
                               rtol=2e-3, atol=1e-4)
    assert loss.shape == (1,) and feats == {}
    print("KERNEL_OK")
</pallas_src>

<mosaic_0001>
module attributes {stable_mosaic.version = 11 : i64} {
  func.func @_mss_scale_kernel(%arg0: i32, %arg1: memref<2x24x512xf32, #tpu.memory_space<vmem>>, %arg2: memref<2x512x512xbf16, #tpu.memory_space<vmem>>, %arg3: memref<1x1x256xf32, #tpu.memory_space<vmem>>) attributes {dimension_semantics = [#tpu.dimension_semantics<parallel>], iteration_bounds = array<i64: 1>, scalar_prefetch = 0 : i64, scratch_operands = 0 : i64, tpu.core_type = #tpu.core_type<tc>, window_params = [{transform_indices = @transform_0, window_bounds = array<i64: 2, 24, 512>}, {pipeline_mode = #tpu.pipeline_mode<synchronous>, transform_indices = @transform_1, window_bounds = array<i64: 2, 512, 512>}, {transform_indices = @transform_2, window_bounds = array<i64: 1, 1, 256>}]} {
    %c0 = arith.constant 0 : index
    %c0_0 = arith.constant 0 : index
    %c0_1 = arith.constant 0 : index
    %0 = vector.load %arg1[%c0, %c0_0, %c0_1] : memref<2x24x512xf32, #tpu.memory_space<vmem>>, vector<2x24x512xf32>
    %1 = vector.shape_cast %0 : vector<2x24x512xf32> to vector<48x512xf32>
    %c0_2 = arith.constant 0 : index
    %c0_3 = arith.constant 0 : index
    %c0_4 = arith.constant 0 : index
    %2 = vector.load %arg2[%c0_2, %c0_3, %c0_4] : memref<2x512x512xbf16, #tpu.memory_space<vmem>>, vector<1x512x512xbf16>
    %3 = vector.shape_cast %2 : vector<1x512x512xbf16> to vector<512x512xbf16>
    %c1 = arith.constant 1 : index
    %c0_5 = arith.constant 0 : index
    %c0_6 = arith.constant 0 : index
    %4 = vector.load %arg2[%c1, %c0_5, %c0_6] : memref<2x512x512xbf16, #tpu.memory_space<vmem>>, vector<1x512x512xbf16>
    %5 = vector.shape_cast %4 : vector<1x512x512xbf16> to vector<512x512xbf16>
    %6 = arith.truncf %1 : vector<48x512xf32> to vector<48x512xbf16>
    %cst = arith.constant dense<0.000000e+00> : vector<48x512xf32>
    %7 = tpu.matmul %6, %3, %cst {dimension_numbers = #tpu.dot_dimension_numbers<[1], [0], [0], [1], [0, 0, 1, 1], [], []>} : vector<48x512xbf16>, vector<512x512xbf16>, vector<48x512xf32> -> vector<48x512xf32>
    %cst_7 = arith.constant dense<0.000000e+00> : vector<48x512xf32>
    %8 = tpu.matmul %6, %5, %cst_7 {dimension_numbers = #tpu.dot_dimension_numbers<[1], [0], [0], [1], [0, 0, 1, 1], [], []>} : vector<48x512xbf16>, vector<512x512xbf16>, vector<48x512xf32> -> vector<48x512xf32>
    %9 = arith.addf %7, %8 : vector<48x512xf32>
    %10 = arith.extf %6 : vector<48x512xbf16> to vector<48x512xf32>
    %11 = arith.subf %1, %10 : vector<48x512xf32>
    %12 = arith.truncf %11 : vector<48x512xf32> to vector<48x512xbf16>
    %cst_8 = arith.constant dense<0.000000e+00> : vector<48x512xf32>
    %13 = tpu.matmul %12, %3, %cst_8 {dimension_numbers = #tpu.dot_dimension_numbers<[1], [0], [0], [1], [0, 0, 1, 1], [], []>} : vector<48x512xbf16>, vector<512x512xbf16>, vector<48x512xf32> -> vector<48x512xf32>
    %14 = arith.addf %9, %13 : vector<48x512xf32>
    %15 = vector.extract_strided_slice %14 {offsets = [0, 0], sizes = [48, 256], strides = [1, 1]} : vector<48x512xf32> to vector<48x256xf32>
    %16 = vector.extract_strided_slice %14 {offsets = [0, 256], sizes = [48, 256], strides = [1, 1]} : vector<48x512xf32> to vector<48x256xf32>
    %17 = tpu.iota {dimensions = array<i32: 1>} : vector<48x256xi32>
    %c0_i32 = arith.constant 0 : i32
    %18 = vector.broadcast %c0_i32 : i32 to vector<48x256xi32>
    %19 = arith.cmpi eq, %17, %18 : vector<48x256xi32>
    %20 = math.absf %15 : vector<48x256xf32>
    %21 = arith.mulf %15, %15 : vector<48x256xf32>
    %22 = arith.mulf %16, %16 : vector<48x256xf32>
    %23 = arith.addf %21, %22 : vector<48x256xf32>
    %24 = math.sqrt %23 : vector<48x256xf32>
    %25 = arith.select %19, %20, %24 : vector<48x256xi1>, vector<48x256xf32>
    %26 = math.absf %16 : vector<48x256xf32>
    %cst_9 = arith.constant 0.000000e+00 : f32
    %27 = vector.broadcast %cst_9 : f32 to vector<48x256xf32>
    %28 = arith.select %19, %26, %27 : vector<48x256xi1>, vector<48x256xf32>
    %29 = vector.extract_strided_slice %25 {offsets = [0, 0], sizes = [24, 256], strides = [1, 1]} : vector<48x256xf32> to vector<24x256xf32>
    %30 = vector.extract_strided_slice %25 {offsets = [24, 0], sizes = [24, 256], strides = [1, 1]} : vector<48x256xf32> to vector<24x256xf32>
    %31 = arith.subf %29, %30 : vector<24x256xf32>
    %32 = vector.extract_strided_slice %28 {offsets = [0, 0], sizes = [24, 256], strides = [1, 1]} : vector<48x256xf32> to vector<24x256xf32>
    %33 = vector.extract_strided_slice %28 {offsets = [24, 0], sizes = [24, 256], strides = [1, 1]} : vector<48x256xf32> to vector<24x256xf32>
    %34 = arith.subf %32, %33 : vector<24x256xf32>
    %35 = arith.mulf %31, %31 : vector<24x256xf32>
    %36 = arith.mulf %34, %34 : vector<24x256xf32>
    %37 = arith.addf %35, %36 : vector<24x256xf32>
    %cst_10 = arith.constant dense<0.000000e+00> : vector<256xf32>
    %38 = vector.multi_reduction <add>, %37, %cst_10 [0] : vector<24x256xf32> to vector<256xf32>
    %39 = vector.shape_cast %38 : vector<256xf32> to vector<1x256xf32>
    %c0_11 = arith.constant 0 : index
    %c0_12 = arith.constant 0 : index
    %c0_13 = arith.constant 0 : index
    %40 = vector.load %arg3[%c0_11, %c0_12, %c0_13] : memref<1x1x256xf32, #tpu.memory_space<vmem>>, vector<1x1x256xf32>
    %41 = vector.shape_cast %40 : vector<1x1x256xf32> to vector<1x256xf32>
    %42 = vector.shape_cast %39 : vector<1x256xf32> to vector<1x1x256xf32>
    tpu.vector_store %arg3[%c0_11, %c0_12, %c0_13], %42 {strides = array<i32>} : memref<1x1x256xf32, #tpu.memory_space<vmem>>, vector<1x1x256xf32>,
    return
  }
  func.func @transform_0(%arg0: i32) -> (i32, i32, i32) {
    %c0_i32 = arith.constant 0 : i32
    %c0_i32_0 = arith.constant 0 : i32
    %c0_i32_1 = arith.constant 0 : i32
    return %c0_i32, %arg0, %c0_i32_0 : i32, i32, i32
  }
  func.func @transform_1(%arg0: i32) -> (i32, i32, i32) {
    %c0_i32 = arith.constant 0 : i32
    %c0_i32_0 = arith.constant 0 : i32
    %c0_i32_1 = arith.constant 0 : i32
    %c0_i32_2 = arith.constant 0 : i32
    return %c0_i32, %c0_i32_0, %c0_i32_1 : i32, i32, i32
  }
  func.func @transform_2(%arg0: i32) -> (i32, i32, i32) {
    %c0_i32 = arith.constant 0 : i32
    %c0_i32_0 = arith.constant 0 : i32
    %c0_i32_1 = arith.constant 0 : i32
    return %arg0, %c0_i32, %c0_i32_0 : i32, i32, i32
  }
}

module attributes {stable_mosaic.version = 11 : i64} {
  func.func @_mss_scale_kernel(%arg0: i32, %arg1: memref<2x40x256xf32, #tpu.memory_space<vmem>>, %arg2: memref<2x256x256xbf16, #tpu.memory_space<vmem>>, %arg3: memref<1x1x128xf32, #tpu.memory_space<vmem>>) attributes {dimension_semantics = [#tpu.dimension_semantics<parallel>], iteration_bounds = array<i64: 1>, scalar_prefetch = 0 : i64, scratch_operands = 0 : i64, tpu.core_type = #tpu.core_type<tc>, window_params = [{transform_indices = @transform_0, window_bounds = array<i64: 2, 40, 256>}, {pipeline_mode = #tpu.pipeline_mode<synchronous>, transform_indices = @transform_1, window_bounds = array<i64: 2, 256, 256>}, {transform_indices = @transform_2, window_bounds = array<i64: 1, 1, 128>}]} {
    %c0 = arith.constant 0 : index
    %c0_0 = arith.constant 0 : index
    %c0_1 = arith.constant 0 : index
    %0 = vector.load %arg1[%c0, %c0_0, %c0_1] : memref<2x40x256xf32, #tpu.memory_space<vmem>>, vector<2x40x256xf32>
    %1 = vector.shape_cast %0 : vector<2x40x256xf32> to vector<80x256xf32>
    %c0_2 = arith.constant 0 : index
    %c0_3 = arith.constant 0 : index
    %c0_4 = arith.constant 0 : index
    %2 = vector.load %arg2[%c0_2, %c0_3, %c0_4] : memref<2x256x256xbf16, #tpu.memory_space<vmem>>, vector<1x256x256xbf16>
    %3 = vector.shape_cast %2 : vector<1x256x256xbf16> to vector<256x256xbf16>
    %c1 = arith.constant 1 : index
    %c0_5 = arith.constant 0 : index
    %c0_6 = arith.constant 0 : index
    %4 = vector.load %arg2[%c1, %c0_5, %c0_6] : memref<2x256x256xbf16, #tpu.memory_space<vmem>>, vector<1x256x256xbf16>
    %5 = vector.shape_cast %4 : vector<1x256x256xbf16> to vector<256x256xbf16>
    %6 = arith.truncf %1 : vector<80x256xf32> to vector<80x256xbf16>
    %cst = arith.constant dense<0.000000e+00> : vector<80x256xf32>
    %7 = tpu.matmul %6, %3, %cst {dimension_numbers = #tpu.dot_dimension_numbers<[1], [0], [0], [1], [0, 0, 1, 1], [], []>} : vector<80x256xbf16>, vector<256x256xbf16>, vector<80x256xf32> -> vector<80x256xf32>
    %cst_7 = arith.constant dense<0.000000e+00> : vector<80x256xf32>
    %8 = tpu.matmul %6, %5, %cst_7 {dimension_numbers = #tpu.dot_dimension_numbers<[1], [0], [0], [1], [0, 0, 1, 1], [], []>} : vector<80x256xbf16>, vector<256x256xbf16>, vector<80x256xf32> -> vector<80x256xf32>
    %9 = arith.addf %7, %8 : vector<80x256xf32>
    %10 = arith.extf %6 : vector<80x256xbf16> to vector<80x256xf32>
    %11 = arith.subf %1, %10 : vector<80x256xf32>
    %12 = arith.truncf %11 : vector<80x256xf32> to vector<80x256xbf16>
    %cst_8 = arith.constant dense<0.000000e+00> : vector<80x256xf32>
    %13 = tpu.matmul %12, %3, %cst_8 {dimension_numbers = #tpu.dot_dimension_numbers<[1], [0], [0], [1], [0, 0, 1, 1], [], []>} : vector<80x256xbf16>, vector<256x256xbf16>, vector<80x256xf32> -> vector<80x256xf32>
    %14 = arith.addf %9, %13 : vector<80x256xf32>
    %15 = vector.extract_strided_slice %14 {offsets = [0, 0], sizes = [80, 128], strides = [1, 1]} : vector<80x256xf32> to vector<80x128xf32>
    %16 = vector.extract_strided_slice %14 {offsets = [0, 128], sizes = [80, 128], strides = [1, 1]} : vector<80x256xf32> to vector<80x128xf32>
    %17 = tpu.iota {dimensions = array<i32: 1>} : vector<80x128xi32>
    %c0_i32 = arith.constant 0 : i32
    %18 = vector.broadcast %c0_i32 : i32 to vector<80x128xi32>
    %19 = arith.cmpi eq, %17, %18 : vector<80x128xi32>
    %20 = math.absf %15 : vector<80x128xf32>
    %21 = arith.mulf %15, %15 : vector<80x128xf32>
    %22 = arith.mulf %16, %16 : vector<80x128xf32>
    %23 = arith.addf %21, %22 : vector<80x128xf32>
    %24 = math.sqrt %23 : vector<80x128xf32>
    %25 = arith.select %19, %20, %24 : vector<80x128xi1>, vector<80x128xf32>
    %26 = math.absf %16 : vector<80x128xf32>
    %cst_9 = arith.constant 0.000000e+00 : f32
    %27 = vector.broadcast %cst_9 : f32 to vector<80x128xf32>
    %28 = arith.select %19, %26, %27 : vector<80x128xi1>, vector<80x128xf32>
    %29 = vector.extract_strided_slice %25 {offsets = [0, 0], sizes = [40, 128], strides = [1, 1]} : vector<80x128xf32> to vector<40x128xf32>
    %30 = vector.extract_strided_slice %25 {offsets = [40, 0], sizes = [40, 128], strides = [1, 1]} : vector<80x128xf32> to vector<40x128xf32>
    %31 = arith.subf %29, %30 : vector<40x128xf32>
    %32 = vector.extract_strided_slice %28 {offsets = [0, 0], sizes = [40, 128], strides = [1, 1]} : vector<80x128xf32> to vector<40x128xf32>
    %33 = vector.extract_strided_slice %28 {offsets = [40, 0], sizes = [40, 128], strides = [1, 1]} : vector<80x128xf32> to vector<40x128xf32>
    %34 = arith.subf %32, %33 : vector<40x128xf32>
    %35 = arith.mulf %31, %31 : vector<40x128xf32>
    %36 = arith.mulf %34, %34 : vector<40x128xf32>
    %37 = arith.addf %35, %36 : vector<40x128xf32>
    %cst_10 = arith.constant dense<0.000000e+00> : vector<128xf32>
    %38 = vector.multi_reduction <add>, %37, %cst_10 [0] : vector<40x128xf32> to vector<128xf32>
    %39 = vector.shape_cast %38 : vector<128xf32> to vector<1x128xf32>
    %c0_11 = arith.constant 0 : index
    %c0_12 = arith.constant 0 : index
    %c0_13 = arith.constant 0 : index
    %40 = vector.load %arg3[%c0_11, %c0_12, %c0_13] : memref<1x1x128xf32, #tpu.memory_space<vmem>>, vector<1x1x128xf32>
    %41 = vector.shape_cast %40 : vector<1x1x128xf32> to vector<1x128xf32>
    %42 = vector.shape_cast %39 : vector<1x128xf32> to vector<1x1x128xf32>
    tpu.vector_store %arg3[%c0_11, %c0_12, %c0_13], %42 {strides = array<i32>} : memref<1x1x128xf32, #tpu.memory_space<vmem>>, vector<1x1x128xf32>,
    return
  }
  func.func @transform_0(%arg0: i32) -> (i32, i32, i32) {
    %c0_i32 = arith.constant 0 : i32
    %c0_i32_0 = arith.constant 0 : i32
    %c0_i32_1 = arith.constant 0 : i32
    return %c0_i32, %arg0, %c0_i32_0 : i32, i32, i32
  }
  func.func @transform_1(%arg0: i32) -> (i32, i32, i32) {
    %c0_i32 = arith.constant 0 : i32
    %c0_i32_0 = arith.constant 0 : i32
    %c0_i32_1 = arith.constant 0 : i32
    %c0_i32_2 = arith.constant 0 : i32
    return %c0_i32, %c0_i32_0, %c0_i32_1 : i32, i32, i32
  }
  func.func @transform_2(%arg0: i32) -> (i32, i32, i32) {
    %c0_i32 = arith.constant 0 : i32
    %c0_i32_0 = arith.constant 0 : i32
    %c0_i32_1 = arith.constant 0 : i32
    return %arg0, %c0_i32, %c0_i32_0 : i32, i32, i32
  }
}

</mosaic_0001>

<bundles_post_ra>
// kernel: _multi_scale_fft_loss.2
= control target key start
LH: loop header
LB: loop body
LE: loop exit
PB: predicated region body
PF: predicated region fallthrough
CT: control target
= control target key end

     0   :  { %s2010_s1 = inlined_call_operand.vmem [shape: bf16[2,256,256], index: 1, kind: input, shape index: {}]   ;;  %s2011_s0 = inlined_call_operand.vmem [shape: f32[2,40,256], index: 0, kind: input, shape index: {}]   ;;  %s2012_s2 = inlined_call_operand.vmem [shape: f32[1,1,128], index: 2, kind: output, shape index: {}]  }
   0x1   :  { %v1096_v0 = vld [vmem:[%s2010_s1 + $0x104] ss:$8 sps:$4 sm:$0xff]   ;;  %v1100_v2 = vld [vmem:[%s2010_s1 + $0x100] ss:$8 sps:$4 sm:$0xff]   ;;  %v1102_v4 = vld [vmem:[%s2010_s1 + $0x114] ss:$8 sps:$4 sm:$0xff]  }
   0x2   :  { %v1233_v1 = vld [vmem:[%s2010_s1 + $0x4] ss:$8 sps:$4 sm:$0xff]   ;;  %266 = vmatprep.subr.bf16.mxu1 %v1096_v0  ;;  %v1241_v3 = vld [vmem:[%s2010_s1] ss:$8 sps:$4 sm:$0xff]   ;;  %v1251_v5 = vld [vmem:[%s2010_s1 + $0x14] ss:$8 sps:$4 sm:$0xff]  }
   0x3   :  { %509 = vmatprep.subr.bf16.mxu0 %v1233_v1  ;;  %267 = vmatpush1.bf16.msra.mxu1 %v1100_v2  ;;  %v1106_v6 = vld [vmem:[%s2010_s1 + $0x110] ss:$8 sps:$4 sm:$0xff]   ;;  %v1108_v8 = vld [vmem:[%s2010_s1 + $0x124] ss:$8 sps:$4 sm:$0xff]   ;;  %v1112_v10 = vld [vmem:[%s2010_s1 + $0x120] ss:$8 sps:$4 sm:$0xff]  }
   0x4   :  { %510 = vmatpush1.bf16.msra.mxu0 %v1241_v3  ;;  %268 = vmatprep.subr.bf16.mxu1 %v1102_v4  ;;  %v1259_v7 = vld [vmem:[%s2010_s1 + $0x10] ss:$8 sps:$4 sm:$0xff]   ;;  %v1268_v9 = vld [vmem:[%s2010_s1 + $0x24] ss:$8 sps:$4 sm:$0xff]   ;;  %v1276_v11 = vld [vmem:[%s2010_s1 + $0x20] ss:$8 sps:$4 sm:$0xff]  }
   0x5   :  { %511 = vmatprep.subr.bf16.mxu0 %v1251_v5  ;;  %v1114_v12 = vld [vmem:[%s2010_s1 + $0x134] ss:$8 sps:$4 sm:$0xff]   ;;  %v1118_v14 = vld [vmem:[%s2010_s1 + $0x130] ss:$8 sps:$4 sm:$0xff]   ;;  %v1120_v16 = vld [vmem:[%s2010_s1 + $0x144] ss:$8 sps:$4 sm:$0xff]  }
   0x6   :  { %v1286_v13 = vld [vmem:[%s2010_s1 + $0x34] ss:$8 sps:$4 sm:$0xff]   ;;  %v1295_v15 = vld [vmem:[%s2010_s1 + $0x30] ss:$8 sps:$4 sm:$0xff]   ;;  %v1304_v17 = vld [vmem:[%s2010_s1 + $0x44] ss:$8 sps:$4 sm:$0xff]  }
   0x7   :  { %269 = vmatpush1.bf16.msra.mxu1 %v1106_v6  ;;  %v1124_v18 = vld [vmem:[%s2010_s1 + $0x140] ss:$8 sps:$4 sm:$0xff]   ;;  %v1126_v20 = vld [vmem:[%s2010_s1 + $0x154] ss:$8 sps:$4 sm:$0xff]   ;;  %v1130_v22 = vld [vmem:[%s2010_s1 + $0x150] ss:$8 sps:$4 sm:$0xff]  }
   0x8   :  { %512 = vmatpush1.bf16.msra.mxu0 %v1259_v7  ;;  %270 = vmatprep.subr.bf16.mxu1 %v1108_v8  ;;  %v1312_v19 = vld [vmem:[%s2010_s1 + $0x40] ss:$8 sps:$4 sm:$0xff]   ;;  %v1322_v21 = vld [vmem:[%s2010_s1 + $0x54] ss:$8 sps:$4 sm:$0xff]   ;;  %v1331_v23 = vld [vmem:[%s2010_s1 + $0x50] ss:$8 sps:$4 sm:$0xff]  }
   0x9   :  { %513 = vmatprep.subr.bf16.mxu0 %v1268_v9  ;;  %v1132_v24 = vld [vmem:[%s2010_s1 + $0x164] ss:$8 sps:$4 sm:$0xff]   ;;  %v1136_v26 = vld [vmem:[%s2010_s1 + $0x160] ss:$8 sps:$4 sm:$0xff]   ;;  %v1138_v28 = vld [vmem:[%s2010_s1 + $0x174] ss:$8 sps:$4 sm:$0xff]  }
   0xa   :  { %v1340_v25 = vld [vmem:[%s2010_s1 + $0x64] ss:$8 sps:$4 sm:$0xff]   ;;  %v1348_v27 = vld [vmem:[%s2010_s1 + $0x60] ss:$8 sps:$4 sm:$0xff]   ;;  %v1358_v29 = vld [vmem:[%s2010_s1 + $0x74] ss:$8 sps:$4 sm:$0xff]  }
   0xb   :  { %271 = vmatpush1.bf16.msra.mxu1 %v1112_v10  ;;  %v1142_v30 = vld [vmem:[%s2010_s1 + $0x170] ss:$8 sps:$4 sm:$0xff]   ;;  %v1144_v32 = vld [vmem:[%s2010_s1 + $0x184] ss:$8 sps:$4 sm:$0xff]   ;;  %v1148_v34 = vld [vmem:[%s2010_s1 + $0x180] ss:$8 sps:$4 sm:$0xff]  }
   0xc   :  { %514 = vmatpush1.bf16.msra.mxu0 %v1276_v11  ;;  %272 = vmatprep.subr.bf16.mxu1 %v1114_v12  ;;  %v1367_v31 = vld [vmem:[%s2010_s1 + $0x70] ss:$8 sps:$4 sm:$0xff]   ;;  %v1376_v33 = vld [vmem:[%s2010_s1 + $0x84] ss:$8 sps:$4 sm:$0xff]   ;;  %v1384_v35 = vld [vmem:[%s2010_s1 + $0x80] ss:$8 sps:$4 sm:$0xff]  }
   0xd   :  { %515 = vmatprep.subr.bf16.mxu0 %v1286_v13  ;;  %v1150_v36 = vld [vmem:[%s2010_s1 + $0x194] ss:$8 sps:$4 sm:$0xff]   ;;  %v1154_v38 = vld [vmem:[%s2010_s1 + $0x190] ss:$8 sps:$4 sm:$0xff]   ;;  %v1156_v40 = vld [vmem:[%s2010_s1 + $0x1a4] ss:$8 sps:$4 sm:$0xff]  }
   0xe   :  { %v1394_v37 = vld [vmem:[%s2010_s1 + $0x94] ss:$8 sps:$4 sm:$0xff]   ;;  %v1403_v39 = vld [vmem:[%s2010_s1 + $0x90] ss:$8 sps:$4 sm:$0xff]   ;;  %v1412_v41 = vld [vmem:[%s2010_s1 + $0xa4] ss:$8 sps:$4 sm:$0xff]  }
   0xf   :  { %273 = vmatpush1.bf16.msra.mxu1 %v1118_v14  ;;  %v1160_v42 = vld [vmem:[%s2010_s1 + $0x1a0] ss:$8 sps:$4 sm:$0xff]   ;;  %v1162_v44 = vld [vmem:[%s2010_s1 + $0x1b4] ss:$8 sps:$4 sm:$0xff]   ;;  %v1166_v48 = vld [vmem:[%s2010_s1 + $0x1b0] ss:$8 sps:$4 sm:$0xff]  }
  0x10   :  { %516 = vmatpush1.bf16.msra.mxu0 %v1295_v15  ;;  %274 = vmatprep.subr.bf16.mxu1 %v1120_v16  ;;  %v1420_v43 = vld [vmem:[%s2010_s1 + $0xa0] ss:$8 sps:$4 sm:$0xff]   ;;  %v1430_v45 = vld [vmem:[%s2010_s1 + $0xb4] ss:$8 sps:$4 sm:$0xff]   ;;  %v1449_v49 = vld [vmem:[%s2010_s1 + $0xb0] ss:$8 sps:$4 sm:$0xff]  }
  0x11   :  { %517 = vmatprep.subr.bf16.mxu0 %v1304_v17  ;;  %v1435_v46 = vld [vmem:[%s2011_s0 + $0x8] sm:$0xff]  ;;  %v1440_v47 = vld [vmem:[%s2011_s0 + $0x18] sm:$0xff]  ;;  %v1532_v6 = vld [vmem:[%s2011_s0] sm:$0xff] }
  0x12   :  { %v1453_v50 = vpack.c.bf16 %v1440_v47, %v1435_v46  ;;  %v1168_v51 = vld [vmem:[%s2010_s1 + $0x1c4] ss:$8 sps:$4 sm:$0xff]   ;;  %v1172_v53 = vld [vmem:[%s2010_s1 + $0x1c0] ss:$8 sps:$4 sm:$0xff]   ;;  %v1174_v55 = vld [vmem:[%s2010_s1 + $0x1d4] ss:$8 sps:$4 sm:$0xff]  }
  0x13   :  { %275 = vmatpush1.bf16.msra.mxu1 %v1124_v18  ;;  %v1462_v52 = vld [vmem:[%s2010_s1 + $0xc4] ss:$8 sps:$4 sm:$0xff]   ;;  %v1473_v54 = vld [vmem:[%s2010_s1 + $0xc0] ss:$8 sps:$4 sm:$0xff]   ;;  %v1482_v56 = vld [vmem:[%s2010_s1 + $0xd4] ss:$8 sps:$4 sm:$0xff]  }
  0x14   :  { %518 = vmatpush1.bf16.msra.mxu0 %v1312_v19  ;;  %276 = vmatprep.subr.bf16.mxu1 %v1126_v20  ;;  %v1178_v57 = vld [vmem:[%s2010_s1 + $0x1d0] ss:$8 sps:$4 sm:$0xff]   ;;  %v1180_v59 = vld [vmem:[%s2010_s1 + $0x1e4] ss:$8 sps:$4 sm:$0xff]   ;;  %v1184_v61 = vld [vmem:[%s2010_s1 + $0x1e0] ss:$8 sps:$4 sm:$0xff]  }
  0x15   :  { %519 = vmatprep.subr.bf16.mxu0 %v1322_v21  ;;  %298 = vmatprep.mubr.bf16.mxu1 %v1453_v50  ;;  %v1491_v58 = vld [vmem:[%s2010_s1 + $0xd0] ss:$8 sps:$4 sm:$0xff]   ;;  %v1500_v60 = vld [vmem:[%s2010_s1 + $0xe4] ss:$8 sps:$4 sm:$0xff]   ;;  %v1509_v62 = vld [vmem:[%s2010_s1 + $0xe0] ss:$8 sps:$4 sm:$0xff]  }
  0x16   :  { %541 = vmatprep.mubr.bf16.mxu0 %v1453_v50  ;;  %v1186_v63 = vld [vmem:[%s2010_s1 + $0x1f4] ss:$8 sps:$4 sm:$0xff]   ;;  %v1190_v2 = vld [vmem:[%s2010_s1 + $0x1f0] ss:$8 sps:$4 sm:$0xff]   ;;  %v1547_v12 = vld [vmem:[%s2011_s0 + $0x28] sm:$0xff] }
  0x17   :  { %277 = vmatpush1.bf16.msra.mxu1 %v1130_v22  ;;  %v1518_v0 = vld [vmem:[%s2010_s1 + $0xf4] ss:$8 sps:$4 sm:$0xff]   ;;  %v1527_v4 = vld [vmem:[%s2010_s1 + $0xf0] ss:$8 sps:$4 sm:$0xff]   ;;  %v1568_v18 = vld [vmem:[%s2011_s0 + $0x20] sm:$0xff] }
  0x18   :  { %520 = vmatpush1.bf16.msra.mxu0 %v1331_v23  ;;  %278 = vmatprep.subr.bf16.mxu1 %v1132_v24  ;;  %v1537_v8 = vld [vmem:[%s2011_s0 + $0x10] sm:$0xff]  ;;  %v1552_v14 = vld [vmem:[%s2011_s0 + $0x38] sm:$0xff]  ;;  %v1586_v20 = vld [vmem:[%s2011_s0 + $0x48] sm:$0xff] }
  0x19   :  { %521 = vmatprep.subr.bf16.mxu0 %v1340_v25  ;;  %v1542_v10 = vpack.c.bf16 %v1537_v8, %v1532_v6  ;;  %v1559_v16 = vpack.c.bf16 %v1552_v14, %v1547_v12  ;;  %v1591_v22 = vld [vmem:[%s2011_s0 + $0x58] sm:$0xff]  ;;  %v24_v24 = vld [vmem:[%s2011_s0 + $0x68] sm:$0xff] }
  0x1b   :  { %279 = vmatpush1.bf16.msra.mxu1 %v1136_v26  ;;  %v26_v26 = vld [vmem:[%s2011_s0 + $0x78] sm:$0xff] }
  0x1c   :  { %522 = vmatpush1.bf16.msra.mxu0 %v1348_v27  ;;  %280 = vmatprep.subr.bf16.mxu1 %v1138_v28  ;;  %v1640_v28 = vld [vmem:[%s2011_s0 + $0x60] sm:$0xff] }
  0x1d   :  { %523 = vmatprep.subr.bf16.mxu0 %v1358_v29 }
  0x1f   :  { %281 = vmatpush1.bf16.msra.mxu1 %v1142_v30  ;;  %v1661_v30 = vld [vmem:[%s2011_s0 + $0x98] sm:$0xff] }
  0x20   :  { %524 = vmatpush1.bf16.msra.mxu0 %v1367_v31  ;;  %282 = vmatprep.subr.bf16.mxu1 %v1144_v32 }
  0x21   :  { %525 = vmatprep.subr.bf16.mxu0 %v1376_v33 }
  0x23   :  { %283 = vmatpush1.bf16.msra.mxu1 %v1148_v34  ;;  %v595_v34 = vunpack.c.h.bf16 %v1453_v50 }
  0x24   :  { %526 = vmatpush1.bf16.msra.mxu0 %v1384_v35  ;;  %284 = vmatprep.subr.bf16.mxu1 %v1150_v36 }
  0x25   :  { %527 = vmatprep.subr.bf16.mxu0 %v1394_v37 }
  0x27   :  { %285 = vmatpush1.bf16.msra.mxu1 %v1154_v38 }
  0x28   :  { %528 = vmatpush1.bf16.msra.mxu0 %v1403_v39  ;;  %286 = vmatprep.subr.bf16.mxu1 %v1156_v40 }
  0x29   :  { %529 = vmatprep.subr.bf16.mxu0 %v1412_v41 }
  0x2b   :  { %287 = vmatpush1.bf16.msra.mxu1 %v1160_v42 }
  0x2c   :  { %530 = vmatpush1.bf16.msra.mxu0 %v1420_v43  ;;  %288 = vmatprep.subr.bf16.mxu1 %v1162_v44 }
  0x2d   :  { %531 = vmatprep.subr.bf16.mxu0 %v1430_v45 }
  0x2f   :  { %289 = vmatpush1.bf16.msra.mxu1 %v1166_v48 }
  0x30   :  { %532 = vmatpush1.bf16.msra.mxu0 %v1449_v49  ;;  %290 = vmatprep.subr.bf16.mxu1 %v1168_v51 }
  0x31   :  { %533 = vmatprep.subr.bf16.mxu0 %v1462_v52 }
  0x33   :  { %291 = vmatpush1.bf16.msra.mxu1 %v1172_v53 }
  0x34   :  { %534 = vmatpush1.bf16.msra.mxu0 %v1473_v54  ;;  %292 = vmatprep.subr.bf16.mxu1 %v1174_v55 }
  0x35   :  { %535 = vmatprep.subr.bf16.mxu0 %v1482_v56 }
  0x37   :  { %293 = vmatpush1.bf16.msra.mxu1 %v1178_v57 }
  0x38   :  { %536 = vmatpush1.bf16.msra.mxu0 %v1491_v58  ;;  %294 = vmatprep.subr.bf16.mxu1 %v1180_v59 }
  0x39   :  { %537 = vmatprep.subr.bf16.mxu0 %v1500_v60 }
  0x3b   :  { %295 = vmatpush1.bf16.msra.mxu1 %v1184_v61 }
  0x3c   :  { %538 = vmatpush1.bf16.msra.mxu0 %v1509_v62  ;;  %296 = vmatprep.subr.bf16.mxu1 %v1186_v63 }
  0x3d   :  { %539 = vmatprep.subr.bf16.mxu0 %v1518_v0 }
  0x3f   :  { %297 = vmatpush1.bf16.msra.mxu1 %v1190_v2 }
  0x40   :  { %540 = vmatpush1.bf16.msra.mxu0 %v1527_v4  ;;  %1024 = vmatprep.subr.bf16.mxu1 %v1233_v1 }
  0x41   :  { %642 = vmatprep.subr.bf16.mxu0 %v1233_v1  ;;  %v1573_v1 = vld [vmem:[%s2011_s0 + $0x30] sm:$0xff] }
  0x42   :  { %299 = vmatmul.mubr.bf16.vlgmr.msra.gmra.mrb[0].mxu1 %v1542_v10 }
  0x43   :  { %542 = vmatmul.mubr.bf16.vlgmr.msra.gmra.mrb[0].mxu0 %v1542_v10  ;;  %1040 = vmatpush1.bf16.msra.mxu1 %v1241_v3 }
  0x44   :  { %643 = vmatpush1.bf16.msra.mxu0 %v1241_v3  ;;  %1025 = vmatprep.subr.bf16.mxu1 %v1251_v5  ;;  %v1581_v3 = vpack.c.bf16 %v1573_v1, %v1568_v18 }
  0x45   :  { %644 = vmatprep.subr.bf16.mxu0 %v1251_v5  ;;  %308 = vmatprep.mubr.bf16.mxu1 %v1559_v16  ;;  %v1599_v5 = vpack.c.bf16 %v1591_v22, %v1586_v20 }
  0x46   :  { %551 = vmatprep.mubr.bf16.mxu0 %v1559_v16  ;;  %v596_v57 = vunpack.c.l.bf16 %v1581_v3  ;;  %v598_v59 = vunpack.c.h.bf16 %v1581_v3 }
  0x47   :  { %1041 = vmatpush1.bf16.msra.mxu1 %v1259_v7  ;;  %v601_v2 = vunpack.c.l.bf16 %v1599_v5 }
  0x48   :  { %645 = vmatpush1.bf16.msra.mxu0 %v1259_v7  ;;  %1026 = vmatprep.subr.bf16.mxu1 %v1268_v9  ;;  %v1608_v7 = vld [vmem:[%s2011_s0 + $0x40] sm:$0xff] }
  0x49   :  { %646 = vmatprep.subr.bf16.mxu0 %v1268_v9  ;;  %v1613_v9 = vld [vmem:[%s2011_s0 + $0x50] sm:$0xff] }
  0x4a   :  { %309 = vmatmul.mubr.bf16.gmra.mrb[4].mxu1 %v1581_v3 }
  0x4b   :  { %552 = vmatmul.mubr.bf16.gmra.mrb[4].mxu0 %v1581_v3  ;;  %1042 = vmatpush1.bf16.msra.mxu1 %v1276_v11 }
  0x4c   :  { %647 = vmatpush1.bf16.msra.mxu0 %v1276_v11  ;;  %1027 = vmatprep.subr.bf16.mxu1 %v1286_v13  ;;  %v1621_v11 = vpack.c.bf16 %v1613_v9, %v1608_v7 }
  0x4d   :  { %648 = vmatprep.subr.bf16.mxu0 %v1286_v13  ;;  %318 = vmatprep.mubr.bf16.mxu1 %v1599_v5  ;;  %v103_v13 = vpack.c.bf16 %v26_v26, %v24_v24 }
  0x4e   :  { %561 = vmatprep.mubr.bf16.mxu0 %v1599_v5 }
  0x4f   :  { %1043 = vmatpush1.bf16.msra.mxu1 %v1295_v15  ;;  %v605_v36 = vunpack.c.l.bf16 %v103_v13  ;;  %v607_v38 = vunpack.c.h.bf16 %v103_v13 }
  0x50   :  { %649 = vmatpush1.bf16.msra.mxu0 %v1295_v15  ;;  %1028 = vmatprep.subr.bf16.mxu1 %v1304_v17  ;;  %v1645_v15 = vld [vmem:[%s2011_s0 + $0x70] sm:$0xff] }
  0x51   :  { %650 = vmatprep.subr.bf16.mxu0 %v1304_v17  ;;  %v1651_v17 = vpack.c.bf16 %v1645_v15, %v1640_v28  ;;  %v625_v42 = vsub.f32 %v24_v24, %v605_v36  ;;  %v627_v44 = vsub.f32 %v26_v26, %v607_v38 }
  0x52   :  { %319 = vmatmul.mubr.bf16.gmra.mrb[8].mxu1 %v1621_v11 }
  0x53   :  { %562 = vmatmul.mubr.bf16.gmra.mrb[8].mxu0 %v1621_v11  ;;  %1044 = vmatpush1.bf16.msra.mxu1 %v1312_v19 }
  0x54   :  { %651 = vmatpush1.bf16.msra.mxu0 %v1312_v19  ;;  %1029 = vmatprep.subr.bf16.mxu1 %v1322_v21  ;;  %v1656_v19 = vld [vmem:[%s2011_s0 + $0x88] sm:$0xff] }
  0x55   :  { %652 = vmatprep.subr.bf16.mxu0 %v1322_v21  ;;  %328 = vmatprep.mubr.bf16.mxu1 %v103_v13  ;;  %v593_v21 = vunpack.c.l.bf16 %v1453_v50  ;;  %v1670_v32 = vpack.c.bf16 %v1661_v30, %v1656_v19 }
  0x56   :  { %571 = vmatprep.mubr.bf16.mxu0 %v103_v13 }
  0x57   :  { %1045 = vmatpush1.bf16.msra.mxu1 %v1331_v23  ;;  %v613_v40 = vsub.f32 %v1435_v46, %v593_v21  ;;  %v639_v46 = vpack.c.bf16 %v627_v44, %v625_v42 }
  0x58   :  { %653 = vmatpush1.bf16.msra.mxu0 %v1331_v23  ;;  %1030 = vmatprep.subr.bf16.mxu1 %v1340_v25  ;;  %v1680_v23 = vld [vmem:[%s2011_s0 + $0x80] sm:$0xff] }
  0x59   :  { %654 = vmatprep.subr.bf16.mxu0 %v1340_v25  ;;  %v1685_v25 = vld [vmem:[%s2011_s0 + $0x90] sm:$0xff] }
  0x5a   :  { %329 = vmatmul.mubr.bf16.gmra.mrb[12].mxu1 %v1651_v17  ;;  %v1695_v48 = vpack.c.bf16 %v1685_v25, %v1680_v23 }
  0x5b   :  { %572 = vmatmul.mubr.bf16.gmra.mrb[12].mxu0 %v1651_v17  ;;  %1046 = vmatpush1.bf16.msra.mxu1 %v1348_v27 }
  0x5c   :  { %655 = vmatpush1.bf16.msra.mxu0 %v1348_v27  ;;  %1031 = vmatprep.subr.bf16.mxu1 %v1358_v29  ;;  %v615_v27 = vsub.f32 %v1440_v47, %v595_v34  ;;  %v610_v61 = vunpack.c.h.bf16 %v1695_v48 }
  0x5d   :  { %656 = vmatprep.subr.bf16.mxu0 %v1358_v29  ;;  %338 = vmatprep.mubr.bf16.mxu1 %v1670_v32 }
  0x5e   :  { %581 = vmatprep.mubr.bf16.mxu0 %v1670_v32  ;;  %v633_v29 = vpack.c.bf16 %v615_v27, %v613_v40 }
  0x5f   :  { %1047 = vmatpush1.bf16.msra.mxu1 %v1367_v31 }
  0x60   :  { %657 = vmatpush1.bf16.msra.mxu0 %v1367_v31  ;;  %1032 = vmatprep.subr.bf16.mxu1 %v1376_v33  ;;  %v592_v31 = vunpack.c.l.bf16 %v1542_v10 }
  0x61   :  { %658 = vmatprep.subr.bf16.mxu0 %v1376_v33  ;;  %v594_v33 = vunpack.c.h.bf16 %v1542_v10 }
  0x62   :  { %339 = vmatmul.mubr.bf16.gmra.mrb[16].mxu1 %v1695_v48  ;;  %v612_v47 = vsub.f32 %v1532_v6, %v592_v31  ;;  %v616_v6 = vsub.f32 %v1568_v18, %v596_v57  ;;  %v602_v18 = vunpack.c.h.bf16 %v1621_v11 }
  0x63   :  { %582 = vmatmul.mubr.bf16.gmra.mrb[16].mxu0 %v1695_v48  ;;  %1048 = vmatpush1.bf16.msra.mxu1 %v1384_v35 }
  0x64   :  { %659 = vmatpush1.bf16.msra.mxu0 %v1384_v35  ;;  %1033 = vmatprep.subr.bf16.mxu1 %v1394_v37  ;;  %v604_v35 = vunpack.c.l.bf16 %v1651_v17  ;;  %v622_v26 = vsub.f32 %v1613_v9, %v602_v18 }
  0x65   :  { %660 = vmatprep.subr.bf16.mxu0 %v1394_v37  ;;  %674 = vmatprep.mubr.bf16.mxu0 %v633_v29  ;;  %v606_v37 = vunpack.c.h.bf16 %v1651_v17 }
  0x66   :  { %704 = vmatprep.mubr.bf16.mxu1 %v639_v46  ;;  %v624_v50 = vsub.f32 %v1640_v28, %v604_v35 }
  0x67   :  { %1049 = vmatpush1.bf16.msra.mxu1 %v1403_v39  ;;  %v626_v51 = vsub.f32 %v1645_v15, %v606_v37 }
  0x68   :  { %661 = vmatpush1.bf16.msra.mxu0 %v1403_v39  ;;  %1034 = vmatprep.subr.bf16.mxu1 %v1412_v41  ;;  %v597_v39 = vunpack.c.l.bf16 %v1559_v16 }
  0x69   :  { %662 = vmatprep.subr.bf16.mxu0 %v1412_v41  ;;  %v599_v41 = vunpack.c.h.bf16 %v1559_v16 }
  0x6b   :  { %1050 = vmatpush1.bf16.msra.mxu1 %v1420_v43  ;;  %v619_v53 = vsub.f32 %v1552_v14, %v599_v41 }
  0x6c   :  { %663 = vmatpush1.bf16.msra.mxu0 %v1420_v43  ;;  %1035 = vmatprep.subr.bf16.mxu1 %v1430_v45  ;;  %v609_v43 = vunpack.c.l.bf16 %v1670_v32 }
  0x6d   :  { %664 = vmatprep.subr.bf16.mxu0 %v1430_v45  ;;  %v611_v45 = vunpack.c.h.bf16 %v1670_v32 }
  0x6f   :  { %1051 = vmatpush1.bf16.msra.mxu1 %v1449_v49  ;;  %v631_v55 = vsub.f32 %v1661_v30, %v611_v45 }
  0x70   :  { %665 = vmatpush1.bf16.msra.mxu0 %v1449_v49  ;;  %1036 = vmatprep.subr.bf16.mxu1 %v1462_v52  ;;  %v614_v49 = vsub.f32 %v1537_v8, %v594_v33  ;;  %v618_v8 = vsub.f32 %v1573_v1, %v598_v59 }
  0x71   :  { %666 = vmatprep.subr.bf16.mxu0 %v1462_v52  ;;  %v617_v52 = vsub.f32 %v1547_v12, %v597_v39  ;;  %v630_v12 = vsub.f32 %v1685_v25, %v610_v61 }
  0x72   :  { %v634_v16 = vpack.c.bf16 %v618_v8, %v616_v6 }
  0x73   :  { %1052 = vmatpush1.bf16.msra.mxu1 %v1473_v54 }
  0x74   :  { %667 = vmatpush1.bf16.msra.mxu0 %v1473_v54  ;;  %1037 = vmatprep.subr.bf16.mxu1 %v1482_v56  ;;  %v629_v54 = vsub.f32 %v1656_v19, %v609_v43 }
  0x75   :  { %668 = vmatprep.subr.bf16.mxu0 %v1482_v56  ;;  %v632_v56 = vpack.c.bf16 %v614_v49, %v612_v47 }
  0x76   :  { %v641_v63 = vpack.c.bf16 %v631_v55, %v629_v54  ;;  %v745_v54 = vlaneseq }
  0x77   :  { %1053 = vmatpush1.bf16.msra.mxu1 %v1491_v58 }
  0x78   :  { %669 = vmatpush1.bf16.msra.mxu0 %v1491_v58  ;;  %1038 = vmatprep.subr.bf16.mxu1 %v1500_v60  ;;  %v638_v58 = vpack.c.bf16 %v626_v51, %v624_v50  ;;  %v1793_v8 = vand.u32 127, %v745_v54 }
  0x79   :  { %670 = vmatprep.subr.bf16.mxu0 %v1500_v60  ;;  %v608_v60 = vunpack.c.l.bf16 %v1695_v48 }
  0x7a   :  { %vm747_vm0 = vcmp.eq.s32.totalorder %v1793_v8, 0 }
  0x7b   :  { %1054 = vmatpush1.bf16.msra.mxu1 %v1509_v62  ;;  %v628_v10 = vsub.f32 %v1680_v23, %v608_v60 }
  0x7c   :  { %671 = vmatpush1.bf16.msra.mxu0 %v1509_v62  ;;  %1039 = vmatprep.subr.bf16.mxu1 %v1518_v0  ;;  %v635_v62 = vpack.c.bf16 %v619_v53, %v617_v52 }
  0x7d   :  { %672 = vmatprep.subr.bf16.mxu0 %v1518_v0  ;;  %v603_v0 = vunpack.c.h.bf16 %v1599_v5  ;;  %v640_v3 = vpack.c.bf16 %v630_v12, %v628_v10  ;;  %v600_v5 = vunpack.c.l.bf16 %v1621_v11 }
  0x7f   :  { %1055 = vmatpush1.bf16.msra.mxu1 %v1527_v4  ;;  %v623_v14 = vsub.f32 %v1591_v22, %v603_v0  ;;  %v620_v1 = vsub.f32 %v1608_v7, %v600_v5 }
  0x80   :  { %673 = vmatpush1.bf16.msra.mxu0 %v1527_v4  ;;  %v621_v4 = vsub.f32 %v1586_v20, %v601_v2 }
  0x81   :  { %v636_v13 = vpack.c.bf16 %v622_v26, %v620_v1 }
  0x82   :  { %705 = vmatmul.mubr.bf16.vlgmr.msra.gmra.mrb[20].mxu1 %v638_v58  ;;  %v637_v24 = vpack.c.bf16 %v623_v14, %v621_v4 }
  0x83   :  { %675 = vmatmul.mubr.bf16.vlgmr.msra.gmra.mrb[0].mxu0 %v632_v56  ;;  %714 = vmatprep.mubr.bf16.mxu1 %v641_v63 }
  0x84   :  { %684 = vmatprep.mubr.bf16.mxu0 %v635_v62 }
  0x8a   :  { %715 = vmatmul.mubr.bf16.gmra.mrb[24].mxu1 %v640_v3 }
  0x8b   :  { %685 = vmatmul.mubr.bf16.gmra.mrb[4].mxu0 %v634_v16 }
  0x8c   :  { %694 = vmatprep.mubr.bf16.mxu0 %v637_v24 }
  0x93   :  { %695 = vmatmul.mubr.bf16.gmra.mrb[8].mxu0 %v636_v13 }
 0x115   :  { %v300_v28 = vpop.f32.mrb[0].mxu1 }
 0x116   :  { %v302_v20 = vpop.f32.mrb[1].mxu1 }
 0x117   :  { %v304_v15 = vpop.f32.mrb[2].mxu1 }
 0x118   :  { %v306_v22 = vpop.f32.mrb[3].mxu1 }
 0x11d   :  { %v1765_v17 = vpop.f32.mrb[4].mxu1 }
 0x11e   :  { %v1767_v19 = vpop.f32.mrb[5].mxu1 }
 0x11f   :  { %v1769_v30 = vpop.f32.mrb[6].mxu1 }
 0x120   :  { %v1771_v11 = vpop.f32.mrb[7].mxu1 }
 0x125   :  { %v1773_v21 = vpop.f32.mrb[8].mxu1 }
 0x126   :  { %v1775_v7 = vpop.f32.mrb[9].mxu1 }
 0x127   :  { %v1777_v9 = vpop.f32.mrb[10].mxu1 }
 0x128   :  { %v1779_v32 = vpop.f32.mrb[11].mxu1 }
 0x12d   :  { %v330_v34 = vpop.f32.mrb[12].mxu1 }
 0x12e   :  { %v573_v36 = vpop.f32.mrb[12].mxu0  ;;  %v332_v23 = vpop.f32.mrb[13].mxu1 }
 0x12f   :  { %v574_v38 = vadd.f32 %v573_v36, %v330_v34  ;;  %v575_v25 = vpop.f32.mrb[13].mxu0  ;;  %v334_v27 = vpop.f32.mrb[14].mxu1 }
 0x130   :  { %v576_v40 = vadd.f32 %v575_v25, %v332_v23  ;;  %v577_v42 = vpop.f32.mrb[14].mxu0  ;;  %v336_v48 = vpop.f32.mrb[15].mxu1 }
 0x131   :  { %v578_v44 = vadd.f32 %v577_v42, %v334_v27  ;;  %v579_v29 = vpop.f32.mrb[15].mxu0 }
 0x132   :  { %v580_v46 = vadd.f32 %v579_v29, %v336_v48 }
 0x135   :  { %v340_v31 = vpop.f32.mrb[16].mxu1 }
 0x136   :  { %v583_v33 = vpop.f32.mrb[16].mxu0  ;;  %v342_v37 = vpop.f32.mrb[17].mxu1 }
 0x137   :  { %v584_v35 = vadd.f32 %v583_v33, %v340_v31  ;;  %v585_v39 = vpop.f32.mrb[17].mxu0  ;;  %v344_v43 = vpop.f32.mrb[18].mxu1 }
 0x138   :  { %v586_v41 = vadd.f32 %v585_v39, %v342_v37  ;;  %v587_v45 = vpop.f32.mrb[18].mxu0  ;;  %v346_v49 = vpop.f32.mrb[19].mxu1 }
 0x139   :  { %v1781_v47 = vadd.f32 %v587_v45, %v344_v43  ;;  %v589_v50 = vpop.f32.mrb[19].mxu0 }
 0x13a   :  { %v1783_v51 = vadd.f32 %v589_v50, %v346_v49 }
 0x155   :  { %v706_v53 = vpop.f32.mrb[20].mxu1 }
 0x156   :  { %v676_v52 = vpop.f32.mrb[0].mxu0  ;;  %v1787_v56 = vadd.f32 %v706_v53, %v574_v38  ;;  %v708_v58 = vpop.f32.mrb[21].mxu1 }
 0x157   :  { %v1785_v55 = vadd.f32 %v676_v52, %v300_v28  ;;  %v678_v57 = vpop.f32.mrb[1].mxu0  ;;  %v738_v60 = vadd.f32 %v708_v58, %v576_v40  ;;  %v710_v62 = vpop.f32.mrb[22].mxu1 }
 0x158   :  { %v1057_v59 = vadd.f32 %v678_v57, %v302_v20  ;;  %v680_v61 = vpop.f32.mrb[2].mxu0  ;;  %v764_v2 = vmul.f32 %v1787_v56, %v1787_v56  ;;  %v712_v6 = vpop.f32.mrb[23].mxu1  ;;  %v1797_v14 = vadd.f32 %v710_v62, %v578_v44  ;;  %v754_v39 = vand.u32 2147483647, %v1787_v56 }
 0x159   :  { %v758_v63 = vmul.f32 %v1785_v55, %v1785_v55  ;;  %v682_v0 = vpop.f32.mrb[3].mxu0  ;;  %v774_v12 = vmul.f32 %v738_v60, %v738_v60  ;;  %v1795_v4 = vadd.f32 %v680_v61, %v304_v15  ;;  %v740_v3 = vadd.f32 %v712_v6, %v580_v46 }
 0x15a   :  { %v768_v10 = vmul.f32 %v1057_v59, %v1057_v59  ;;  %v1059_v16 = vadd.f32 %v682_v0, %v306_v22  ;;  %v765_v1 = vmul.f32 %v1797_v14, %v1797_v14  ;;  %v868_v26 = vand.u32 2147483647, %v1057_v59 }
 0x15b   :  { %v1801_v18 = vadd.f32 %v774_v12, %v764_v2  ;;  %v759_v24 = vmul.f32 %v1795_v4, %v1795_v4  ;;  %v874_v13 = vand.u32 2147483647, %v738_v60  ;;  %v775_v34 = vmul.f32 %v740_v3, %v740_v3 }
 0x15c   :  { %v1799_v5 = vadd.f32 %v768_v10, %v758_v63  ;;  %v769_v28 = vmul.f32 %v1059_v16, %v1059_v16  ;;  %v869_v22 = vand.u32 2147483647, %v1059_v16  ;;  %v748_v23 = vand.u32 2147483647, %v1785_v55 }
 0x15d   :  { %v716_v15 = vpop.f32.mrb[24].mxu1  ;;  %1192 = vrsqrt.f32 %v1801_v18  ;;  %v1819_v29 = vadd.f32 %v775_v34, %v765_v1  ;;  %v749_v43 = vand.u32 2147483647, %v1795_v4  ;;  %v755_v45 = vand.u32 2147483647, %v1797_v14 }
 0x15e   :  { %v686_v20 = vpop.f32.mrb[4].mxu0  ;;  %v718_v38 = vpop.f32.mrb[25].mxu1  ;;  %v1810_v25 = vadd.f32 %v769_v28, %v759_v24  ;;  %v1815_v27 = vadd.f32 %v716_v15, %v584_v35  ;;  %v879_v48 = vsel %vm747_vm0, %v869_v22, 0.0  ;;  %v884_v35 = vsel %vm747_vm0, %v874_v13, 0.0 }
 0x15f   :  { %v688_v36 = vpop.f32.mrb[5].mxu0  ;;  %v1813_v40 = vadd.f32 %v686_v20, %v1765_v17  ;;  %v720_v44 = vpop.f32.mrb[26].mxu1  ;;  %v1822_v31 = vadd.f32 %v718_v38, %v586_v41  ;;  %v1827_v17 = vsel %vm747_vm0, %v868_v26, 0.0  ;;  %v875_v41 = vand.u32 2147483647, %v740_v3 }
 0x160   :  { %v690_v42 = vpop.f32.mrb[6].mxu0  ;;  %v1061_v46 = vadd.f32 %v688_v36, %v1767_v19  ;;  %v722_v37 = vpop.f32.mrb[27].mxu1  ;;  %1194 = vrsqrt.f32 %v1810_v25  ;;  %v894_v19 = vsub.f32 %v879_v48, %v884_v35  ;;  %vm832_vm1 = vcmp.eq.f32.partialorder %v1801_v18, inf }
 0x161   :  { %v692_v33 = vpop.f32.mrb[7].mxu0  ;;  %1196 = vrsqrt.f32 %v1819_v29  ;;  %v760_v49 = vmul.f32 %v1813_v40, %v1813_v40  ;;  %vm834_vm2 = vcmp.eq.f32.partialorder %v1801_v18, 0.0  ;;  %v835_v52 = vand.u32 2147483648, %v1801_v18 }
 0x162   :  { %1198 = vrsqrt.f32 %v1799_v5  ;;  %v770_v50 = vmul.f32 %v1061_v46, %v1061_v46  ;;  %v766_v53 = vmul.f32 %v1815_v27, %v1815_v27  ;;  %vm797_vm3 = vcmp.eq.f32.partialorder %v1810_v25, inf }
 0x163   :  { %v870_v56 = vand.u32 2147483647, %v1061_v46  ;;  %v776_v57 = vmul.f32 %v1822_v31, %v1822_v31  ;;  %vm799_vm4 = vcmp.eq.f32.partialorder %v1810_v25, 0.0  ;;  %v1850_v59 = vadd.f32 %v690_v42, %v1769_v30 }
 0x164   :  { %v1844_v54 = vadd.f32 %v770_v50, %v760_v49  ;;  %v1853_v60 = vadd.f32 %v720_v44, %v1781_v47  ;;  %v1063_v61 = vadd.f32 %v692_v33, %v1771_v11  ;;  %v1857_v62 = vadd.f32 %v722_v37, %v1783_v51 }
 0x165   :  { %v800_v2 = vand.u32 2147483648, %v1810_v25  ;;  %v885_v0 = vsel %vm747_vm0, %v875_v41, 0.0  ;;  %v750_v6 = vand.u32 2147483647, %v1813_v40  ;;  %v904_v47 = vmul.f32 %v894_v19, %v894_v19 }
 0x166   :  { %v696_v58 = vpop.f32.mrb[8].mxu0  ;;  %1200 = vrsqrt.f32 %v1844_v54  ;;  %v756_v12 = vand.u32 2147483647, %v1815_v27  ;;  %v880_v11 = vsel %vm747_vm0, %v870_v56, 0.0  ;;  %v1869_v51 = vadd.f32 %v776_v57, %v766_v53 }
 0x167   :  { %v698_v63 = vpop.f32.mrb[9].mxu0  ;;  %v1193_v10 = vpop.eup %1192  ;;  %vm839_vm5 = vcmp.eq.f32.partialorder %v1819_v29, inf  ;;  %v895_v24 = vsub.f32 %v880_v11, %v885_v0  ;;  %v761_v1 = vmul.f32 %v1850_v59, %v1850_v59  ;;  %vm841_vm6 = vcmp.eq.f32.partialorder %v1819_v29, 0.0 }
 0x168   :  { %v1864_v30 = vpop.f32.mrb[10].mxu0  ;;  %v831_v3 = vmul.f32 %v1193_v10, %v1801_v18  ;;  %1202 = vrsqrt.f32 %v1869_v51  ;;  %v876_v26 = vand.u32 2147483647, %v1822_v31  ;;  %v771_v13 = vmul.f32 %v1063_v61, %v1063_v61 }
 0x169   :  { %v702_v16 = vpop.f32.mrb[11].mxu0  ;;  %vm804_vm7 = vcmp.eq.f32.partialorder %v1844_v54, inf  ;;  %v842_v15 = vand.u32 2147483648, %v1819_v29  ;;  %v767_v22 = vmul.f32 %v1853_v60, %v1853_v60  ;;  %v871_v44 = vand.u32 2147483647, %v1063_v61 }
 0x16a   :  { %v1195_v28 = vpop.eup %1194  ;;  %v833_v20 = vsel %vm832_vm1, %v1801_v18, %v831_v3  ;;  %v1888_v42 = vadd.f32 %v771_v13, %v761_v1  ;;  %vm806_vm8 = vcmp.eq.f32.partialorder %v1844_v54, 0.0  ;;  %v777_v33 = vmul.f32 %v1857_v62, %v1857_v62 }
 0x16b   :  { %v1197_v34 = vpop.eup %1196  ;;  %v796_v36 = vmul.f32 %v1195_v28, %v1810_v25  ;;  %v836_v38 = vsel %vm834_vm2, %v835_v52, %v833_v20  ;;  %v807_v18 = vand.u32 2147483648, %v1844_v54  ;;  %v886_v35 = vsel %vm747_vm0, %v876_v26, 0.0 }
 0x16c   :  { %v1199_v48 = vpop.eup %1198  ;;  %v864_v46 = vsel %vm747_vm0, %v754_v39, %v836_v38  ;;  %v838_v31 = vmul.f32 %v1197_v34, %v1819_v29  ;;  %1204 = vrsqrt.f32 %v1888_v42  ;;  %v751_v41 = vand.u32 2147483647, %v1850_v59 }
 0x16d   :  { %v798_v37 = vsel %vm797_vm3, %v1810_v25, %v796_v36  ;;  %v881_v49 = vsel %vm747_vm0, %v871_v44, 0.0  ;;  %v1917_v25 = vadd.f32 %v777_v33, %v767_v22  ;;  %v757_v61 = vand.u32 2147483647, %v1853_v60 }
 0x16e   :  { %v801_v39 = vsel %vm799_vm4, %v800_v2, %v798_v37  ;;  %v840_v19 = vsel %vm839_vm5, %v1819_v29, %v838_v31  ;;  %v896_v53 = vsub.f32 %v881_v49, %v886_v35  ;;  %v1925_v4 = vadd.f32 %v696_v58, %v1773_v21 }
 0x16f   :  { %v859_v50 = vsel %vm747_vm0, %v749_v43, %v801_v39  ;;  %v843_v52 = vsel %vm841_vm6, %v842_v15, %v840_v19  ;;  %vm846_vm9 = vcmp.eq.f32.partialorder %v1869_v51, inf  ;;  %1206 = vrsqrt.f32 %v1917_v25 }
 0x170   :  { %v1201_v56 = vpop.eup %1200  ;;  %v889_v57 = vsub.f32 %v859_v50, %v864_v46  ;;  %v865_v59 = vsel %vm747_vm0, %v755_v45, %v843_v52  ;;  %v1065_v29 = vadd.f32 %v698_v63, %v1775_v7  ;;  %v905_v0 = vmul.f32 %v895_v24, %v895_v24 }
 0x171   :  { %v803_v43 = vmul.f32 %v1201_v56, %v1844_v54  ;;  %vm848_vm10 = vcmp.eq.f32.partialorder %v1869_v51, 0.0  ;;  %v762_v14 = vmul.f32 %v1925_v4, %v1925_v4  ;;  %v849_v58 = vand.u32 2147483648, %v1869_v51 }
 0x172   :  { %v899_v2 = vmul.f32 %v889_v57, %v889_v57  ;;  %v1203_v45 = vpop.eup %1202  ;;  %v877_v10 = vand.u32 2147483647, %v1857_v62  ;;  %v772_v11 = vmul.f32 %v1065_v29, %v1065_v29  ;;  %v872_v24 = vand.u32 2147483647, %v1065_v29 }
 0x173   :  { %v805_v21 = vsel %vm804_vm7, %v1844_v54, %v803_v43  ;;  %v845_v63 = vmul.f32 %v1203_v45, %v1869_v51  ;;  %v1950_v13 = vadd.f32 %v1864_v30, %v1777_v9  ;;  %v1067_v62 = vadd.f32 %v702_v16, %v1779_v32 }
 0x174   :  { %v1939_v3 = vadd.f32 %v904_v47, %v899_v2  ;;  %v808_v7 = vsel %vm806_vm8, %v807_v18, %v805_v21  ;;  %v782_v26 = vadd.f32 %v772_v11, %v762_v14  ;;  %vm811_vm11 = vcmp.eq.f32.partialorder %v1888_v42, inf }
 0x175   :  { %v860_v1 = vsel %vm747_vm0, %v750_v6, %v808_v7  ;;  %v847_v54 = vsel %vm846_vm9, %v1869_v51, %v845_v63  ;;  %v882_v40 = vsel %vm747_vm0, %v872_v24, 0.0  ;;  %vm813_vm12 = vcmp.eq.f32.partialorder %v1888_v42, 0.0 }
 0x176   :  { %v890_v47 = vsub.f32 %v860_v1, %v865_v59  ;;  %v1205_v28 = vpop.eup %1204  ;;  %v850_v6 = vsel %vm848_vm10, %v849_v58, %v847_v54  ;;  %1208 = vrsqrt.f32 %v782_v26  ;;  %v789_v9 = vmul.f32 %v1199_v48, %v1799_v5 }
 0x177   :  { %v810_v30 = vmul.f32 %v1205_v28, %v1888_v42  ;;  %v866_v16 = vsel %vm747_vm0, %v756_v12, %v850_v6  ;;  %v887_v20 = vsel %vm747_vm0, %v877_v10, 0.0  ;;  %v814_v15 = vand.u32 2147483648, %v1888_v42 }
 0x178   :  { %v900_v32 = vmul.f32 %v890_v47, %v890_v47  ;;  %v897_v22 = vsub.f32 %v882_v40, %v887_v20  ;;  %v763_v51 = vmul.f32 %v1950_v13, %v1950_v13  ;;  %v773_v34 = vmul.f32 %v1067_v62, %v1067_v62 }
 0x179   :  { %v812_v38 = vsel %vm811_vm11, %v1888_v42, %v810_v30  ;;  %v906_v44 = vmul.f32 %v896_v53, %v896_v53  ;;  %vm790_vm13 = vcmp.eq.f32.partialorder %v1799_v5, inf  ;;  %v1207_v27 = vpop.eup %1206  ;;  %vm853_vm14 = vcmp.eq.f32.partialorder %v1917_v25, inf }
 0x17a   :  { %v910_v36 = vadd.f32 %v905_v0, %v900_v32  ;;  %v815_v12 = vsel %vm813_vm12, %v814_v15, %v812_v38  ;;  %v783_v48 = vadd.f32 %v773_v34, %v763_v51  ;;  %v791_v46 = vsel %vm790_vm13, %v1799_v5, %v789_v9 }
 0x17b   :  { %v861_v31 = vsel %vm747_vm0, %v751_v41, %v815_v12  ;;  %v852_v33 = vmul.f32 %v1207_v27, %v1917_v25  ;;  %v793_v37 = vand.u32 2147483648, %v1799_v5  ;;  %v873_v18 = vand.u32 2147483647, %v1067_v62 }
 0x17c   :  { %v891_v35 = vsub.f32 %v861_v31, %v866_v16  ;;  %v856_v39 = vand.u32 2147483648, %v1917_v25  ;;  %vm792_vm15 = vcmp.eq.f32.partialorder %v1799_v5, 0.0  ;;  %1210 = vrsqrt.f32 %v783_v48 }
 0x17d   :  { %v854_v42 = vsel %vm853_vm14, %v1917_v25, %v852_v33  ;;  %vm855_vm1 = vcmp.eq.f32.partialorder %v1917_v25, 0.0  ;;  %v794_v19 = vsel %vm792_vm15, %v793_v37, %v791_v46  ;;  %v883_v49 = vsel %vm747_vm0, %v873_v18, 0.0 }
 0x17e   :  { %v901_v41 = vmul.f32 %v891_v35, %v891_v35  ;;  %v857_v50 = vsel %vm855_vm1, %v856_v39, %v854_v42  ;;  %v858_v52 = vsel %vm747_vm0, %v748_v23, %v794_v19  ;;  %v893_v53 = vsub.f32 %v1827_v17, %v883_v49 }
 0x17f   :  { %v867_v5 = vsel %vm747_vm0, %v757_v61, %v857_v50  ;;  %vm818_vm2 = vcmp.eq.f32.partialorder %v782_v26, inf  ;;  %v821_v59 = vand.u32 2147483648, %v782_v26  ;;  %v752_v43 = vand.u32 2147483647, %v1925_v4 }
 0x180   :  { %v1209_v56 = vpop.eup %1208  ;;  %v911_v25 = vadd.f32 %v906_v44, %v901_v41  ;;  %vm820_vm3 = vcmp.eq.f32.partialorder %v782_v26, 0.0  ;;  %v907_v14 = vmul.f32 %v897_v22, %v897_v22  ;;  %vm825_vm4 = vcmp.eq.f32.partialorder %v783_v48, inf }
 0x181   :  { %v817_v57 = vmul.f32 %v1209_v56, %v782_v26  ;;  %v828_v61 = vand.u32 2147483648, %v783_v48  ;;  %v753_v45 = vand.u32 2147483647, %v1950_v13  ;;  %vm827_vm5 = vcmp.eq.f32.partialorder %v783_v48, 0.0 }
 0x182   :  { %v903_v63 = vmul.f32 %v893_v53, %v893_v53 }
 0x183   :  { %v819_v29 = vsel %vm818_vm2, %v782_v26, %v817_v57 }
 0x184   :  { %v822_v55 = vsel %vm820_vm3, %v821_v59, %v819_v29 }
 0x185   :  { %v862_v23 = vsel %vm747_vm0, %v752_v43, %v822_v55 }
 0x186   :  { %v1211_v2 = vpop.eup %1210  ;;  %v892_v17 = vsub.f32 %v862_v23, %v867_v5 }
 0x187   :  { %v824_v0 = vmul.f32 %v1211_v2, %v783_v48 }
 0x188   :  { %v902_v60 = vmul.f32 %v892_v17, %v892_v17 }
 0x189   :  { %v826_v21 = vsel %vm825_vm4, %v783_v48, %v824_v0 }
 0x18a   :  { %v912_v58 = vadd.f32 %v907_v14, %v902_v60  ;;  %v829_v10 = vsel %vm827_vm5, %v828_v61, %v826_v21 }
 0x18b   :  { %v863_v4 = vsel %vm747_vm0, %v753_v45, %v829_v10 }
 0x18c   :  { %v888_v11 = vsub.f32 %v858_v52, %v863_v4 }
 0x18e   :  { %v898_v7 = vmul.f32 %v888_v11, %v888_v11 }
 0x190   :  { %v908_v24 = vadd.f32 %v903_v63, %v898_v7 }
 0x192   :  { %v913_v1 = vadd.f32 %v1939_v3, %v908_v24 }
 0x194   :  { %v914_v26 = vadd.f32 %v913_v1, %v910_v36 }
 0x196   :  { %v915_v62 = vadd.f32 %v914_v26, %v911_v25 }
 0x198   :  { %v916_v47 = vadd.f32 %v915_v62, %v912_v58 }
 0x19a   :  { %v917_v54 = vrot.slane %v916_v47, 4 }
 0x19c   :  { %v918_v40 = vadd.f32 %v917_v54, %v916_v47 }
 0x19e   :  { %v919_v28 = vrot.slane %v918_v40, 2 }
 0x1a0   :  { %v920_v13 = vadd.f32 %v919_v28, %v918_v40 }
 0x1a2   :  { %v921_v6 = vrot.slane %v920_v13, 1 }
 0x1a4   :  { %v922_v9 = vadd.f32 %v921_v6, %v920_v13 }
 0x1a6   :  { %923 = vst [vmem:[%s2012_s2] sm:$0x1] %v922_v9 }

// kernel: _multi_scale_fft_loss.3
= control target key start
LH: loop header
LB: loop body
LE: loop exit
PB: predicated region body
PF: predicated region fallthrough
CT: control target
= control target key end

     0   :  { %s5327_s1 = inlined_call_operand.vmem [shape: bf16[2,512,512], index: 1, kind: input, shape index: {}]   ;;  %s5328_s0 = inlined_call_operand.vmem [shape: f32[2,24,512], index: 0, kind: input, shape index: {}]   ;;  %s5329_s2 = inlined_call_operand.vmem [shape: f32[1,1,256], index: 2, kind: output, shape index: {}]  }
   0x1   :  { %v3175_v0 = vld [vmem:[%s5327_s1 + $0x404] ss:$16 sps:$4 sm:$0xff]   ;;  %v3177_v1 = vld [vmem:[%s5327_s1 + $0x40c] ss:$16 sps:$4 sm:$0xff]   ;;  %v3179_v2 = vld [vmem:[%s5327_s1 + $0x400] ss:$16 sps:$4 sm:$0xff]  }
   0x2   :  { %944 = vmatprep.subr.bf16.mxu0 %v3175_v0  ;;  %v3180_v3 = vld [vmem:[%s5327_s1 + $0x408] ss:$16 sps:$4 sm:$0xff]   ;;  %1070 = vmatprep.subr.bf16.mxu1 %v3177_v1  ;;  %v3181_v4 = vld [vmem:[%s5327_s1 + $0x424] ss:$16 sps:$4 sm:$0xff]   ;;  %v3183_v5 = vld [vmem:[%s5327_s1 + $0x42c] ss:$16 sps:$4 sm:$0xff]  }
   0x3   :  { %945 = vmatpush1.bf16.msra.mxu0 %v3179_v2  ;;  %1071 = vmatpush1.bf16.msra.mxu1 %v3180_v3  ;;  %v3185_v6 = vld [vmem:[%s5327_s1 + $0x420] ss:$16 sps:$4 sm:$0xff]   ;;  %v3186_v7 = vld [vmem:[%s5327_s1 + $0x428] ss:$16 sps:$4 sm:$0xff]   ;;  %v3187_v8 = vld [vmem:[%s5327_s1 + $0x444] ss:$16 sps:$4 sm:$0xff]  }
   0x4   :  { %946 = vmatprep.subr.bf16.mxu0 %v3181_v4  ;;  %1072 = vmatprep.subr.bf16.mxu1 %v3183_v5  ;;  %v3189_v9 = vld [vmem:[%s5327_s1 + $0x44c] ss:$16 sps:$4 sm:$0xff]   ;;  %v3191_v10 = vld [vmem:[%s5327_s1 + $0x440] ss:$16 sps:$4 sm:$0xff]   ;;  %v3192_v11 = vld [vmem:[%s5327_s1 + $0x448] ss:$16 sps:$4 sm:$0xff]  }
   0x5   :  { %v3193_v12 = vld [vmem:[%s5327_s1 + $0x464] ss:$16 sps:$4 sm:$0xff]   ;;  %v3195_v13 = vld [vmem:[%s5327_s1 + $0x46c] ss:$16 sps:$4 sm:$0xff]   ;;  %v3197_v14 = vld [vmem:[%s5327_s1 + $0x460] ss:$16 sps:$4 sm:$0xff]  }
   0x6   :  { %v3198_v15 = vld [vmem:[%s5327_s1 + $0x468] ss:$16 sps:$4 sm:$0xff]   ;;  %v3199_v16 = vld [vmem:[%s5327_s1 + $0x484] ss:$16 sps:$4 sm:$0xff]   ;;  %v3201_v17 = vld [vmem:[%s5327_s1 + $0x48c] ss:$16 sps:$4 sm:$0xff]  }
   0x7   :  { %947 = vmatpush1.bf16.msra.mxu0 %v3185_v6  ;;  %1073 = vmatpush1.bf16.msra.mxu1 %v3186_v7  ;;  %v3203_v18 = vld [vmem:[%s5327_s1 + $0x480] ss:$16 sps:$4 sm:$0xff]   ;;  %v3204_v19 = vld [vmem:[%s5327_s1 + $0x488] ss:$16 sps:$4 sm:$0xff]   ;;  %v3205_v20 = vld [vmem:[%s5327_s1 + $0x4a4] ss:$16 sps:$4 sm:$0xff]  }
   0x8   :  { %948 = vmatprep.subr.bf16.mxu0 %v3187_v8  ;;  %1074 = vmatprep.subr.bf16.mxu1 %v3189_v9  ;;  %v3207_v21 = vld [vmem:[%s5327_s1 + $0x4ac] ss:$16 sps:$4 sm:$0xff]   ;;  %v3209_v22 = vld [vmem:[%s5327_s1 + $0x4a0] ss:$16 sps:$4 sm:$0xff]   ;;  %v3210_v23 = vld [vmem:[%s5327_s1 + $0x4a8] ss:$16 sps:$4 sm:$0xff]  }
   0x9   :  { %v3211_v24 = vld [vmem:[%s5327_s1 + $0x4c4] ss:$16 sps:$4 sm:$0xff]   ;;  %v3213_v25 = vld [vmem:[%s5327_s1 + $0x4cc] ss:$16 sps:$4 sm:$0xff]   ;;  %v3215_v26 = vld [vmem:[%s5327_s1 + $0x4c0] ss:$16 sps:$4 sm:$0xff]  }
   0xa   :  { %v3216_v27 = vld [vmem:[%s5327_s1 + $0x4c8] ss:$16 sps:$4 sm:$0xff]   ;;  %v3217_v28 = vld [vmem:[%s5327_s1 + $0x4e4] ss:$16 sps:$4 sm:$0xff]   ;;  %v3219_v29 = vld [vmem:[%s5327_s1 + $0x4ec] ss:$16 sps:$4 sm:$0xff]  }
   0xb   :  { %949 = vmatpush1.bf16.msra.mxu0 %v3191_v10  ;;  %1075 = vmatpush1.bf16.msra.mxu1 %v3192_v11  ;;  %v3221_v30 = vld [vmem:[%s5327_s1 + $0x4e0] ss:$16 sps:$4 sm:$0xff]   ;;  %v3222_v31 = vld [vmem:[%s5327_s1 + $0x4e8] ss:$16 sps:$4 sm:$0xff]   ;;  %v3223_v32 = vld [vmem:[%s5327_s1 + $0x504] ss:$16 sps:$4 sm:$0xff]  }
   0xc   :  { %950 = vmatprep.subr.bf16.mxu0 %v3193_v12  ;;  %1076 = vmatprep.subr.bf16.mxu1 %v3195_v13  ;;  %v3225_v33 = vld [vmem:[%s5327_s1 + $0x50c] ss:$16 sps:$4 sm:$0xff]   ;;  %v3227_v34 = vld [vmem:[%s5327_s1 + $0x500] ss:$16 sps:$4 sm:$0xff]   ;;  %v3228_v35 = vld [vmem:[%s5327_s1 + $0x508] ss:$16 sps:$4 sm:$0xff]  }
   0xd   :  { %v3229_v36 = vld [vmem:[%s5327_s1 + $0x524] ss:$16 sps:$4 sm:$0xff]   ;;  %v3231_v37 = vld [vmem:[%s5327_s1 + $0x52c] ss:$16 sps:$4 sm:$0xff]   ;;  %v3233_v38 = vld [vmem:[%s5327_s1 + $0x520] ss:$16 sps:$4 sm:$0xff]  }
   0xe   :  { %v3234_v39 = vld [vmem:[%s5327_s1 + $0x528] ss:$16 sps:$4 sm:$0xff]   ;;  %v3235_v40 = vld [vmem:[%s5327_s1 + $0x544] ss:$16 sps:$4 sm:$0xff]   ;;  %v3237_v41 = vld [vmem:[%s5327_s1 + $0x54c] ss:$16 sps:$4 sm:$0xff]  }
   0xf   :  { %951 = vmatpush1.bf16.msra.mxu0 %v3197_v14  ;;  %1077 = vmatpush1.bf16.msra.mxu1 %v3198_v15  ;;  %v3239_v42 = vld [vmem:[%s5327_s1 + $0x540] ss:$16 sps:$4 sm:$0xff]   ;;  %v3240_v43 = vld [vmem:[%s5327_s1 + $0x548] ss:$16 sps:$4 sm:$0xff]   ;;  %v3241_v44 = vld [vmem:[%s5327_s1 + $0x564] ss:$16 sps:$4 sm:$0xff]  }
  0x10   :  { %952 = vmatprep.subr.bf16.mxu0 %v3199_v16  ;;  %1078 = vmatprep.subr.bf16.mxu1 %v3201_v17  ;;  %v3243_v45 = vld [vmem:[%s5327_s1 + $0x56c] ss:$16 sps:$4 sm:$0xff]   ;;  %v3245_v48 = vld [vmem:[%s5327_s1 + $0x560] ss:$16 sps:$4 sm:$0xff]   ;;  %v3246_v49 = vld [vmem:[%s5327_s1 + $0x568] ss:$16 sps:$4 sm:$0xff]  }
  0x11   :  { %v12_v46 = vld [vmem:[%s5328_s0 + $0x8] sm:$0xff]  ;;  %v3247_v51 = vld [vmem:[%s5327_s1 + $0x584] ss:$16 sps:$4 sm:$0xff]   ;;  %v3251_v53 = vld [vmem:[%s5327_s1 + $0x580] ss:$16 sps:$4 sm:$0xff]  }
  0x12   :  { %v16_v47 = vld [vmem:[%s5328_s0 + $0x28] sm:$0xff]  ;;  %v3253_v55 = vld [vmem:[%s5327_s1 + $0x5a4] ss:$16 sps:$4 sm:$0xff]   ;;  %v3257_v57 = vld [vmem:[%s5327_s1 + $0x5a0] ss:$16 sps:$4 sm:$0xff]  }
  0x13   :  { %953 = vmatpush1.bf16.msra.mxu0 %v3203_v18  ;;  %1079 = vmatpush1.bf16.msra.mxu1 %v3204_v19  ;;  %v3773_v50 = vpack.c.bf16 %v16_v47, %v12_v46  ;;  %v3249_v52 = vld [vmem:[%s5327_s1 + $0x58c] ss:$16 sps:$4 sm:$0xff]   ;;  %v3252_v54 = vld [vmem:[%s5327_s1 + $0x588] ss:$16 sps:$4 sm:$0xff]   ;;  %v3259_v59 = vld [vmem:[%s5327_s1 + $0x5c4] ss:$16 sps:$4 sm:$0xff]  }
  0x14   :  { %954 = vmatprep.subr.bf16.mxu0 %v3205_v20  ;;  %1080 = vmatprep.subr.bf16.mxu1 %v3207_v21  ;;  %v3255_v56 = vld [vmem:[%s5327_s1 + $0x5ac] ss:$16 sps:$4 sm:$0xff]   ;;  %v3258_v58 = vld [vmem:[%s5327_s1 + $0x5a8] ss:$16 sps:$4 sm:$0xff]   ;;  %v3263_v61 = vld [vmem:[%s5327_s1 + $0x5c0] ss:$16 sps:$4 sm:$0xff]  }
  0x15   :  { %976 = vmatprep.mubr.bf16.mxu0 %v3773_v50  ;;  %1102 = vmatprep.mubr.bf16.mxu1 %v3773_v50  ;;  %v3261_v60 = vld [vmem:[%s5327_s1 + $0x5cc] ss:$16 sps:$4 sm:$0xff]   ;;  %v3264_v62 = vld [vmem:[%s5327_s1 + $0x5c8] ss:$16 sps:$4 sm:$0xff]   ;;  %v3265_v63 = vld [vmem:[%s5327_s1 + $0x5e4] ss:$16 sps:$4 sm:$0xff]  }
  0x16   :  { %v3267_v0 = vld [vmem:[%s5327_s1 + $0x5ec] ss:$16 sps:$4 sm:$0xff]   ;;  %v3269_v1 = vld [vmem:[%s5327_s1 + $0x5e0] ss:$16 sps:$4 sm:$0xff]   ;;  %v3270_v2 = vld [vmem:[%s5327_s1 + $0x5e8] ss:$16 sps:$4 sm:$0xff]  }
  0x17   :  { %955 = vmatpush1.bf16.msra.mxu0 %v3209_v22  ;;  %1081 = vmatpush1.bf16.msra.mxu1 %v3210_v23  ;;  %v3273_v3 = vld [vmem:[%s5327_s1 + $0x604] ss:$16 sps:$4 sm:$0xff]   ;;  %v3276_v6 = vld [vmem:[%s5327_s1 + $0x60c] ss:$16 sps:$4 sm:$0xff]   ;;  %v3271_v7 = vld [vmem:[%s5327_s1 + $0x600] ss:$16 sps:$4 sm:$0xff]  }
  0x18   :  { %956 = vmatprep.subr.bf16.mxu0 %v3211_v24  ;;  %1082 = vmatprep.subr.bf16.mxu1 %v3213_v25  ;;  %v11_v4 = vld [vmem:[%s5328_s0] sm:$0xff]  ;;  %v3274_v8 = vld [vmem:[%s5327_s1 + $0x608] ss:$16 sps:$4 sm:$0xff]   ;;  %v3282_v11 = vld [vmem:[%s5327_s1 + $0x62c] ss:$16 sps:$4 sm:$0xff]  }
  0x19   :  { %v15_v5 = vld [vmem:[%s5328_s0 + $0x20] sm:$0xff]  ;;  %v3280_v13 = vld [vmem:[%s5327_s1 + $0x628] ss:$16 sps:$4 sm:$0xff]   ;;  %v3288_v15 = vld [vmem:[%s5327_s1 + $0x64c] ss:$16 sps:$4 sm:$0xff]  }
  0x1a   :  { %v3843_v9 = vpack.c.bf16 %v15_v5, %v11_v4  ;;  %v3279_v10 = vld [vmem:[%s5327_s1 + $0x624] ss:$16 sps:$4 sm:$0xff]   ;;  %v3277_v12 = vld [vmem:[%s5327_s1 + $0x620] ss:$16 sps:$4 sm:$0xff]   ;;  %v3286_v17 = vld [vmem:[%s5327_s1 + $0x648] ss:$16 sps:$4 sm:$0xff]  }
  0x1b   :  { %957 = vmatpush1.bf16.msra.mxu0 %v3215_v26  ;;  %1083 = vmatpush1.bf16.msra.mxu1 %v3216_v27  ;;  %v3285_v14 = vld [vmem:[%s5327_s1 + $0x644] ss:$16 sps:$4 sm:$0xff]   ;;  %v3283_v16 = vld [vmem:[%s5327_s1 + $0x640] ss:$16 sps:$4 sm:$0xff]   ;;  %v3294_v19 = vld [vmem:[%s5327_s1 + $0x66c] ss:$16 sps:$4 sm:$0xff]  }
  0x1c   :  { %958 = vmatprep.subr.bf16.mxu0 %v3217_v28  ;;  %1084 = vmatprep.subr.bf16.mxu1 %v3219_v29  ;;  %v3291_v18 = vld [vmem:[%s5327_s1 + $0x664] ss:$16 sps:$4 sm:$0xff]   ;;  %v3289_v20 = vld [vmem:[%s5327_s1 + $0x660] ss:$16 sps:$4 sm:$0xff]   ;;  %v3292_v21 = vld [vmem:[%s5327_s1 + $0x668] ss:$16 sps:$4 sm:$0xff]  }
  0x1d   :  { %v20_v22 = vld [vmem:[%s5328_s0 + $0x48] sm:$0xff]  ;;  %v3297_v24 = vld [vmem:[%s5327_s1 + $0x684] ss:$16 sps:$4 sm:$0xff]   ;;  %v3295_v27 = vld [vmem:[%s5327_s1 + $0x680] ss:$16 sps:$4 sm:$0xff]  }
  0x1e   :  { %v24_v23 = vld [vmem:[%s5328_s0 + $0x68] sm:$0xff]  ;;  %v19_v29 = vld [vmem:[%s5328_s0 + $0x40] sm:$0xff] }
  0x1f   :  { %959 = vmatpush1.bf16.msra.mxu0 %v3221_v30  ;;  %1085 = vmatpush1.bf16.msra.mxu1 %v3222_v31  ;;  %v3300_v25 = vld [vmem:[%s5327_s1 + $0x68c] ss:$16 sps:$4 sm:$0xff]   ;;  %v3895_v26 = vpack.c.bf16 %v24_v23, %v20_v22  ;;  %v3298_v28 = vld [vmem:[%s5327_s1 + $0x688] ss:$16 sps:$4 sm:$0xff]   ;;  %v23_v30 = vld [vmem:[%s5328_s0 + $0x60] sm:$0xff] }
  0x20   :  { %960 = vmatprep.subr.bf16.mxu0 %v3223_v32  ;;  %1086 = vmatprep.subr.bf16.mxu1 %v3225_v33  ;;  %v3303_v31 = vld [vmem:[%s5327_s1 + $0x6a4] ss:$16 sps:$4 sm:$0xff]   ;;  %v3914_v32 = vpack.c.bf16 %v23_v30, %v19_v29  ;;  %v3306_v33 = vld [vmem:[%s5327_s1 + $0x6ac] ss:$16 sps:$4 sm:$0xff]   ;;  %v3337_v4 = vld [vmem:[%s5327_s1 + $0x760] ss:$16 sps:$4 sm:$0xff]  }
  0x21   :  { %v3315_v46 = vld [vmem:[%s5327_s1 + $0x6e4] ss:$16 sps:$4 sm:$0xff]   ;;  %v3318_v47 = vld [vmem:[%s5327_s1 + $0x6ec] ss:$16 sps:$4 sm:$0xff]   ;;  %v3340_v5 = vld [vmem:[%s5327_s1 + $0x768] ss:$16 sps:$4 sm:$0xff]  }
  0x22   :  { %v3364_v22 = vld [vmem:[%s5327_s1 + $0x7e8] ss:$16 sps:$4 sm:$0xff]   ;;  %v13_v23 = vld [vmem:[%s5328_s0 + $0x10] sm:$0xff] }
  0x23   :  { %961 = vmatpush1.bf16.msra.mxu0 %v3227_v34  ;;  %1087 = vmatpush1.bf16.msra.mxu1 %v3228_v35  ;;  %v28_v34 = vld [vmem:[%s5328_s0 + $0x88] sm:$0xff]  ;;  %v22_v30 = vld [vmem:[%s5328_s0 + $0x58] sm:$0xff] }
  0x24   :  { %962 = vmatprep.subr.bf16.mxu0 %v3229_v36  ;;  %1088 = vmatprep.subr.bf16.mxu1 %v3231_v37  ;;  %v32_v35 = vld [vmem:[%s5328_s0 + $0xa8] sm:$0xff]  ;;  %v3301_v36 = vld [vmem:[%s5327_s1 + $0x6a0] ss:$16 sps:$4 sm:$0xff]  }
  0x25   :  { %v3304_v37 = vld [vmem:[%s5327_s1 + $0x6a8] ss:$16 sps:$4 sm:$0xff]  }
  0x27   :  { %963 = vmatpush1.bf16.msra.mxu0 %v3233_v38  ;;  %1089 = vmatpush1.bf16.msra.mxu1 %v3234_v39  ;;  %v3933_v38 = vpack.c.bf16 %v32_v35, %v28_v34  ;;  %v3309_v39 = vld [vmem:[%s5327_s1 + $0x6c4] ss:$16 sps:$4 sm:$0xff]   ;;  %v4121_v35 = vld [vmem:[%s5327_s1 + $0x2c] ss:$16 sps:$4 sm:$0xff]  }
  0x28   :  { %964 = vmatprep.subr.bf16.mxu0 %v3235_v40  ;;  %1090 = vmatprep.subr.bf16.mxu1 %v3237_v41  ;;  %v3312_v40 = vld [vmem:[%s5327_s1 + $0x6cc] ss:$16 sps:$4 sm:$0xff]   ;;  %v27_v41 = vld [vmem:[%s5328_s0 + $0x80] sm:$0xff] }
  0x29   :  { %v4116_v34 = vld [vmem:[%s5327_s1 + $0x24] ss:$16 sps:$4 sm:$0xff]  }
  0x2b   :  { %965 = vmatpush1.bf16.msra.mxu0 %v3239_v42  ;;  %1091 = vmatpush1.bf16.msra.mxu1 %v3240_v43  ;;  %v31_v42 = vld [vmem:[%s5328_s0 + $0xa0] sm:$0xff] }
  0x2c   :  { %966 = vmatprep.subr.bf16.mxu0 %v3241_v44  ;;  %1092 = vmatprep.subr.bf16.mxu1 %v3243_v45  ;;  %v3307_v43 = vld [vmem:[%s5327_s1 + $0x6c0] ss:$16 sps:$4 sm:$0xff]   ;;  %v3310_v44 = vld [vmem:[%s5327_s1 + $0x6c8] ss:$16 sps:$4 sm:$0xff]   ;;  %v3955_v45 = vpack.c.bf16 %v31_v42, %v27_v41 }
  0x2d   :  { %v21_v41 = vld [vmem:[%s5328_s0 + $0x50] sm:$0xff] }
  0x2e   :  { %v25_v42 = vld [vmem:[%s5328_s0 + $0x70] sm:$0xff] }
  0x2f   :  { %967 = vmatpush1.bf16.msra.mxu0 %v3245_v48  ;;  %1093 = vmatpush1.bf16.msra.mxu1 %v3246_v49  ;;  %v14_v48 = vld [vmem:[%s5328_s0 + $0x18] sm:$0xff] }
  0x30   :  { %968 = vmatprep.subr.bf16.mxu0 %v3247_v51  ;;  %1094 = vmatprep.subr.bf16.mxu1 %v3249_v52  ;;  %v18_v49 = vld [vmem:[%s5328_s0 + $0x38] sm:$0xff]  ;;  %v3313_v52 = vld [vmem:[%s5327_s1 + $0x6e0] ss:$16 sps:$4 sm:$0xff]  }
  0x31   :  { %v3971_v51 = vpack.c.bf16 %v18_v49, %v14_v48  ;;  %v30_v48 = vld [vmem:[%s5328_s0 + $0x98] sm:$0xff] }
  0x32   :  { %v34_v49 = vld [vmem:[%s5328_s0 + $0xb8] sm:$0xff] }
  0x33   :  { %969 = vmatpush1.bf16.msra.mxu0 %v3251_v53  ;;  %1095 = vmatpush1.bf16.msra.mxu1 %v3252_v54  ;;  %v3316_v53 = vld [vmem:[%s5327_s1 + $0x6e8] ss:$16 sps:$4 sm:$0xff]   ;;  %v3321_v54 = vld [vmem:[%s5327_s1 + $0x704] ss:$16 sps:$4 sm:$0xff]  }
  0x34   :  { %970 = vmatprep.subr.bf16.mxu0 %v3253_v55  ;;  %1096 = vmatprep.subr.bf16.mxu1 %v3255_v56  ;;  %v3324_v55 = vld [vmem:[%s5327_s1 + $0x70c] ss:$16 sps:$4 sm:$0xff]   ;;  %v3319_v56 = vld [vmem:[%s5327_s1 + $0x700] ss:$16 sps:$4 sm:$0xff]  }
  0x37   :  { %971 = vmatpush1.bf16.msra.mxu0 %v3257_v57  ;;  %1097 = vmatpush1.bf16.msra.mxu1 %v3258_v58  ;;  %v3322_v57 = vld [vmem:[%s5327_s1 + $0x708] ss:$16 sps:$4 sm:$0xff]   ;;  %v3327_v58 = vld [vmem:[%s5327_s1 + $0x724] ss:$16 sps:$4 sm:$0xff]  }
  0x38   :  { %972 = vmatprep.subr.bf16.mxu0 %v3259_v59  ;;  %1098 = vmatprep.subr.bf16.mxu1 %v3261_v60  ;;  %v3330_v59 = vld [vmem:[%s5327_s1 + $0x72c] ss:$16 sps:$4 sm:$0xff]   ;;  %v3325_v60 = vld [vmem:[%s5327_s1 + $0x720] ss:$16 sps:$4 sm:$0xff]  }
  0x3b   :  { %973 = vmatpush1.bf16.msra.mxu0 %v3263_v61  ;;  %1099 = vmatpush1.bf16.msra.mxu1 %v3264_v62  ;;  %v3328_v61 = vld [vmem:[%s5327_s1 + $0x728] ss:$16 sps:$4 sm:$0xff]   ;;  %v3333_v62 = vld [vmem:[%s5327_s1 + $0x744] ss:$16 sps:$4 sm:$0xff]  }
  0x3c   :  { %974 = vmatprep.subr.bf16.mxu0 %v3265_v63  ;;  %1100 = vmatprep.subr.bf16.mxu1 %v3267_v0  ;;  %v3336_v63 = vld [vmem:[%s5327_s1 + $0x74c] ss:$16 sps:$4 sm:$0xff]   ;;  %v3331_v0 = vld [vmem:[%s5327_s1 + $0x740] ss:$16 sps:$4 sm:$0xff]  }
  0x3f   :  { %975 = vmatpush1.bf16.msra.mxu0 %v3269_v1  ;;  %1101 = vmatpush1.bf16.msra.mxu1 %v3270_v2  ;;  %v3334_v1 = vld [vmem:[%s5327_s1 + $0x748] ss:$16 sps:$4 sm:$0xff]   ;;  %v3339_v2 = vld [vmem:[%s5327_s1 + $0x764] ss:$16 sps:$4 sm:$0xff]  }
  0x40   :  { %1007 = vmatprep.subr.bf16.mxu0 %v3273_v3  ;;  %1133 = vmatprep.subr.bf16.mxu1 %v3276_v6  ;;  %v3342_v3 = vld [vmem:[%s5327_s1 + $0x76c] ss:$16 sps:$4 sm:$0xff]   ;;  %v3345_v6 = vld [vmem:[%s5327_s1 + $0x784] ss:$16 sps:$4 sm:$0xff]  }
  0x42   :  { %977 = vmatmul.mubr.bf16.vlgmr.msra.gmra.mrb[0].mxu0 %v3843_v9  ;;  %1103 = vmatmul.mubr.bf16.vlgmr.msra.gmra.mrb[0].mxu1 %v3843_v9 }
  0x43   :  { %1008 = vmatpush1.bf16.msra.mxu0 %v3271_v7  ;;  %1134 = vmatpush1.bf16.msra.mxu1 %v3274_v8  ;;  %v3348_v7 = vld [vmem:[%s5327_s1 + $0x78c] ss:$16 sps:$4 sm:$0xff]   ;;  %v3343_v8 = vld [vmem:[%s5327_s1 + $0x780] ss:$16 sps:$4 sm:$0xff]  }
  0x44   :  { %1009 = vmatprep.subr.bf16.mxu0 %v3279_v10  ;;  %1135 = vmatprep.subr.bf16.mxu1 %v3282_v11  ;;  %v3346_v10 = vld [vmem:[%s5327_s1 + $0x788] ss:$16 sps:$4 sm:$0xff]   ;;  %v3351_v11 = vld [vmem:[%s5327_s1 + $0x7a4] ss:$16 sps:$4 sm:$0xff]  }
  0x45   :  { %986 = vmatprep.mubr.bf16.mxu0 %v3895_v26  ;;  %1112 = vmatprep.mubr.bf16.mxu1 %v3895_v26 }
  0x47   :  { %1010 = vmatpush1.bf16.msra.mxu0 %v3277_v12  ;;  %1136 = vmatpush1.bf16.msra.mxu1 %v3280_v13  ;;  %v3354_v12 = vld [vmem:[%s5327_s1 + $0x7ac] ss:$16 sps:$4 sm:$0xff]   ;;  %v3349_v13 = vld [vmem:[%s5327_s1 + $0x7a0] ss:$16 sps:$4 sm:$0xff]  }
  0x48   :  { %1011 = vmatprep.subr.bf16.mxu0 %v3285_v14  ;;  %1137 = vmatprep.subr.bf16.mxu1 %v3288_v15  ;;  %v3352_v14 = vld [vmem:[%s5327_s1 + $0x7a8] ss:$16 sps:$4 sm:$0xff]   ;;  %v3357_v15 = vld [vmem:[%s5327_s1 + $0x7c4] ss:$16 sps:$4 sm:$0xff]  }
  0x4a   :  { %987 = vmatmul.mubr.bf16.gmra.mrb[4].mxu0 %v3914_v32  ;;  %1113 = vmatmul.mubr.bf16.gmra.mrb[4].mxu1 %v3914_v32 }
  0x4b   :  { %1012 = vmatpush1.bf16.msra.mxu0 %v3283_v16  ;;  %1138 = vmatpush1.bf16.msra.mxu1 %v3286_v17  ;;  %v3360_v16 = vld [vmem:[%s5327_s1 + $0x7cc] ss:$16 sps:$4 sm:$0xff]   ;;  %v3355_v17 = vld [vmem:[%s5327_s1 + $0x7c0] ss:$16 sps:$4 sm:$0xff]  }
  0x4c   :  { %1013 = vmatprep.subr.bf16.mxu0 %v3291_v18  ;;  %1139 = vmatprep.subr.bf16.mxu1 %v3294_v19  ;;  %v3358_v18 = vld [vmem:[%s5327_s1 + $0x7c8] ss:$16 sps:$4 sm:$0xff]   ;;  %v3363_v19 = vld [vmem:[%s5327_s1 + $0x7e4] ss:$16 sps:$4 sm:$0xff]  }
  0x4d   :  { %996 = vmatprep.mubr.bf16.mxu0 %v3933_v38  ;;  %1122 = vmatprep.mubr.bf16.mxu1 %v3933_v38 }
  0x4f   :  { %1014 = vmatpush1.bf16.msra.mxu0 %v3289_v20  ;;  %1140 = vmatpush1.bf16.msra.mxu1 %v3292_v21  ;;  %v3366_v20 = vld [vmem:[%s5327_s1 + $0x7ec] ss:$16 sps:$4 sm:$0xff]   ;;  %v3361_v21 = vld [vmem:[%s5327_s1 + $0x7e0] ss:$16 sps:$4 sm:$0xff]  }
  0x50   :  { %1015 = vmatprep.subr.bf16.mxu0 %v3297_v24  ;;  %1141 = vmatprep.subr.bf16.mxu1 %v3300_v25  ;;  %v17_v24 = vld [vmem:[%s5328_s0 + $0x30] sm:$0xff] }
  0x51   :  { %v4086_v25 = vld [vmem:[%s5327_s1 + $0x4] ss:$16 sps:$4 sm:$0xff]   ;;  %v4098_v29 = vpack.c.bf16 %v17_v24, %v13_v23  ;;  %v4380_v23 = vld [vmem:[%s5327_s1 + $0x140] ss:$16 sps:$4 sm:$0xff]   ;;  %v4385_v24 = vld [vmem:[%s5327_s1 + $0x148] ss:$16 sps:$4 sm:$0xff]  }
  0x52   :  { %997 = vmatmul.mubr.bf16.gmra.mrb[8].mxu0 %v3955_v45  ;;  %1123 = vmatmul.mubr.bf16.gmra.mrb[8].mxu1 %v3955_v45 }
  0x53   :  { %1016 = vmatpush1.bf16.msra.mxu0 %v3295_v27  ;;  %1142 = vmatpush1.bf16.msra.mxu1 %v3298_v28  ;;  %v4091_v27 = vld [vmem:[%s5327_s1 + $0xc] ss:$16 sps:$4 sm:$0xff]   ;;  %v4096_v28 = vld [vmem:[%s5327_s1] ss:$16 sps:$4 sm:$0xff]  }
  0x54   :  { %1017 = vmatprep.subr.bf16.mxu0 %v3303_v31  ;;  %1143 = vmatprep.subr.bf16.mxu1 %v3306_v33  ;;  %v26_v31 = vld [vmem:[%s5328_s0 + $0x78] sm:$0xff] }
  0x55   :  { %1039 = vmatprep.mubr.bf16.mxu0 %v3971_v51  ;;  %1165 = vmatprep.mubr.bf16.mxu1 %v3971_v51  ;;  %v4109_v33 = vld [vmem:[%s5327_s1 + $0x8] ss:$16 sps:$4 sm:$0xff]  }
  0x57   :  { %1018 = vmatpush1.bf16.msra.mxu0 %v3301_v36  ;;  %1144 = vmatpush1.bf16.msra.mxu1 %v3304_v37  ;;  %v4126_v36 = vld [vmem:[%s5327_s1 + $0x20] ss:$16 sps:$4 sm:$0xff]   ;;  %v4128_v37 = vpack.c.bf16 %v26_v31, %v22_v30  ;;  %v4392_v30 = vld [vmem:[%s5327_s1 + $0x164] ss:$16 sps:$4 sm:$0xff]   ;;  %v4399_v31 = vld [vmem:[%s5327_s1 + $0x16c] ss:$16 sps:$4 sm:$0xff]  }
  0x58   :  { %1019 = vmatprep.subr.bf16.mxu0 %v3309_v39  ;;  %1145 = vmatprep.subr.bf16.mxu1 %v3312_v40  ;;  %v4135_v39 = vld [vmem:[%s5327_s1 + $0x28] ss:$16 sps:$4 sm:$0xff]   ;;  %v4142_v40 = vld [vmem:[%s5327_s1 + $0x44] ss:$16 sps:$4 sm:$0xff]   ;;  %5406 = vst [vmem:[#allocation2_spill] sm:$0xff] %v4392_v30  ;;  %5407 = vst [vmem:[#allocation3_spill] sm:$0xff] %v4399_v31 }
  0x5b   :  { %1020 = vmatpush1.bf16.msra.mxu0 %v3307_v43  ;;  %1146 = vmatpush1.bf16.msra.mxu1 %v3310_v44  ;;  %v4155_v43 = vld [vmem:[%s5327_s1 + $0x4c] ss:$16 sps:$4 sm:$0xff]   ;;  %v4160_v44 = vld [vmem:[%s5327_s1 + $0x40] ss:$16 sps:$4 sm:$0xff]  }
  0x5c   :  { %1021 = vmatprep.subr.bf16.mxu0 %v3315_v46  ;;  %1147 = vmatprep.subr.bf16.mxu1 %v3318_v47  ;;  %v4165_v46 = vld [vmem:[%s5327_s1 + $0x48] ss:$16 sps:$4 sm:$0xff]   ;;  %v4169_v47 = vpack.c.bf16 %v25_v42, %v21_v41  ;;  %v4404_v41 = vld [vmem:[%s5327_s1 + $0x160] ss:$16 sps:$4 sm:$0xff]  }
  0x5d   :  { %v4409_v42 = vld [vmem:[%s5327_s1 + $0x168] ss:$16 sps:$4 sm:$0xff]  }
  0x5e   :  { %5408 = vst [vmem:[#allocation4_spill] sm:$0xff] %v4409_v42 }
  0x5f   :  { %1022 = vmatpush1.bf16.msra.mxu0 %v3313_v52  ;;  %1148 = vmatpush1.bf16.msra.mxu1 %v3316_v53  ;;  %v4182_v52 = vld [vmem:[%s5327_s1 + $0x64] ss:$16 sps:$4 sm:$0xff]   ;;  %v4189_v53 = vld [vmem:[%s5327_s1 + $0x6c] ss:$16 sps:$4 sm:$0xff]  }
  0x60   :  { %1023 = vmatprep.subr.bf16.mxu0 %v3321_v54  ;;  %1149 = vmatprep.subr.bf16.mxu1 %v3324_v55  ;;  %v4194_v54 = vld [vmem:[%s5327_s1 + $0x60] ss:$16 sps:$4 sm:$0xff]   ;;  %v4199_v55 = vld [vmem:[%s5327_s1 + $0x68] ss:$16 sps:$4 sm:$0xff]  }
  0x63   :  { %1024 = vmatpush1.bf16.msra.mxu0 %v3319_v56  ;;  %1150 = vmatpush1.bf16.msra.mxu1 %v3322_v57  ;;  %v4201_v56 = vpack.c.bf16 %v34_v49, %v30_v48  ;;  %v4206_v57 = vld [vmem:[%s5327_s1 + $0x84] ss:$16 sps:$4 sm:$0xff]   ;;  %v4423_v49 = vld [vmem:[%s5327_s1 + $0x18c] ss:$16 sps:$4 sm:$0xff]  }
  0x64   :  { %1025 = vmatprep.subr.bf16.mxu0 %v3327_v58  ;;  %1151 = vmatprep.subr.bf16.mxu1 %v3330_v59  ;;  %v29_v58 = vld [vmem:[%s5328_s0 + $0x90] sm:$0xff] }
  0x65   :  { %v33_v59 = vld [vmem:[%s5328_s0 + $0xb0] sm:$0xff] }
  0x66   :  { %v4416_v48 = vld [vmem:[%s5327_s1 + $0x184] ss:$16 sps:$4 sm:$0xff]  }
  0x67   :  { %1026 = vmatpush1.bf16.msra.mxu0 %v3325_v60  ;;  %1152 = vmatpush1.bf16.msra.mxu1 %v3328_v61  ;;  %v4223_v60 = vld [vmem:[%s5327_s1 + $0x8c] ss:$16 sps:$4 sm:$0xff]   ;;  %v4230_v61 = vld [vmem:[%s5327_s1 + $0x80] ss:$16 sps:$4 sm:$0xff]   ;;  %5409 = vst [vmem:[#allocation5_spill] sm:$0xff] %v4416_v48 }
  0x68   :  { %1027 = vmatprep.subr.bf16.mxu0 %v3333_v62  ;;  %1153 = vmatprep.subr.bf16.mxu1 %v3336_v63  ;;  %v4235_v62 = vld [vmem:[%s5327_s1 + $0x88] ss:$16 sps:$4 sm:$0xff]   ;;  %v4237_v63 = vpack.c.bf16 %v33_v59, %v29_v58  ;;  %v4428_v58 = vld [vmem:[%s5327_s1 + $0x180] ss:$16 sps:$4 sm:$0xff]  }
  0x69   :  { %5410 = vst [vmem:[#allocation6_spill] sm:$0xff] %v4428_v58  ;;  %v4433_v59 = vld [vmem:[%s5327_s1 + $0x188] ss:$16 sps:$4 sm:$0xff]  }
  0x6a   :  { %5411 = vst [vmem:[#allocation7_spill] sm:$0xff] %v4433_v59 }
  0x6b   :  { %1028 = vmatpush1.bf16.msra.mxu0 %v3331_v0  ;;  %1154 = vmatpush1.bf16.msra.mxu1 %v3334_v1  ;;  %v4244_v0 = vld [vmem:[%s5327_s1 + $0xa4] ss:$16 sps:$4 sm:$0xff]   ;;  %v4251_v1 = vld [vmem:[%s5327_s1 + $0xac] ss:$16 sps:$4 sm:$0xff]  }
  0x6c   :  { %1029 = vmatprep.subr.bf16.mxu0 %v3339_v2  ;;  %1155 = vmatprep.subr.bf16.mxu1 %v3342_v3  ;;  %v4256_v2 = vld [vmem:[%s5327_s1 + $0xa0] ss:$16 sps:$4 sm:$0xff]   ;;  %v4261_v3 = vld [vmem:[%s5327_s1 + $0xa8] ss:$16 sps:$4 sm:$0xff]  }
  0x6f   :  { %1030 = vmatpush1.bf16.msra.mxu0 %v3337_v4  ;;  %1156 = vmatpush1.bf16.msra.mxu1 %v3340_v5  ;;  %v4270_v4 = vld [vmem:[%s5327_s1 + $0xc4] ss:$16 sps:$4 sm:$0xff]   ;;  %v4277_v5 = vld [vmem:[%s5327_s1 + $0xcc] ss:$16 sps:$4 sm:$0xff]  }
  0x70   :  { %1031 = vmatprep.subr.bf16.mxu0 %v3345_v6  ;;  %1157 = vmatprep.subr.bf16.mxu1 %v3348_v7  ;;  %v4284_v6 = vld [vmem:[%s5327_s1 + $0xc0] ss:$16 sps:$4 sm:$0xff]   ;;  %v4289_v7 = vld [vmem:[%s5327_s1 + $0xc8] ss:$16 sps:$4 sm:$0xff]  }
  0x73   :  { %1032 = vmatpush1.bf16.msra.mxu0 %v3343_v8  ;;  %1158 = vmatpush1.bf16.msra.mxu1 %v3346_v10  ;;  %v4296_v8 = vld [vmem:[%s5327_s1 + $0xe4] ss:$16 sps:$4 sm:$0xff]   ;;  %v4303_v10 = vld [vmem:[%s5327_s1 + $0xec] ss:$16 sps:$4 sm:$0xff]  }
  0x74   :  { %1033 = vmatprep.subr.bf16.mxu0 %v3351_v11  ;;  %1159 = vmatprep.subr.bf16.mxu1 %v3354_v12  ;;  %v4308_v11 = vld [vmem:[%s5327_s1 + $0xe0] ss:$16 sps:$4 sm:$0xff]   ;;  %v4313_v12 = vld [vmem:[%s5327_s1 + $0xe8] ss:$16 sps:$4 sm:$0xff]  }
  0x77   :  { %1034 = vmatpush1.bf16.msra.mxu0 %v3349_v13  ;;  %1160 = vmatpush1.bf16.msra.mxu1 %v3352_v14  ;;  %v4320_v13 = vld [vmem:[%s5327_s1 + $0x104] ss:$16 sps:$4 sm:$0xff]   ;;  %v4327_v14 = vld [vmem:[%s5327_s1 + $0x10c] ss:$16 sps:$4 sm:$0xff]  }
  0x78   :  { %1035 = vmatprep.subr.bf16.mxu0 %v3357_v15  ;;  %1161 = vmatprep.subr.bf16.mxu1 %v3360_v16  ;;  %v4332_v15 = vld [vmem:[%s5327_s1 + $0x100] ss:$16 sps:$4 sm:$0xff]   ;;  %v4337_v16 = vld [vmem:[%s5327_s1 + $0x108] ss:$16 sps:$4 sm:$0xff]  }
  0x7b   :  { %1036 = vmatpush1.bf16.msra.mxu0 %v3355_v17  ;;  %1162 = vmatpush1.bf16.msra.mxu1 %v3358_v18  ;;  %v4344_v17 = vld [vmem:[%s5327_s1 + $0x124] ss:$16 sps:$4 sm:$0xff]   ;;  %v4351_v18 = vld [vmem:[%s5327_s1 + $0x12c] ss:$16 sps:$4 sm:$0xff]  }
  0x7c   :  { %1037 = vmatprep.subr.bf16.mxu0 %v3363_v19  ;;  %1163 = vmatprep.subr.bf16.mxu1 %v3366_v20  ;;  %v4356_v19 = vld [vmem:[%s5327_s1 + $0x120] ss:$16 sps:$4 sm:$0xff]   ;;  %v4361_v20 = vld [vmem:[%s5327_s1 + $0x128] ss:$16 sps:$4 sm:$0xff]  }
  0x7f   :  { %1038 = vmatpush1.bf16.msra.mxu0 %v3361_v21  ;;  %1164 = vmatpush1.bf16.msra.mxu1 %v3364_v22  ;;  %v4368_v21 = vld [vmem:[%s5327_s1 + $0x144] ss:$16 sps:$4 sm:$0xff]   ;;  %v4375_v22 = vld [vmem:[%s5327_s1 + $0x14c] ss:$16 sps:$4 sm:$0xff]  }
  0x80   :  { %1836 = vmatprep.subr.bf16.mxu0 %v4086_v25  ;;  %1962 = vmatprep.subr.bf16.mxu1 %v4091_v27 }
  0x82   :  { %1040 = vmatmul.mubr.bf16.vlgmr.msra.gmra.mrb[0].mxu0 %v4098_v29  ;;  %1166 = vmatmul.mubr.bf16.vlgmr.msra.gmra.mrb[0].mxu1 %v4098_v29 }
  0x83   :  { %1837 = vmatpush1.bf16.msra.mxu0 %v4096_v28  ;;  %1963 = vmatpush1.bf16.msra.mxu1 %v4109_v33 }
  0x84   :  { %1838 = vmatprep.subr.bf16.mxu0 %v4116_v34  ;;  %1964 = vmatprep.subr.bf16.mxu1 %v4121_v35 }
  0x85   :  { %1049 = vmatprep.mubr.bf16.mxu0 %v4128_v37  ;;  %1175 = vmatprep.mubr.bf16.mxu1 %v4128_v37 }
  0x87   :  { %1839 = vmatpush1.bf16.msra.mxu0 %v4126_v36  ;;  %1965 = vmatpush1.bf16.msra.mxu1 %v4135_v39 }
  0x88   :  { %1840 = vmatprep.subr.bf16.mxu0 %v4142_v40  ;;  %1966 = vmatprep.subr.bf16.mxu1 %v4155_v43 }
  0x8a   :  { %1050 = vmatmul.mubr.bf16.gmra.mrb[4].mxu0 %v4169_v47  ;;  %1176 = vmatmul.mubr.bf16.gmra.mrb[4].mxu1 %v4169_v47 }
  0x8b   :  { %1841 = vmatpush1.bf16.msra.mxu0 %v4160_v44  ;;  %1967 = vmatpush1.bf16.msra.mxu1 %v4165_v46 }
  0x8c   :  { %1842 = vmatprep.subr.bf16.mxu0 %v4182_v52  ;;  %1968 = vmatprep.subr.bf16.mxu1 %v4189_v53 }
  0x8d   :  { %1059 = vmatprep.mubr.bf16.mxu0 %v4201_v56  ;;  %1185 = vmatprep.mubr.bf16.mxu1 %v4201_v56 }
  0x8f   :  { %1843 = vmatpush1.bf16.msra.mxu0 %v4194_v54  ;;  %1969 = vmatpush1.bf16.msra.mxu1 %v4199_v55 }
  0x90   :  { %1844 = vmatprep.subr.bf16.mxu0 %v4206_v57  ;;  %1970 = vmatprep.subr.bf16.mxu1 %v4223_v60 }
  0x92   :  { %1060 = vmatmul.mubr.bf16.gmra.mrb[8].mxu0 %v4237_v63  ;;  %1186 = vmatmul.mubr.bf16.gmra.mrb[8].mxu1 %v4237_v63 }
  0x93   :  { %1845 = vmatpush1.bf16.msra.mxu0 %v4230_v61  ;;  %1971 = vmatpush1.bf16.msra.mxu1 %v4235_v62 }
  0x94   :  { %1846 = vmatprep.subr.bf16.mxu0 %v4244_v0  ;;  %1972 = vmatprep.subr.bf16.mxu1 %v4251_v1 }
  0x95   :  { %1868 = vmatprep.mubr.bf16.mxu0 %v3773_v50  ;;  %1994 = vmatprep.mubr.bf16.mxu1 %v3773_v50 }
  0x97   :  { %1847 = vmatpush1.bf16.msra.mxu0 %v4256_v2  ;;  %1973 = vmatpush1.bf16.msra.mxu1 %v4261_v3 }
  0x98   :  { %1848 = vmatprep.subr.bf16.mxu0 %v4270_v4  ;;  %1974 = vmatprep.subr.bf16.mxu1 %v4277_v5 }
  0x9b   :  { %1849 = vmatpush1.bf16.msra.mxu0 %v4284_v6  ;;  %1975 = vmatpush1.bf16.msra.mxu1 %v4289_v7 }
  0x9c   :  { %1850 = vmatprep.subr.bf16.mxu0 %v4296_v8  ;;  %1976 = vmatprep.subr.bf16.mxu1 %v4303_v10 }
  0x9f   :  { %1851 = vmatpush1.bf16.msra.mxu0 %v4308_v11  ;;  %1977 = vmatpush1.bf16.msra.mxu1 %v4313_v12 }
  0xa0   :  { %1852 = vmatprep.subr.bf16.mxu0 %v4320_v13  ;;  %1978 = vmatprep.subr.bf16.mxu1 %v4327_v14 }
  0xa3   :  { %1853 = vmatpush1.bf16.msra.mxu0 %v4332_v15  ;;  %1979 = vmatpush1.bf16.msra.mxu1 %v4337_v16 }
  0xa4   :  { %1854 = vmatprep.subr.bf16.mxu0 %v4344_v17  ;;  %1980 = vmatprep.subr.bf16.mxu1 %v4351_v18 }
  0xa7   :  { %1855 = vmatpush1.bf16.msra.mxu0 %v4356_v19  ;;  %1981 = vmatpush1.bf16.msra.mxu1 %v4361_v20 }
  0xa8   :  { %1856 = vmatprep.subr.bf16.mxu0 %v4368_v21  ;;  %1982 = vmatprep.subr.bf16.mxu1 %v4375_v22 }
  0xab   :  { %1857 = vmatpush1.bf16.msra.mxu0 %v4380_v23  ;;  %1983 = vmatpush1.bf16.msra.mxu1 %v4385_v24 }
  0xac   :  { %1858 = vmatprep.subr.bf16.mxu0 %v4392_v30  ;;  %1984 = vmatprep.subr.bf16.mxu1 %v4399_v31  ;;  %v4440_v31 = vld [vmem:[%s5327_s1 + $0x1a4] ss:$16 sps:$4 sm:$0xff]   ;;  %v4447_v30 = vld [vmem:[%s5327_s1 + $0x1ac] ss:$16 sps:$4 sm:$0xff]  }
  0xad   :  { %5412 = vst [vmem:[#allocation8_spill] sm:$0xff] %v4440_v31  ;;  %5413 = vst [vmem:[#allocation9_spill] sm:$0xff] %v4447_v30 }
  0xaf   :  { %1859 = vmatpush1.bf16.msra.mxu0 %v4404_v41  ;;  %1985 = vmatpush1.bf16.msra.mxu1 %v4409_v42  ;;  %v4454_v42 = vld [vmem:[%s5327_s1 + $0x1a0] ss:$16 sps:$4 sm:$0xff]  }
  0xb0   :  { %1860 = vmatprep.subr.bf16.mxu0 %v4416_v48  ;;  %1986 = vmatprep.subr.bf16.mxu1 %v4423_v49  ;;  %5414 = vst [vmem:[#allocation10_spill] sm:$0xff] %v4454_v42  ;;  %v4459_v48 = vld [vmem:[%s5327_s1 + $0x1a8] ss:$16 sps:$4 sm:$0xff]  }
  0xb1   :  { %5415 = vst [vmem:[#allocation11_spill] sm:$0xff] %v4459_v48 }
  0xb3   :  { %1861 = vmatpush1.bf16.msra.mxu0 %v4428_v58  ;;  %1987 = vmatpush1.bf16.msra.mxu1 %v4433_v59  ;;  %v4466_v58 = vld [vmem:[%s5327_s1 + $0x1c4] ss:$16 sps:$4 sm:$0xff]   ;;  %v4471_v59 = vld [vmem:[%s5327_s1 + $0x1cc] ss:$16 sps:$4 sm:$0xff]  }
  0xb4   :  { %1862 = vmatprep.subr.bf16.mxu0 %v4440_v31  ;;  %1988 = vmatprep.subr.bf16.mxu1 %v4447_v30  ;;  %5416 = vst [vmem:[#allocation12_spill] sm:$0xff] %v4466_v58  ;;  %5417 = vst [vmem:[#allocation13_spill] sm:$0xff] %v4471_v59  ;;  %v4478_v31 = vld [vmem:[%s5327_s1 + $0x1c0] ss:$16 sps:$4 sm:$0xff]   ;;  %v4483_v30 = vld [vmem:[%s5327_s1 + $0x1c8] ss:$16 sps:$4 sm:$0xff]  }
  0xb5   :  { %5418 = vst [vmem:[#allocation14_spill] sm:$0xff] %v4478_v31  ;;  %5419 = vst [vmem:[#allocation15_spill] sm:$0xff] %v4483_v30 }
  0xb7   :  { %1863 = vmatpush1.bf16.msra.mxu0 %v4454_v42  ;;  %1989 = vmatpush1.bf16.msra.mxu1 %v4459_v48  ;;  %v4490_v42 = vld [vmem:[%s5327_s1 + $0x1e4] ss:$16 sps:$4 sm:$0xff]   ;;  %v4495_v48 = vld [vmem:[%s5327_s1 + $0x1ec] ss:$16 sps:$4 sm:$0xff]  }
  0xb8   :  { %1864 = vmatprep.subr.bf16.mxu0 %v4466_v58  ;;  %1990 = vmatprep.subr.bf16.mxu1 %v4471_v59  ;;  %5420 = vst [vmem:[#allocation16_spill] sm:$0xff] %v4490_v42  ;;  %5421 = vst [vmem:[#allocation17_spill] sm:$0xff] %v4495_v48  ;;  %v4502_v58 = vld [vmem:[%s5327_s1 + $0x1e0] ss:$16 sps:$4 sm:$0xff]   ;;  %v4507_v59 = vld [vmem:[%s5327_s1 + $0x1e8] ss:$16 sps:$4 sm:$0xff]  }
  0xb9   :  { %5422 = vst [vmem:[#allocation18_spill] sm:$0xff] %v4502_v58  ;;  %5423 = vst [vmem:[#allocation19_spill] sm:$0xff] %v4507_v59 }
  0xbb   :  { %1865 = vmatpush1.bf16.msra.mxu0 %v4478_v31  ;;  %1991 = vmatpush1.bf16.msra.mxu1 %v4483_v30  ;;  %v4514_v31 = vld [vmem:[%s5327_s1 + $0x204] ss:$16 sps:$4 sm:$0xff]   ;;  %v4519_v30 = vld [vmem:[%s5327_s1 + $0x20c] ss:$16 sps:$4 sm:$0xff]  }
  0xbc   :  { %1866 = vmatprep.subr.bf16.mxu0 %v4490_v42  ;;  %1992 = vmatprep.subr.bf16.mxu1 %v4495_v48  ;;  %5424 = vst [vmem:[#allocation20_spill] sm:$0xff] %v4514_v31  ;;  %5425 = vst [vmem:[#allocation21_spill] sm:$0xff] %v4519_v30  ;;  %v4526_v42 = vld [vmem:[%s5327_s1 + $0x200] ss:$16 sps:$4 sm:$0xff]   ;;  %v4531_v48 = vld [vmem:[%s5327_s1 + $0x208] ss:$16 sps:$4 sm:$0xff]  }
  0xbd   :  { %5426 = vst [vmem:[#allocation22_spill] sm:$0xff] %v4526_v42  ;;  %5427 = vst [vmem:[#allocation23_spill] sm:$0xff] %v4531_v48 }
  0xbf   :  { %1867 = vmatpush1.bf16.msra.mxu0 %v4502_v58  ;;  %1993 = vmatpush1.bf16.msra.mxu1 %v4507_v59  ;;  %v4538_v58 = vld [vmem:[%s5327_s1 + $0x224] ss:$16 sps:$4 sm:$0xff]   ;;  %v4543_v59 = vld [vmem:[%s5327_s1 + $0x22c] ss:$16 sps:$4 sm:$0xff]  }
  0xc0   :  { %1899 = vmatprep.subr.bf16.mxu0 %v4514_v31  ;;  %2025 = vmatprep.subr.bf16.mxu1 %v4519_v30  ;;  %5428 = vst [vmem:[#allocation24_spill] sm:$0xff] %v4538_v58  ;;  %5429 = vst [vmem:[#allocation25_spill] sm:$0xff] %v4543_v59  ;;  %v4552_v30 = vld [vmem:[%s5327_s1 + $0x220] ss:$16 sps:$4 sm:$0xff]   ;;  %v4557_v31 = vld [vmem:[%s5327_s1 + $0x228] ss:$16 sps:$4 sm:$0xff]  }
  0xc1   :  { %5430 = vst [vmem:[#allocation26_spill] sm:$0xff] %v4552_v30  ;;  %5431 = vst [vmem:[#allocation27_spill] sm:$0xff] %v4557_v31 }
  0xc2   :  { %1869 = vmatmul.mubr.bf16.vlgmr.msra.gmra.mrb[0].mxu0 %v3843_v9  ;;  %1995 = vmatmul.mubr.bf16.vlgmr.msra.gmra.mrb[0].mxu1 %v3843_v9 }
  0xc3   :  { %1900 = vmatpush1.bf16.msra.mxu0 %v4526_v42  ;;  %2026 = vmatpush1.bf16.msra.mxu1 %v4531_v48  ;;  %v4564_v42 = vld [vmem:[%s5327_s1 + $0x244] ss:$16 sps:$4 sm:$0xff]   ;;  %v4569_v48 = vld [vmem:[%s5327_s1 + $0x24c] ss:$16 sps:$4 sm:$0xff]  }
  0xc4   :  { %1901 = vmatprep.subr.bf16.mxu0 %v4538_v58  ;;  %2027 = vmatprep.subr.bf16.mxu1 %v4543_v59  ;;  %5432 = vst [vmem:[#allocation28_spill] sm:$0xff] %v4564_v42  ;;  %5433 = vst [vmem:[#allocation29_spill] sm:$0xff] %v4569_v48  ;;  %v4578_v59 = vld [vmem:[%s5327_s1 + $0x240] ss:$16 sps:$4 sm:$0xff]   ;;  %v4583_v58 = vld [vmem:[%s5327_s1 + $0x248] ss:$16 sps:$4 sm:$0xff]  }
  0xc5   :  { %1878 = vmatprep.mubr.bf16.mxu0 %v3895_v26  ;;  %2004 = vmatprep.mubr.bf16.mxu1 %v3895_v26  ;;  %5434 = vst [vmem:[#allocation30_spill] sm:$0xff] %v4578_v59  ;;  %5435 = vst [vmem:[#allocation31_spill] sm:$0xff] %v4583_v58 }
  0xc7   :  { %1902 = vmatpush1.bf16.msra.mxu0 %v4552_v30  ;;  %2028 = vmatpush1.bf16.msra.mxu1 %v4557_v31  ;;  %v4590_v30 = vld [vmem:[%s5327_s1 + $0x264] ss:$16 sps:$4 sm:$0xff]   ;;  %v4595_v31 = vld [vmem:[%s5327_s1 + $0x26c] ss:$16 sps:$4 sm:$0xff]  }
  0xc8   :  { %1903 = vmatprep.subr.bf16.mxu0 %v4564_v42  ;;  %2029 = vmatprep.subr.bf16.mxu1 %v4569_v48  ;;  %5436 = vst [vmem:[#allocation32_spill] sm:$0xff] %v4590_v30  ;;  %5437 = vst [vmem:[#allocation33_spill] sm:$0xff] %v4595_v31  ;;  %v4604_v48 = vld [vmem:[%s5327_s1 + $0x260] ss:$16 sps:$4 sm:$0xff]   ;;  %v4609_v42 = vld [vmem:[%s5327_s1 + $0x268] ss:$16 sps:$4 sm:$0xff]  }
  0xc9   :  { %5438 = vst [vmem:[#allocation34_spill] sm:$0xff] %v4604_v48  ;;  %5439 = vst [vmem:[#allocation35_spill] sm:$0xff] %v4609_v42 }
  0xca   :  { %1879 = vmatmul.mubr.bf16.gmra.mrb[4].mxu0 %v3914_v32  ;;  %2005 = vmatmul.mubr.bf16.gmra.mrb[4].mxu1 %v3914_v32 }
  0xcb   :  { %1904 = vmatpush1.bf16.msra.mxu0 %v4578_v59  ;;  %2030 = vmatpush1.bf16.msra.mxu1 %v4583_v58  ;;  %v4616_v59 = vld [vmem:[%s5327_s1 + $0x284] ss:$16 sps:$4 sm:$0xff]   ;;  %v4621_v58 = vld [vmem:[%s5327_s1 + $0x28c] ss:$16 sps:$4 sm:$0xff]  }
  0xcc   :  { %1905 = vmatprep.subr.bf16.mxu0 %v4590_v30  ;;  %2031 = vmatprep.subr.bf16.mxu1 %v4595_v31  ;;  %5440 = vst [vmem:[#allocation36_spill] sm:$0xff] %v4616_v59  ;;  %5441 = vst [vmem:[#allocation37_spill] sm:$0xff] %v4621_v58  ;;  %v4630_v31 = vld [vmem:[%s5327_s1 + $0x280] ss:$16 sps:$4 sm:$0xff]   ;;  %v4635_v30 = vld [vmem:[%s5327_s1 + $0x288] ss:$16 sps:$4 sm:$0xff]  }
  0xcd   :  { %1888 = vmatprep.mubr.bf16.mxu0 %v3933_v38  ;;  %2014 = vmatprep.mubr.bf16.mxu1 %v3933_v38  ;;  %5442 = vst [vmem:[#allocation38_spill] sm:$0xff] %v4630_v31  ;;  %5443 = vst [vmem:[#allocation39_spill] sm:$0xff] %v4635_v30 }
  0xcf   :  { %1906 = vmatpush1.bf16.msra.mxu0 %v4604_v48  ;;  %2032 = vmatpush1.bf16.msra.mxu1 %v4609_v42  ;;  %v4642_v48 = vld [vmem:[%s5327_s1 + $0x2a4] ss:$16 sps:$4 sm:$0xff]   ;;  %v4647_v42 = vld [vmem:[%s5327_s1 + $0x2ac] ss:$16 sps:$4 sm:$0xff]  }
  0xd0   :  { %1907 = vmatprep.subr.bf16.mxu0 %v4616_v59  ;;  %2033 = vmatprep.subr.bf16.mxu1 %v4621_v58  ;;  %5444 = vst [vmem:[#allocation40_spill] sm:$0xff] %v4642_v48  ;;  %5445 = vst [vmem:[#allocation41_spill] sm:$0xff] %v4647_v42  ;;  %v4656_v58 = vld [vmem:[%s5327_s1 + $0x2a0] ss:$16 sps:$4 sm:$0xff]   ;;  %v4661_v59 = vld [vmem:[%s5327_s1 + $0x2a8] ss:$16 sps:$4 sm:$0xff]  }
  0xd1   :  { %5446 = vst [vmem:[#allocation42_spill] sm:$0xff] %v4656_v58  ;;  %5447 = vst [vmem:[#allocation43_spill] sm:$0xff] %v4661_v59 }
  0xd2   :  { %1889 = vmatmul.mubr.bf16.gmra.mrb[8].mxu0 %v3955_v45  ;;  %2015 = vmatmul.mubr.bf16.gmra.mrb[8].mxu1 %v3955_v45 }
  0xd3   :  { %1908 = vmatpush1.bf16.msra.mxu0 %v4630_v31  ;;  %2034 = vmatpush1.bf16.msra.mxu1 %v4635_v30  ;;  %v4668_v31 = vld [vmem:[%s5327_s1 + $0x2c4] ss:$16 sps:$4 sm:$0xff]   ;;  %v4673_v30 = vld [vmem:[%s5327_s1 + $0x2cc] ss:$16 sps:$4 sm:$0xff]  }
  0xd4   :  { %1909 = vmatprep.subr.bf16.mxu0 %v4642_v48  ;;  %2035 = vmatprep.subr.bf16.mxu1 %v4647_v42  ;;  %5448 = vst [vmem:[#allocation44_spill] sm:$0xff] %v4668_v31  ;;  %5449 = vst [vmem:[#allocation45_spill] sm:$0xff] %v4673_v30  ;;  %v4682_v42 = vld [vmem:[%s5327_s1 + $0x2c0] ss:$16 sps:$4 sm:$0xff]   ;;  %v4687_v48 = vld [vmem:[%s5327_s1 + $0x2c8] ss:$16 sps:$4 sm:$0xff]  }
  0xd5   :  { %1931 = vmatprep.mubr.bf16.mxu0 %v3971_v51  ;;  %2057 = vmatprep.mubr.bf16.mxu1 %v3971_v51  ;;  %5450 = vst [vmem:[#allocation46_spill] sm:$0xff] %v4682_v42  ;;  %5451 = vst [vmem:[#allocation47_spill] sm:$0xff] %v4687_v48 }
  0xd7   :  { %1910 = vmatpush1.bf16.msra.mxu0 %v4656_v58  ;;  %2036 = vmatpush1.bf16.msra.mxu1 %v4661_v59  ;;  %v4694_v58 = vld [vmem:[%s5327_s1 + $0x2e4] ss:$16 sps:$4 sm:$0xff]   ;;  %v4699_v59 = vld [vmem:[%s5327_s1 + $0x2ec] ss:$16 sps:$4 sm:$0xff]  }
  0xd8   :  { %1911 = vmatprep.subr.bf16.mxu0 %v4668_v31  ;;  %2037 = vmatprep.subr.bf16.mxu1 %v4673_v30  ;;  %5452 = vst [vmem:[#allocation48_spill] sm:$0xff] %v4694_v58  ;;  %5453 = vst [vmem:[#allocation49_spill] sm:$0xff] %v4699_v59  ;;  %v4706_v31 = vld [vmem:[%s5327_s1 + $0x2e0] ss:$16 sps:$4 sm:$0xff]   ;;  %v4711_v30 = vld [vmem:[%s5327_s1 + $0x2e8] ss:$16 sps:$4 sm:$0xff]  }
  0xd9   :  { %5454 = vst [vmem:[#allocation50_spill] sm:$0xff] %v4706_v31  ;;  %5455 = vst [vmem:[#allocation51_spill] sm:$0xff] %v4711_v30 }
  0xdb   :  { %1912 = vmatpush1.bf16.msra.mxu0 %v4682_v42  ;;  %2038 = vmatpush1.bf16.msra.mxu1 %v4687_v48  ;;  %v4718_v42 = vld [vmem:[%s5327_s1 + $0x304] ss:$16 sps:$4 sm:$0xff]   ;;  %v4723_v48 = vld [vmem:[%s5327_s1 + $0x30c] ss:$16 sps:$4 sm:$0xff]  }
  0xdc   :  { %1913 = vmatprep.subr.bf16.mxu0 %v4694_v58  ;;  %2039 = vmatprep.subr.bf16.mxu1 %v4699_v59  ;;  %5456 = vst [vmem:[#allocation52_spill] sm:$0xff] %v4718_v42  ;;  %5457 = vst [vmem:[#allocation53_spill] sm:$0xff] %v4723_v48  ;;  %v4730_v58 = vld [vmem:[%s5327_s1 + $0x300] ss:$16 sps:$4 sm:$0xff]   ;;  %v4735_v59 = vld [vmem:[%s5327_s1 + $0x308] ss:$16 sps:$4 sm:$0xff]  }
  0xdd   :  { %5458 = vst [vmem:[#allocation54_spill] sm:$0xff] %v4730_v58  ;;  %5459 = vst [vmem:[#allocation55_spill] sm:$0xff] %v4735_v59 }
  0xdf   :  { %1914 = vmatpush1.bf16.msra.mxu0 %v4706_v31  ;;  %2040 = vmatpush1.bf16.msra.mxu1 %v4711_v30  ;;  %v4742_v31 = vld [vmem:[%s5327_s1 + $0x324] ss:$16 sps:$4 sm:$0xff]   ;;  %v4747_v30 = vld [vmem:[%s5327_s1 + $0x32c] ss:$16 sps:$4 sm:$0xff]  }
  0xe0   :  { %1915 = vmatprep.subr.bf16.mxu0 %v4718_v42  ;;  %2041 = vmatprep.subr.bf16.mxu1 %v4723_v48  ;;  %5460 = vst [vmem:[#allocation56_spill] sm:$0xff] %v4742_v31  ;;  %5461 = vst [vmem:[#allocation57_spill] sm:$0xff] %v4747_v30  ;;  %v4754_v42 = vld [vmem:[%s5327_s1 + $0x320] ss:$16 sps:$4 sm:$0xff]   ;;  %v4759_v48 = vld [vmem:[%s5327_s1 + $0x328] ss:$16 sps:$4 sm:$0xff]  }
  0xe1   :  { %5462 = vst [vmem:[#allocation58_spill] sm:$0xff] %v4754_v42  ;;  %5463 = vst [vmem:[#allocation59_spill] sm:$0xff] %v4759_v48 }
  0xe3   :  { %1916 = vmatpush1.bf16.msra.mxu0 %v4730_v58  ;;  %2042 = vmatpush1.bf16.msra.mxu1 %v4735_v59  ;;  %v4766_v58 = vld [vmem:[%s5327_s1 + $0x344] ss:$16 sps:$4 sm:$0xff]   ;;  %v4771_v59 = vld [vmem:[%s5327_s1 + $0x34c] ss:$16 sps:$4 sm:$0xff]  }
  0xe4   :  { %1917 = vmatprep.subr.bf16.mxu0 %v4742_v31  ;;  %2043 = vmatprep.subr.bf16.mxu1 %v4747_v30  ;;  %5464 = vst [vmem:[#allocation60_spill] sm:$0xff] %v4766_v58  ;;  %5465 = vst [vmem:[#allocation61_spill] sm:$0xff] %v4771_v59  ;;  %v4778_v31 = vld [vmem:[%s5327_s1 + $0x340] ss:$16 sps:$4 sm:$0xff]   ;;  %v4783_v30 = vld [vmem:[%s5327_s1 + $0x348] ss:$16 sps:$4 sm:$0xff]  }
  0xe5   :  { %5466 = vst [vmem:[#allocation62_spill] sm:$0xff] %v4778_v31  ;;  %5467 = vst [vmem:[#allocation63_spill] sm:$0xff] %v4783_v30 }
  0xe7   :  { %1918 = vmatpush1.bf16.msra.mxu0 %v4754_v42  ;;  %2044 = vmatpush1.bf16.msra.mxu1 %v4759_v48  ;;  %v4790_v42 = vld [vmem:[%s5327_s1 + $0x364] ss:$16 sps:$4 sm:$0xff]   ;;  %v4795_v48 = vld [vmem:[%s5327_s1 + $0x36c] ss:$16 sps:$4 sm:$0xff]  }
  0xe8   :  { %1919 = vmatprep.subr.bf16.mxu0 %v4766_v58  ;;  %2045 = vmatprep.subr.bf16.mxu1 %v4771_v59  ;;  %5468 = vst [vmem:[#allocation64_spill] sm:$0xff] %v4790_v42  ;;  %5469 = vst [vmem:[#allocation65_spill] sm:$0xff] %v4795_v48  ;;  %v4802_v58 = vld [vmem:[%s5327_s1 + $0x360] ss:$16 sps:$4 sm:$0xff]   ;;  %v4807_v59 = vld [vmem:[%s5327_s1 + $0x368] ss:$16 sps:$4 sm:$0xff]  }
  0xe9   :  { %5470 = vst [vmem:[#allocation66_spill] sm:$0xff] %v4802_v58  ;;  %5471 = vst [vmem:[#allocation67_spill] sm:$0xff] %v4807_v59 }
  0xeb   :  { %1920 = vmatpush1.bf16.msra.mxu0 %v4778_v31  ;;  %2046 = vmatpush1.bf16.msra.mxu1 %v4783_v30  ;;  %v4814_v31 = vld [vmem:[%s5327_s1 + $0x384] ss:$16 sps:$4 sm:$0xff]   ;;  %v4819_v30 = vld [vmem:[%s5327_s1 + $0x38c] ss:$16 sps:$4 sm:$0xff]  }
  0xec   :  { %1921 = vmatprep.subr.bf16.mxu0 %v4790_v42  ;;  %2047 = vmatprep.subr.bf16.mxu1 %v4795_v48  ;;  %5472 = vst [vmem:[#allocation68_spill] sm:$0xff] %v4814_v31  ;;  %5473 = vst [vmem:[#allocation69_spill] sm:$0xff] %v4819_v30  ;;  %v4826_v42 = vld [vmem:[%s5327_s1 + $0x380] ss:$16 sps:$4 sm:$0xff]   ;;  %v4831_v48 = vld [vmem:[%s5327_s1 + $0x388] ss:$16 sps:$4 sm:$0xff]  }
  0xed   :  { %5474 = vst [vmem:[#allocation70_spill] sm:$0xff] %v4826_v42  ;;  %5475 = vst [vmem:[#allocation71_spill] sm:$0xff] %v4831_v48 }
  0xef   :  { %1922 = vmatpush1.bf16.msra.mxu0 %v4802_v58  ;;  %2048 = vmatpush1.bf16.msra.mxu1 %v4807_v59  ;;  %v4838_v58 = vld [vmem:[%s5327_s1 + $0x3a4] ss:$16 sps:$4 sm:$0xff]   ;;  %v4843_v59 = vld [vmem:[%s5327_s1 + $0x3ac] ss:$16 sps:$4 sm:$0xff]  }
  0xf0   :  { %1923 = vmatprep.subr.bf16.mxu0 %v4814_v31  ;;  %2049 = vmatprep.subr.bf16.mxu1 %v4819_v30  ;;  %5476 = vst [vmem:[#allocation72_spill] sm:$0xff] %v4838_v58  ;;  %5477 = vst [vmem:[#allocation73_spill] sm:$0xff] %v4843_v59  ;;  %v4850_v31 = vld [vmem:[%s5327_s1 + $0x3a0] ss:$16 sps:$4 sm:$0xff]   ;;  %v4855_v30 = vld [vmem:[%s5327_s1 + $0x3a8] ss:$16 sps:$4 sm:$0xff]  }
  0xf1   :  { %5478 = vst [vmem:[#allocation74_spill] sm:$0xff] %v4850_v31  ;;  %5479 = vst [vmem:[#allocation75_spill] sm:$0xff] %v4855_v30 }
  0xf3   :  { %1924 = vmatpush1.bf16.msra.mxu0 %v4826_v42  ;;  %2050 = vmatpush1.bf16.msra.mxu1 %v4831_v48  ;;  %v4862_v42 = vld [vmem:[%s5327_s1 + $0x3c4] ss:$16 sps:$4 sm:$0xff]   ;;  %v4867_v48 = vld [vmem:[%s5327_s1 + $0x3cc] ss:$16 sps:$4 sm:$0xff]  }
  0xf4   :  { %1925 = vmatprep.subr.bf16.mxu0 %v4838_v58  ;;  %2051 = vmatprep.subr.bf16.mxu1 %v4843_v59  ;;  %5480 = vst [vmem:[#allocation76_spill] sm:$0xff] %v4862_v42  ;;  %5481 = vst [vmem:[#allocation77_spill] sm:$0xff] %v4867_v48  ;;  %v4874_v58 = vld [vmem:[%s5327_s1 + $0x3c0] ss:$16 sps:$4 sm:$0xff]   ;;  %v4879_v59 = vld [vmem:[%s5327_s1 + $0x3c8] ss:$16 sps:$4 sm:$0xff]  }
  0xf7   :  { %1926 = vmatpush1.bf16.msra.mxu0 %v4850_v31  ;;  %2052 = vmatpush1.bf16.msra.mxu1 %v4855_v30  ;;  %v4886_v31 = vld [vmem:[%s5327_s1 + $0x3e4] ss:$16 sps:$4 sm:$0xff]   ;;  %v4891_v30 = vld [vmem:[%s5327_s1 + $0x3ec] ss:$16 sps:$4 sm:$0xff]  }
  0xf8   :  { %1927 = vmatprep.subr.bf16.mxu0 %v4862_v42  ;;  %2053 = vmatprep.subr.bf16.mxu1 %v4867_v48  ;;  %v4898_v42 = vld [vmem:[%s5327_s1 + $0x3e0] ss:$16 sps:$4 sm:$0xff]   ;;  %v4903_v48 = vld [vmem:[%s5327_s1 + $0x3e8] ss:$16 sps:$4 sm:$0xff]  }
  0xfb   :  { %1928 = vmatpush1.bf16.msra.mxu0 %v4874_v58  ;;  %2054 = vmatpush1.bf16.msra.mxu1 %v4879_v59 }
  0xfc   :  { %1929 = vmatprep.subr.bf16.mxu0 %v4886_v31  ;;  %2055 = vmatprep.subr.bf16.mxu1 %v4891_v30 }
  0xff   :  { %1930 = vmatpush1.bf16.msra.mxu0 %v4898_v42  ;;  %2056 = vmatpush1.bf16.msra.mxu1 %v4903_v48 }
 0x100   :  { %2148 = vmatprep.subr.bf16.mxu0 %v4086_v25  ;;  %2274 = vmatprep.subr.bf16.mxu1 %v4091_v27  ;;  %v2089_v25 = vunpack.c.l.bf16 %v3773_v50  ;;  %v2093_v27 = vunpack.c.h.bf16 %v3773_v50  ;;  %v3583_v50 = vld [vmem:[%s5328_s0 + $0x8] sm:$0xff] }
 0x102   :  { %1932 = vmatmul.mubr.bf16.vlgmr.msra.gmra.mrb[0].mxu0 %v4098_v29  ;;  %2058 = vmatmul.mubr.bf16.vlgmr.msra.gmra.mrb[0].mxu1 %v4098_v29 }
 0x103   :  { %2149 = vmatpush1.bf16.msra.mxu0 %v4096_v28  ;;  %2275 = vmatpush1.bf16.msra.mxu1 %v4109_v33  ;;  %v2113_v28 = vsub.f32 %v3583_v50, %v2089_v25  ;;  %v3584_v33 = vld [vmem:[%s5328_s0 + $0x28] sm:$0xff]  ;;  %v5505_v50 = vld [vmem:[#allocation25_spill] sm:$0xff] }
 0x104   :  { %2150 = vmatprep.subr.bf16.mxu0 %v4116_v34  ;;  %2276 = vmatprep.subr.bf16.mxu1 %v4121_v35  ;;  %v2117_v34 = vsub.f32 %v3584_v33, %v2093_v27  ;;  %v5503_v25 = vld [vmem:[#allocation23_spill] sm:$0xff]  ;;  %v5504_v27 = vld [vmem:[#allocation24_spill] sm:$0xff] }
 0x105   :  { %1941 = vmatprep.mubr.bf16.mxu0 %v4128_v37  ;;  %2067 = vmatprep.mubr.bf16.mxu1 %v4128_v37  ;;  %v3592_v33 = vld [vmem:[%s5328_s0 + $0xa8] sm:$0xff] }
 0x106   :  { %v2137_v35 = vpack.c.bf16 %v2117_v34, %v2113_v28 }
 0x107   :  { %2151 = vmatpush1.bf16.msra.mxu0 %v4126_v36  ;;  %2277 = vmatpush1.bf16.msra.mxu1 %v4135_v39  ;;  %v5482_v36 = vld [vmem:[#allocation2_spill] sm:$0xff]  ;;  %v5483_v39 = vld [vmem:[#allocation3_spill] sm:$0xff] }
 0x108   :  { %2152 = vmatprep.subr.bf16.mxu0 %v4142_v40  ;;  %2278 = vmatprep.subr.bf16.mxu1 %v4155_v43  ;;  %v5484_v40 = vld [vmem:[#allocation4_spill] sm:$0xff]  ;;  %v5485_v43 = vld [vmem:[#allocation5_spill] sm:$0xff] }
 0x10a   :  { %1942 = vmatmul.mubr.bf16.gmra.mrb[4].mxu0 %v4169_v47  ;;  %2068 = vmatmul.mubr.bf16.gmra.mrb[4].mxu1 %v4169_v47 }
 0x10b   :  { %2153 = vmatpush1.bf16.msra.mxu0 %v4160_v44  ;;  %2279 = vmatpush1.bf16.msra.mxu1 %v4165_v46  ;;  %v5486_v44 = vld [vmem:[#allocation6_spill] sm:$0xff]  ;;  %v5487_v46 = vld [vmem:[#allocation7_spill] sm:$0xff] }
 0x10c   :  { %2154 = vmatprep.subr.bf16.mxu0 %v4182_v52  ;;  %2280 = vmatprep.subr.bf16.mxu1 %v4189_v53  ;;  %v5488_v52 = vld [vmem:[#allocation8_spill] sm:$0xff]  ;;  %v5489_v53 = vld [vmem:[#allocation9_spill] sm:$0xff] }
 0x10d   :  { %1951 = vmatprep.mubr.bf16.mxu0 %v4201_v56  ;;  %2077 = vmatprep.mubr.bf16.mxu1 %v4201_v56 }
 0x10f   :  { %2155 = vmatpush1.bf16.msra.mxu0 %v4194_v54  ;;  %2281 = vmatpush1.bf16.msra.mxu1 %v4199_v55  ;;  %v2088_v54 = vunpack.c.l.bf16 %v3843_v9  ;;  %v2092_v55 = vunpack.c.h.bf16 %v3843_v9  ;;  %v3586_v9 = vld [vmem:[%s5328_s0 + $0x20] sm:$0xff] }
 0x110   :  { %2156 = vmatprep.subr.bf16.mxu0 %v4206_v57  ;;  %2282 = vmatprep.subr.bf16.mxu1 %v4223_v60  ;;  %v5490_v57 = vld [vmem:[#allocation10_spill] sm:$0xff]  ;;  %v5491_v60 = vld [vmem:[#allocation11_spill] sm:$0xff] }
 0x112   :  { %1952 = vmatmul.mubr.bf16.gmra.mrb[8].mxu0 %v4237_v63  ;;  %2078 = vmatmul.mubr.bf16.gmra.mrb[8].mxu1 %v4237_v63 }
 0x113   :  { %2157 = vmatpush1.bf16.msra.mxu0 %v4230_v61  ;;  %2283 = vmatpush1.bf16.msra.mxu1 %v4235_v62  ;;  %v5492_v61 = vld [vmem:[#allocation12_spill] sm:$0xff]  ;;  %v5493_v62 = vld [vmem:[#allocation13_spill] sm:$0xff] }
 0x114   :  { %2158 = vmatprep.subr.bf16.mxu0 %v4244_v0  ;;  %2284 = vmatprep.subr.bf16.mxu1 %v4251_v1  ;;  %v2097_v0 = vunpack.c.l.bf16 %v3895_v26  ;;  %v2101_v1 = vunpack.c.h.bf16 %v3895_v26  ;;  %v3587_v26 = vld [vmem:[%s5328_s0 + $0x48] sm:$0xff] }
 0x115   :  { %2180 = vmatprep.mubr.bf16.mxu0 %v2137_v35  ;;  %2306 = vmatprep.mubr.bf16.mxu1 %v2137_v35 }
 0x117   :  { %2159 = vmatpush1.bf16.msra.mxu0 %v4256_v2  ;;  %2285 = vmatpush1.bf16.msra.mxu1 %v4261_v3  ;;  %v3585_v2 = vld [vmem:[%s5328_s0] sm:$0xff] }
 0x118   :  { %2160 = vmatprep.subr.bf16.mxu0 %v4270_v4  ;;  %2286 = vmatprep.subr.bf16.mxu1 %v4277_v5  ;;  %v2112_v3 = vsub.f32 %v3585_v2, %v2088_v54  ;;  %v2116_v4 = vsub.f32 %v3586_v9, %v2092_v55  ;;  %v5494_v5 = vld [vmem:[#allocation14_spill] sm:$0xff]  ;;  %v2095_v54 = vunpack.c.h.bf16 %v3971_v51 }
 0x119   :  { %v3593_v55 = vld [vmem:[%s5328_s0 + $0x80] sm:$0xff] }
 0x11b   :  { %2161 = vmatpush1.bf16.msra.mxu0 %v4284_v6  ;;  %2287 = vmatpush1.bf16.msra.mxu1 %v4289_v7  ;;  %v5495_v6 = vld [vmem:[#allocation15_spill] sm:$0xff]  ;;  %v5496_v7 = vld [vmem:[#allocation16_spill] sm:$0xff] }
 0x11c   :  { %2162 = vmatprep.subr.bf16.mxu0 %v4296_v8  ;;  %2288 = vmatprep.subr.bf16.mxu1 %v4303_v10  ;;  %v5497_v8 = vld [vmem:[#allocation17_spill] sm:$0xff]  ;;  %v2121_v10 = vsub.f32 %v3587_v26, %v2097_v0  ;;  %v5512_v0 = vld [vmem:[#allocation32_spill] sm:$0xff] }
 0x11f   :  { %2163 = vmatpush1.bf16.msra.mxu0 %v4308_v11  ;;  %2289 = vmatpush1.bf16.msra.mxu1 %v4313_v12  ;;  %v3588_v11 = vld [vmem:[%s5328_s0 + $0x68] sm:$0xff] }
 0x120   :  { %2164 = vmatprep.subr.bf16.mxu0 %v4320_v13  ;;  %2290 = vmatprep.subr.bf16.mxu1 %v4327_v14  ;;  %v2125_v12 = vsub.f32 %v3588_v11, %v2101_v1  ;;  %v2136_v13 = vpack.c.bf16 %v2116_v4, %v2112_v3  ;;  %v2096_v14 = vunpack.c.l.bf16 %v3914_v32  ;;  %v5513_v1 = vld [vmem:[#allocation33_spill] sm:$0xff]  ;;  %v5519_v11 = vld [vmem:[#allocation39_spill] sm:$0xff] }
 0x121   :  { %v3596_v3 = vld [vmem:[%s5328_s0 + $0x38] sm:$0xff] }
 0x122   :  { %v2119_v9 = vsub.f32 %v3596_v3, %v2095_v54  ;;  %v5552_v54 = vld [vmem:[#allocation72_spill] sm:$0xff] }
 0x123   :  { %2165 = vmatpush1.bf16.msra.mxu0 %v4332_v15  ;;  %2291 = vmatpush1.bf16.msra.mxu1 %v4337_v16  ;;  %v2100_v15 = vunpack.c.h.bf16 %v3914_v32  ;;  %v5498_v16 = vld [vmem:[#allocation18_spill] sm:$0xff] }
 0x124   :  { %2166 = vmatprep.subr.bf16.mxu0 %v4344_v17  ;;  %2292 = vmatprep.subr.bf16.mxu1 %v4351_v18  ;;  %v5499_v17 = vld [vmem:[#allocation19_spill] sm:$0xff]  ;;  %v5500_v18 = vld [vmem:[#allocation20_spill] sm:$0xff] }
 0x127   :  { %2167 = vmatpush1.bf16.msra.mxu0 %v4356_v19  ;;  %2293 = vmatpush1.bf16.msra.mxu1 %v4361_v20  ;;  %v5501_v19 = vld [vmem:[#allocation21_spill] sm:$0xff]  ;;  %v2141_v20 = vpack.c.bf16 %v2125_v12, %v2121_v10  ;;  %v5518_v10 = vld [vmem:[#allocation38_spill] sm:$0xff]  ;;  %v5520_v12 = vld [vmem:[#allocation40_spill] sm:$0xff] }
 0x128   :  { %2168 = vmatprep.subr.bf16.mxu0 %v4368_v21  ;;  %2294 = vmatprep.subr.bf16.mxu1 %v4375_v22  ;;  %v2105_v21 = vunpack.c.l.bf16 %v3933_v38  ;;  %v2109_v22 = vunpack.c.h.bf16 %v3933_v38  ;;  %v3591_v38 = vld [vmem:[%s5328_s0 + $0x88] sm:$0xff] }
 0x12a   :  { %v2129_v28 = vsub.f32 %v3591_v38, %v2105_v21  ;;  %v2133_v34 = vsub.f32 %v3592_v33, %v2109_v22  ;;  %v5529_v21 = vld [vmem:[#allocation49_spill] sm:$0xff]  ;;  %v5530_v22 = vld [vmem:[#allocation50_spill] sm:$0xff]  ;;  %v5539_v38 = vld [vmem:[#allocation59_spill] sm:$0xff] }
 0x12b   :  { %2169 = vmatpush1.bf16.msra.mxu0 %v4380_v23  ;;  %2295 = vmatpush1.bf16.msra.mxu1 %v4385_v24  ;;  %v3589_v23 = vld [vmem:[%s5328_s0 + $0x40] sm:$0xff]  ;;  %v5541_v33 = vld [vmem:[#allocation61_spill] sm:$0xff] }
 0x12c   :  { %2170 = vmatprep.subr.bf16.mxu0 %v5482_v36  ;;  %2296 = vmatprep.subr.bf16.mxu1 %v5483_v39  ;;  %v2120_v32 = vsub.f32 %v3589_v23, %v2096_v14  ;;  %v3590_v24 = vld [vmem:[%s5328_s0 + $0x60] sm:$0xff]  ;;  %v2104_v36 = vunpack.c.l.bf16 %v3955_v45  ;;  %v2108_v39 = vunpack.c.h.bf16 %v3955_v45  ;;  %v5531_v23 = vld [vmem:[#allocation51_spill] sm:$0xff] }
 0x12d   :  { %v5522_v14 = vld [vmem:[#allocation42_spill] sm:$0xff] }
 0x12e   :  { %v2128_v45 = vsub.f32 %v3593_v55, %v2104_v36  ;;  %v5544_v36 = vld [vmem:[#allocation64_spill] sm:$0xff]  ;;  %v5553_v55 = vld [vmem:[#allocation73_spill] sm:$0xff] }
 0x12f   :  { %2171 = vmatpush1.bf16.msra.mxu0 %v4404_v41  ;;  %2297 = vmatpush1.bf16.msra.mxu1 %v5484_v40  ;;  %v2124_v41 = vsub.f32 %v3590_v24, %v2100_v15  ;;  %v5506_v40 = vld [vmem:[#allocation26_spill] sm:$0xff]  ;;  %v5523_v15 = vld [vmem:[#allocation43_spill] sm:$0xff]  ;;  %v5533_v24 = vld [vmem:[#allocation53_spill] sm:$0xff] }
 0x130   :  { %2172 = vmatprep.subr.bf16.mxu0 %v5485_v43  ;;  %2298 = vmatprep.subr.bf16.mxu1 %v4423_v49  ;;  %v5502_v49 = vld [vmem:[#allocation22_spill] sm:$0xff]  ;;  %v5507_v43 = vld [vmem:[#allocation27_spill] sm:$0xff] }
 0x131   :  { %v2140_v35 = vpack.c.bf16 %v2124_v41, %v2120_v32  ;;  %v5532_v32 = vld [vmem:[#allocation52_spill] sm:$0xff]  ;;  %v5534_v41 = vld [vmem:[#allocation54_spill] sm:$0xff] }
 0x133   :  { %2173 = vmatpush1.bf16.msra.mxu0 %v5486_v44  ;;  %2299 = vmatpush1.bf16.msra.mxu1 %v5487_v46  ;;  %v5508_v44 = vld [vmem:[#allocation28_spill] sm:$0xff]  ;;  %v5509_v46 = vld [vmem:[#allocation29_spill] sm:$0xff] }
 0x134   :  { %2174 = vmatprep.subr.bf16.mxu0 %v5488_v52  ;;  %2300 = vmatprep.subr.bf16.mxu1 %v5489_v53  ;;  %v2145_v52 = vpack.c.bf16 %v2133_v34, %v2129_v28  ;;  %v2091_v53 = vunpack.c.l.bf16 %v3971_v51  ;;  %v3595_v51 = vld [vmem:[%s5328_s0 + $0x18] sm:$0xff]  ;;  %v5540_v28 = vld [vmem:[#allocation60_spill] sm:$0xff]  ;;  %v5542_v34 = vld [vmem:[#allocation62_spill] sm:$0xff] }
 0x136   :  { %v2115_v2 = vsub.f32 %v3595_v51, %v2091_v53  ;;  %v5551_v53 = vld [vmem:[#allocation71_spill] sm:$0xff]  ;;  %v5557_v51 = vld [vmem:[#allocation77_spill] sm:$0xff] }
 0x137   :  { %2175 = vmatpush1.bf16.msra.mxu0 %v5490_v57  ;;  %2301 = vmatpush1.bf16.msra.mxu1 %v5491_v60  ;;  %v3594_v57 = vld [vmem:[%s5328_s0 + $0xa0] sm:$0xff] }
 0x138   :  { %2176 = vmatprep.subr.bf16.mxu0 %v5492_v61  ;;  %2302 = vmatprep.subr.bf16.mxu1 %v5493_v62  ;;  %v2132_v60 = vsub.f32 %v3594_v57, %v2108_v39  ;;  %v5510_v61 = vld [vmem:[#allocation30_spill] sm:$0xff]  ;;  %v5511_v62 = vld [vmem:[#allocation31_spill] sm:$0xff]  ;;  %v2139_v26 = vpack.c.bf16 %v2119_v9, %v2115_v2  ;;  %v5545_v39 = vld [vmem:[#allocation65_spill] sm:$0xff]  ;;  %v2094_v57 = vunpack.c.h.bf16 %v4098_v29 }
 0x139   :  { %v3597_v2 = vld [vmem:[%s5328_s0 + $0x10] sm:$0xff] }
 0x13a   :  { %v2144_v4 = vpack.c.bf16 %v2132_v60, %v2128_v45  ;;  %v2090_v45 = vunpack.c.l.bf16 %v4098_v29  ;;  %v5554_v60 = vld [vmem:[#allocation74_spill] sm:$0xff]  ;;  %v3598_v29 = vld [vmem:[%s5328_s0 + $0x30] sm:$0xff] }
 0x13b   :  { %2177 = vmatpush1.bf16.msra.mxu0 %v5494_v5  ;;  %2303 = vmatpush1.bf16.msra.mxu1 %v5495_v6  ;;  %v5514_v5 = vld [vmem:[#allocation34_spill] sm:$0xff]  ;;  %v5515_v6 = vld [vmem:[#allocation35_spill] sm:$0xff]  ;;  %v2118_v9 = vsub.f32 %v3598_v29, %v2094_v57 }
 0x13c   :  { %2178 = vmatprep.subr.bf16.mxu0 %v5496_v7  ;;  %2304 = vmatprep.subr.bf16.mxu1 %v5497_v8  ;;  %v5516_v7 = vld [vmem:[#allocation36_spill] sm:$0xff]  ;;  %v5517_v8 = vld [vmem:[#allocation37_spill] sm:$0xff]  ;;  %v2114_v3 = vsub.f32 %v3597_v2, %v2090_v45 }
 0x13f   :  { %2179 = vmatpush1.bf16.msra.mxu0 %v5498_v16  ;;  %2305 = vmatpush1.bf16.msra.mxu1 %v5499_v17  ;;  %v5524_v16 = vld [vmem:[#allocation44_spill] sm:$0xff]  ;;  %v5525_v17 = vld [vmem:[#allocation45_spill] sm:$0xff] }
 0x140   :  { %2211 = vmatprep.subr.bf16.mxu0 %v5500_v18  ;;  %2337 = vmatprep.subr.bf16.mxu1 %v5501_v19  ;;  %v5526_v18 = vld [vmem:[#allocation46_spill] sm:$0xff]  ;;  %v5527_v19 = vld [vmem:[#allocation47_spill] sm:$0xff] }
 0x142   :  { %2181 = vmatmul.mubr.bf16.vlgmr.msra.gmra.mrb[0].mxu0 %v2136_v13  ;;  %2307 = vmatmul.mubr.bf16.vlgmr.msra.gmra.mrb[0].mxu1 %v2136_v13  ;;  %v5521_v13 = vld [vmem:[#allocation41_spill] sm:$0xff] }
 0x143   :  { %2212 = vmatpush1.bf16.msra.mxu0 %v5502_v49  ;;  %2338 = vmatpush1.bf16.msra.mxu1 %v5503_v25  ;;  %v5535_v49 = vld [vmem:[#allocation55_spill] sm:$0xff]  ;;  %v5536_v25 = vld [vmem:[#allocation56_spill] sm:$0xff] }
 0x144   :  { %2213 = vmatprep.subr.bf16.mxu0 %v5504_v27  ;;  %2339 = vmatprep.subr.bf16.mxu1 %v5505_v50  ;;  %v5537_v27 = vld [vmem:[#allocation57_spill] sm:$0xff]  ;;  %v5538_v50 = vld [vmem:[#allocation58_spill] sm:$0xff] }
 0x145   :  { %2190 = vmatprep.mubr.bf16.mxu0 %v2141_v20  ;;  %2316 = vmatprep.mubr.bf16.mxu1 %v2141_v20  ;;  %v5528_v20 = vld [vmem:[#allocation48_spill] sm:$0xff] }
 0x147   :  { %2214 = vmatpush1.bf16.msra.mxu0 %v5506_v40  ;;  %2340 = vmatpush1.bf16.msra.mxu1 %v5507_v43  ;;  %v5546_v40 = vld [vmem:[#allocation66_spill] sm:$0xff]  ;;  %v5547_v43 = vld [vmem:[#allocation67_spill] sm:$0xff] }
 0x148   :  { %2215 = vmatprep.subr.bf16.mxu0 %v5508_v44  ;;  %2341 = vmatprep.subr.bf16.mxu1 %v5509_v46  ;;  %v5548_v44 = vld [vmem:[#allocation68_spill] sm:$0xff]  ;;  %v5549_v46 = vld [vmem:[#allocation69_spill] sm:$0xff] }
 0x14a   :  { %2191 = vmatmul.mubr.bf16.gmra.mrb[4].mxu0 %v2140_v35  ;;  %2317 = vmatmul.mubr.bf16.gmra.mrb[4].mxu1 %v2140_v35  ;;  %v5543_v35 = vld [vmem:[#allocation63_spill] sm:$0xff] }
 0x14b   :  { %2216 = vmatpush1.bf16.msra.mxu0 %v5510_v61  ;;  %2342 = vmatpush1.bf16.msra.mxu1 %v5511_v62  ;;  %v5555_v61 = vld [vmem:[#allocation75_spill] sm:$0xff]  ;;  %v2099_v62 = vunpack.c.l.bf16 %v4128_v37 }
 0x14c   :  { %2217 = vmatprep.subr.bf16.mxu0 %v5512_v0  ;;  %2343 = vmatprep.subr.bf16.mxu1 %v5513_v1  ;;  %v2103_v0 = vunpack.c.h.bf16 %v4128_v37  ;;  %v5556_v1 = vld [vmem:[#allocation76_spill] sm:$0xff]  ;;  %v3599_v37 = vld [vmem:[%s5328_s0 + $0x58] sm:$0xff] }
 0x14d   :  { %2200 = vmatprep.mubr.bf16.mxu0 %v2145_v52  ;;  %2326 = vmatprep.mubr.bf16.mxu1 %v2145_v52  ;;  %v5550_v52 = vld [vmem:[#allocation70_spill] sm:$0xff] }
 0x14f   :  { %2218 = vmatpush1.bf16.msra.mxu0 %v5514_v5  ;;  %2344 = vmatpush1.bf16.msra.mxu1 %v5515_v6  ;;  %v3600_v5 = vld [vmem:[%s5328_s0 + $0x78] sm:$0xff] }
 0x150   :  { %2219 = vmatprep.subr.bf16.mxu0 %v5516_v7  ;;  %2345 = vmatprep.subr.bf16.mxu1 %v5517_v8  ;;  %v2127_v6 = vsub.f32 %v3600_v5, %v2103_v0  ;;  %v2138_v7 = vpack.c.bf16 %v2118_v9, %v2114_v3  ;;  %v2098_v8 = vunpack.c.l.bf16 %v4169_v47 }
 0x152   :  { %2201 = vmatmul.mubr.bf16.gmra.mrb[8].mxu0 %v2144_v4  ;;  %2327 = vmatmul.mubr.bf16.gmra.mrb[8].mxu1 %v2144_v4  ;;  %v2123_v4 = vsub.f32 %v3599_v37, %v2099_v62 }
 0x153   :  { %2220 = vmatpush1.bf16.msra.mxu0 %v5518_v10  ;;  %2346 = vmatpush1.bf16.msra.mxu1 %v5519_v11  ;;  %v2111_v10 = vunpack.c.h.bf16 %v4201_v56 }
 0x154   :  { %2221 = vmatprep.subr.bf16.mxu0 %v5520_v12  ;;  %2347 = vmatprep.subr.bf16.mxu1 %v5521_v13 }
 0x155   :  { %2243 = vmatprep.mubr.bf16.mxu0 %v2139_v26  ;;  %2369 = vmatprep.mubr.bf16.mxu1 %v2139_v26  ;;  %v2107_v26 = vunpack.c.l.bf16 %v4201_v56  ;;  %v3604_v56 = vld [vmem:[%s5328_s0 + $0xb8] sm:$0xff] }
 0x156   :  { %v2135_v12 = vsub.f32 %v3604_v56, %v2111_v10 }
 0x157   :  { %2222 = vmatpush1.bf16.msra.mxu0 %v5522_v14  ;;  %2348 = vmatpush1.bf16.msra.mxu1 %v5523_v15  ;;  %v2106_v14 = vunpack.c.l.bf16 %v4237_v63  ;;  %v2110_v15 = vunpack.c.h.bf16 %v4237_v63 }
 0x158   :  { %2223 = vmatprep.subr.bf16.mxu0 %v5524_v16  ;;  %2349 = vmatprep.subr.bf16.mxu1 %v5525_v17  ;;  %v3605_v17 = vld [vmem:[%s5328_s0 + $0x90] sm:$0xff] }
 0x15b   :  { %2224 = vmatpush1.bf16.msra.mxu0 %v5526_v18  ;;  %2350 = vmatpush1.bf16.msra.mxu1 %v5527_v19  ;;  %v2130_v18 = vsub.f32 %v3605_v17, %v2106_v14  ;;  %v3606_v19 = vld [vmem:[%s5328_s0 + $0xb0] sm:$0xff] }
 0x15c   :  { %2225 = vmatprep.subr.bf16.mxu0 %v5528_v20  ;;  %2351 = vmatprep.subr.bf16.mxu1 %v5529_v21  ;;  %v2134_v20 = vsub.f32 %v3606_v19, %v2110_v15 }
 0x15e   :  { %v2146_v21 = vpack.c.bf16 %v2134_v20, %v2130_v18 }
 0x15f   :  { %2226 = vmatpush1.bf16.msra.mxu0 %v5530_v22  ;;  %2352 = vmatpush1.bf16.msra.mxu1 %v5531_v23 }
 0x160   :  { %2227 = vmatprep.subr.bf16.mxu0 %v5532_v32  ;;  %2353 = vmatprep.subr.bf16.mxu1 %v5533_v24 }
 0x163   :  { %2228 = vmatpush1.bf16.msra.mxu0 %v5534_v41  ;;  %2354 = vmatpush1.bf16.msra.mxu1 %v5535_v49 }
 0x164   :  { %2229 = vmatprep.subr.bf16.mxu0 %v5536_v25  ;;  %2355 = vmatprep.subr.bf16.mxu1 %v5537_v27 }
 0x167   :  { %2230 = vmatpush1.bf16.msra.mxu0 %v5538_v50  ;;  %2356 = vmatpush1.bf16.msra.mxu1 %v5539_v38  ;;  %v2424_v38 = vlaneseq }
 0x168   :  { %2231 = vmatprep.subr.bf16.mxu0 %v5540_v28  ;;  %2357 = vmatprep.subr.bf16.mxu1 %v5541_v33 }
 0x16b   :  { %2232 = vmatpush1.bf16.msra.mxu0 %v5542_v34  ;;  %2358 = vmatpush1.bf16.msra.mxu1 %v5543_v35 }
 0x16c   :  { %2233 = vmatprep.subr.bf16.mxu0 %v5544_v36  ;;  %2359 = vmatprep.subr.bf16.mxu1 %v5545_v39 }
 0x16f   :  { %2234 = vmatpush1.bf16.msra.mxu0 %v5546_v40  ;;  %2360 = vmatpush1.bf16.msra.mxu1 %v5547_v43 }
 0x170   :  { %2235 = vmatprep.subr.bf16.mxu0 %v5548_v44  ;;  %2361 = vmatprep.subr.bf16.mxu1 %v5549_v46  ;;  %v5161_v44 = vand.u32 127, %v2424_v38 }
 0x172   :  { %vm2427_vm0 = vcmp.eq.s32.totalorder %v5161_v44, 0 }
 0x173   :  { %2236 = vmatpush1.bf16.msra.mxu0 %v5550_v52  ;;  %2362 = vmatpush1.bf16.msra.mxu1 %v5551_v53 }
 0x174   :  { %2237 = vmatprep.subr.bf16.mxu0 %v5552_v54  ;;  %2363 = vmatprep.subr.bf16.mxu1 %v5553_v55 }
 0x177   :  { %2238 = vmatpush1.bf16.msra.mxu0 %v5554_v60  ;;  %2364 = vmatpush1.bf16.msra.mxu1 %v5555_v61 }
 0x178   :  { %2239 = vmatprep.subr.bf16.mxu0 %v5556_v1  ;;  %2365 = vmatprep.subr.bf16.mxu1 %v5557_v51 }
 0x17b   :  { %2240 = vmatpush1.bf16.msra.mxu0 %v4874_v58  ;;  %2366 = vmatpush1.bf16.msra.mxu1 %v4879_v59  ;;  %v2102_v58 = vunpack.c.h.bf16 %v4169_v47  ;;  %v2143_v59 = vpack.c.bf16 %v2127_v6, %v2123_v4  ;;  %v3602_v47 = vld [vmem:[%s5328_s0 + $0x70] sm:$0xff] }
 0x17c   :  { %2241 = vmatprep.subr.bf16.mxu0 %v4886_v31  ;;  %2367 = vmatprep.subr.bf16.mxu1 %v4891_v30  ;;  %v3601_v30 = vld [vmem:[%s5328_s0 + $0x50] sm:$0xff] }
 0x17d   :  { %v2122_v31 = vsub.f32 %v3601_v30, %v2098_v8  ;;  %v2126_v11 = vsub.f32 %v3602_v47, %v2102_v58 }
 0x17f   :  { %2242 = vmatpush1.bf16.msra.mxu0 %v4898_v42  ;;  %2368 = vmatpush1.bf16.msra.mxu1 %v4903_v48  ;;  %v3603_v42 = vld [vmem:[%s5328_s0 + $0x98] sm:$0xff]  ;;  %v2142_v13 = vpack.c.bf16 %v2126_v11, %v2122_v31 }
 0x180   :  { %v2131_v48 = vsub.f32 %v3603_v42, %v2107_v26 }
 0x182   :  { %2244 = vmatmul.mubr.bf16.vlgmr.msra.gmra.mrb[0].mxu0 %v2138_v7  ;;  %2370 = vmatmul.mubr.bf16.vlgmr.msra.gmra.mrb[0].mxu1 %v2138_v7  ;;  %v2147_v16 = vpack.c.bf16 %v2135_v12, %v2131_v48 }
 0x183   :  { %2253 = vmatprep.mubr.bf16.mxu0 %v2143_v59  ;;  %2379 = vmatprep.mubr.bf16.mxu1 %v2143_v59 }
 0x18a   :  { %2254 = vmatmul.mubr.bf16.gmra.mrb[4].mxu0 %v2142_v13  ;;  %2380 = vmatmul.mubr.bf16.gmra.mrb[4].mxu1 %v2142_v13 }
 0x18b   :  { %2263 = vmatprep.mubr.bf16.mxu0 %v2147_v16  ;;  %2389 = vmatprep.mubr.bf16.mxu1 %v2147_v16 }
 0x192   :  { %2264 = vmatmul.mubr.bf16.gmra.mrb[8].mxu0 %v2146_v21  ;;  %2390 = vmatmul.mubr.bf16.gmra.mrb[8].mxu1 %v2146_v21 }
 0x255   :  { %v5143_v22 = vpop.f32.mrb[0].mxu0  ;;  %v2371_v63 = vpop.f32.mrb[0].mxu1 }
 0x256   :  { %v2441_v23 = vmul.f32 %v5143_v22, %v5143_v22  ;;  %v2453_v32 = vmul.f32 %v2371_v63, %v2371_v63  ;;  %v2247_v24 = vpop.f32.mrb[1].mxu0  ;;  %v2373_v41 = vpop.f32.mrb[1].mxu1  ;;  %v2573_v0 = vand.u32 2147483647, %v2371_v63  ;;  %v2429_v26 = vand.u32 2147483647, %v5143_v22 }
 0x257   :  { %v2442_v49 = vmul.f32 %v2247_v24, %v2247_v24  ;;  %v2454_v25 = vmul.f32 %v2373_v41, %v2373_v41  ;;  %v5147_v27 = vpop.f32.mrb[2].mxu0  ;;  %v5149_v50 = vpop.f32.mrb[2].mxu1 }
 0x258   :  { %v5151_v28 = vadd.f32 %v2453_v32, %v2441_v23  ;;  %v2443_v33 = vmul.f32 %v5147_v27, %v5147_v27  ;;  %v2251_v34 = vpop.f32.mrb[3].mxu0  ;;  %v2377_v35 = vpop.f32.mrb[3].mxu1  ;;  %v2455_v39 = vmul.f32 %v5149_v50, %v5149_v50  ;;  %v2585_v10 = vsel %vm2427_vm0, %v2573_v0, 0.0 }
 0x259   :  { %v5155_v36 = vadd.f32 %v2454_v25, %v2442_v49  ;;  %v2444_v40 = vmul.f32 %v2251_v34, %v2251_v34  ;;  %v2456_v43 = vmul.f32 %v2377_v35, %v2377_v35  ;;  %v2431_v30 = vand.u32 2147483647, %v5147_v27 }
 0x25a   :  { %3559 = vrsqrt.f32 %v5151_v28  ;;  %v5163_v46 = vadd.f32 %v2455_v39, %v2443_v33  ;;  %v2575_v31 = vand.u32 2147483647, %v5149_v50  ;;  %vm2479_vm1 = vcmp.eq.f32.partialorder %v5151_v28, inf }
 0x25b   :  { %v5165_v52 = vadd.f32 %v2456_v43, %v2444_v40  ;;  %3561 = vrsqrt.f32 %v5155_v36  ;;  %vm2481_vm2 = vcmp.eq.f32.partialorder %v5151_v28, 0.0  ;;  %v2482_v48 = vand.u32 2147483648, %v5151_v28 }
 0x25c   :  { %3563 = vrsqrt.f32 %v5163_v46  ;;  %vm2486_vm3 = vcmp.eq.f32.partialorder %v5155_v36, inf  ;;  %vm2488_vm4 = vcmp.eq.f32.partialorder %v5155_v36, 0.0  ;;  %v2489_v32 = vand.u32 2147483648, %v5155_v36 }
 0x25d   :  { %v5168_v53 = vpop.f32.mrb[4].mxu0  ;;  %v5170_v54 = vpop.f32.mrb[4].mxu1  ;;  %v2587_v24 = vsel %vm2427_vm0, %v2575_v31, 0.0  ;;  %vm2493_vm5 = vcmp.eq.f32.partialorder %v5163_v46, inf  ;;  %v2496_v34 = vand.u32 2147483648, %v5163_v46  ;;  %vm2495_vm6 = vcmp.eq.f32.partialorder %v5163_v46, 0.0 }
 0x25e   :  { %v2257_v55 = vpop.f32.mrb[5].mxu0  ;;  %v2383_v45 = vpop.f32.mrb[5].mxu1  ;;  %v2445_v57 = vmul.f32 %v5168_v53, %v5168_v53  ;;  %v2457_v60 = vmul.f32 %v5170_v54, %v5170_v54  ;;  %v2577_v41 = vand.u32 2147483647, %v5170_v54  ;;  %v2433_v27 = vand.u32 2147483647, %v5168_v53 }
 0x25f   :  { %v5177_v61 = vpop.f32.mrb[6].mxu0  ;;  %v2385_v62 = vpop.f32.mrb[6].mxu1  ;;  %v2446_v1 = vmul.f32 %v2257_v55, %v2257_v55  ;;  %v2458_v51 = vmul.f32 %v2383_v45, %v2383_v45  ;;  %vm2500_vm15 = vcmp.eq.f32.partialorder %v5165_v52, inf }
 0x260   :  { %v2261_v2 = vpop.f32.mrb[7].mxu0  ;;  %v2387_v3 = vpop.f32.mrb[7].mxu1  ;;  %v5180_v29 = vadd.f32 %v2457_v60, %v2445_v57  ;;  %v2447_v9 = vmul.f32 %v5177_v61, %v5177_v61  ;;  %v2459_v37 = vmul.f32 %v2385_v62, %v2385_v62  ;;  %v2579_v4 = vand.u32 2147483647, %v2385_v62 }
 0x261   :  { %v5184_v5 = vadd.f32 %v2458_v51, %v2446_v1  ;;  %v2448_v6 = vmul.f32 %v2261_v2, %v2261_v2  ;;  %v2460_v7 = vmul.f32 %v2387_v3, %v2387_v3  ;;  %v2435_v33 = vand.u32 2147483647, %v5177_v61 }
 0x262   :  { %3565 = vrsqrt.f32 %v5180_v29  ;;  %v5187_v8 = vadd.f32 %v2459_v37, %v2447_v9  ;;  %v2591_v58 = vsel %vm2427_vm0, %v2579_v4, 0.0  ;;  %v2589_v53 = vsel %vm2427_vm0, %v2577_v41, 0.0 }
 0x263   :  { %v2603_v56 = vsub.f32 %v2585_v10, %v2591_v58  ;;  %v5203_v12 = vadd.f32 %v2460_v7, %v2448_v6  ;;  %vm2507_vm11 = vcmp.eq.f32.partialorder %v5180_v29, inf  ;;  %vm2509_vm12 = vcmp.eq.f32.partialorder %v5180_v29, 0.0 }
 0x264   :  { %v3560_v59 = vpop.eup %3559  ;;  %3567 = vrsqrt.f32 %v5187_v8  ;;  %vm2521_vm7 = vcmp.eq.f32.partialorder %v5187_v8, inf  ;;  %vm2523_vm8 = vcmp.eq.f32.partialorder %v5187_v8, 0.0  ;;  %v2524_v51 = vand.u32 2147483648, %v5187_v8 }
 0x265   :  { %v2478_v47 = vmul.f32 %v3560_v59, %v5151_v28  ;;  %v5199_v11 = vpop.f32.mrb[8].mxu0  ;;  %v2391_v42 = vpop.f32.mrb[8].mxu1  ;;  %3569 = vrsqrt.f32 %v5165_v52  ;;  %v2615_v4 = vmul.f32 %v2603_v56, %v2603_v56  ;;  %vm2528_vm9 = vcmp.eq.f32.partialorder %v5203_v12, inf }
 0x266   :  { %v2267_v13 = vpop.f32.mrb[9].mxu0  ;;  %v2393_v14 = vpop.f32.mrb[9].mxu1  ;;  %v2449_v17 = vmul.f32 %v5199_v11, %v5199_v11  ;;  %v2461_v18 = vmul.f32 %v2391_v42, %v2391_v42  ;;  %3571 = vrsqrt.f32 %v5203_v12  ;;  %v2581_v35 = vand.u32 2147483647, %v2391_v42 }
 0x267   :  { %v3562_v15 = vpop.eup %3561  ;;  %v2480_v16 = vsel %vm2479_vm1, %v5151_v28, %v2478_v47  ;;  %v5209_v19 = vpop.f32.mrb[10].mxu0  ;;  %v2450_v40 = vmul.f32 %v2267_v13, %v2267_v13  ;;  %v2462_v57 = vmul.f32 %v2393_v14, %v2393_v14  ;;  %v2437_v6 = vand.u32 2147483647, %v5199_v11 }
 0x268   :  { %v5211_v20 = vpop.f32.mrb[10].mxu1  ;;  %v3564_v21 = vpop.eup %3563  ;;  %v2483_v22 = vsel %vm2481_vm2, %v2482_v48, %v2480_v16  ;;  %v2485_v25 = vmul.f32 %v3562_v15, %v5155_v36  ;;  %v5230_v50 = vadd.f32 %v2461_v18, %v2449_v17  ;;  %v2451_v62 = vmul.f32 %v5209_v19, %v5209_v19 }
 0x269   :  { %v5218_v63 = vpop.f32.mrb[11].mxu0  ;;  %v5220_v23 = vpop.f32.mrb[11].mxu1  ;;  %v2561_v49 = vsel %vm2427_vm0, %v2429_v26, %v2483_v22  ;;  %v2492_v28 = vmul.f32 %v3564_v21, %v5163_v46  ;;  %v2463_v0 = vmul.f32 %v5211_v20, %v5211_v20  ;;  %v5257_v2 = vadd.f32 %v2462_v57, %v2450_v40 }
 0x26a   :  { %3573 = vrsqrt.f32 %v5230_v50  ;;  %v2487_v55 = vsel %vm2486_vm3, %v5155_v36, %v2485_v25  ;;  %vm2530_vm10 = vcmp.eq.f32.partialorder %v5203_v12, 0.0  ;;  %v2531_v10 = vand.u32 2147483648, %v5203_v12 }
 0x26b   :  { %v2494_v39 = vsel %vm2493_vm5, %v5163_v46, %v2492_v28  ;;  %3575 = vrsqrt.f32 %v5184_v5  ;;  %v2593_v46 = vsel %vm2427_vm0, %v2581_v35, 0.0  ;;  %v2490_v37 = vsel %vm2488_vm4, %v2489_v32, %v2487_v55 }
 0x26c   :  { %v3566_v43 = vpop.eup %3565  ;;  %v2497_v54 = vsel %vm2495_vm6, %v2496_v34, %v2494_v39  ;;  %v2605_v61 = vsub.f32 %v2587_v24, %v2593_v46  ;;  %v5263_v7 = vadd.f32 %v2463_v0, %v2451_v62  ;;  %3577 = vrsqrt.f32 %v5257_v2 }
 0x26d   :  { %v2563_v45 = vsel %vm2427_vm0, %v2431_v30, %v2497_v54  ;;  %v2506_v3 = vmul.f32 %v3566_v43, %v5180_v29  ;;  %v2510_v47 = vand.u32 2147483648, %v5180_v29  ;;  %vm2535_vm13 = vcmp.eq.f32.partialorder %v5230_v50, inf }
 0x26e   :  { %v3568_v60 = vpop.eup %3567  ;;  %3579 = vrsqrt.f32 %v5263_v7  ;;  %v2583_v14 = vand.u32 2147483647, %v5211_v20  ;;  %v2538_v22 = vand.u32 2147483648, %v5230_v50  ;;  %v2464_v32 = vmul.f32 %v5220_v23, %v5220_v23 }
 0x26f   :  { %v2520_v1 = vmul.f32 %v3568_v60, %v5187_v8  ;;  %v3570_v9 = vpop.eup %3569  ;;  %v2508_v31 = vsel %vm2507_vm11, %v5180_v29, %v2506_v3  ;;  %vm2537_vm14 = vcmp.eq.f32.partialorder %v5230_v50, 0.0  ;;  %vm2502_vm1 = vcmp.eq.f32.partialorder %v5165_v52, 0.0 }
 0x270   :  { %v3572_v58 = vpop.eup %3571  ;;  %v2499_v11 = vmul.f32 %v3570_v9, %v5165_v52  ;;  %v2511_v13 = vsel %vm2509_vm12, %v2510_v47, %v2508_v31  ;;  %v2595_v29 = vsel %vm2427_vm0, %v2583_v14, 0.0  ;;  %v2503_v23 = vand.u32 2147483648, %v5165_v52 }
 0x271   :  { %v2522_v59 = vsel %vm2521_vm7, %v5187_v8, %v2520_v1  ;;  %v2527_v26 = vmul.f32 %v3572_v58, %v5203_v12  ;;  %v2565_v21 = vsel %vm2427_vm0, %v2433_v27, %v2511_v13  ;;  %v2607_v41 = vsub.f32 %v2589_v53, %v2595_v29 }
 0x272   :  { %v2525_v36 = vsel %vm2523_vm8, %v2524_v51, %v2522_v59  ;;  %v2617_v39 = vmul.f32 %v2605_v61, %v2605_v61  ;;  %vm2542_vm2 = vcmp.eq.f32.partialorder %v5257_v2, inf  ;;  %v2545_v40 = vand.u32 2147483648, %v5257_v2 }
 0x273   :  { %v2567_v30 = vsel %vm2427_vm0, %v2435_v33, %v2525_v36  ;;  %v2529_v8 = vsel %vm2528_vm9, %v5203_v12, %v2527_v26  ;;  %v2452_v12 = vmul.f32 %v5218_v63, %v5218_v63  ;;  %v2501_v33 = vsel %vm2500_vm15, %v5165_v52, %v2499_v11 }
 0x274   :  { %v2597_v42 = vsub.f32 %v2561_v49, %v2567_v30  ;;  %v3574_v48 = vpop.eup %3573  ;;  %v2532_v56 = vsel %vm2530_vm10, %v2531_v10, %v2529_v8  ;;  %v2504_v43 = vsel %vm2502_vm1, %v2503_v23, %v2501_v33  ;;  %vm2544_vm3 = vcmp.eq.f32.partialorder %v5257_v2, 0.0 }
 0x275   :  { %v3576_v15 = vpop.eup %3575  ;;  %v2598_v17 = vsub.f32 %v2490_v37, %v2532_v56  ;;  %v2534_v18 = vmul.f32 %v3574_v48, %v5230_v50  ;;  %v2476_v25 = vadd.f32 %v2464_v32, %v2452_v12  ;;  %vm2549_vm4 = vcmp.eq.f32.partialorder %v5263_v7, inf }
 0x276   :  { %v2609_v16 = vmul.f32 %v2597_v42, %v2597_v42  ;;  %v3578_v28 = vpop.eup %3577  ;;  %v2552_v52 = vand.u32 2147483648, %v5263_v7  ;;  %v2439_v57 = vand.u32 2147483647, %v5209_v19  ;;  %vm2551_vm5 = vcmp.eq.f32.partialorder %v5263_v7, 0.0 }
 0x277   :  { %v2536_v24 = vsel %vm2535_vm13, %v5230_v50, %v2534_v18  ;;  %3581 = vrsqrt.f32 %v2476_v25  ;;  %v2541_v34 = vmul.f32 %v3578_v28, %v5257_v2  ;;  %v2513_v0 = vmul.f32 %v3576_v15, %v5184_v5 }
 0x278   :  { %v2621_v20 = vadd.f32 %v2615_v4, %v2609_v16  ;;  %v2539_v49 = vsel %vm2537_vm14, %v2538_v22, %v2536_v24  ;;  %v3580_v50 = vpop.eup %3579  ;;  %v2610_v1 = vmul.f32 %v2598_v17, %v2598_v17  ;;  %vm2514_vm6 = vcmp.eq.f32.partialorder %v5184_v5, inf }
 0x279   :  { %v2569_v27 = vsel %vm2427_vm0, %v2437_v6, %v2539_v49  ;;  %v2543_v53 = vsel %vm2542_vm2, %v5257_v2, %v2541_v34  ;;  %v2548_v54 = vmul.f32 %v3580_v50, %v5263_v7  ;;  %v2619_v19 = vmul.f32 %v2607_v41, %v2607_v41 }
 0x27a   :  { %v2599_v63 = vsub.f32 %v2563_v45, %v2569_v27  ;;  %v2546_v45 = vsel %vm2544_vm3, %v2545_v40, %v2543_v53  ;;  %v2515_v6 = vsel %vm2514_vm6, %v5184_v5, %v2513_v0  ;;  %vm2556_vm7 = vcmp.eq.f32.partialorder %v2476_v25, inf }
 0x27b   :  { %v2600_v46 = vsub.f32 %v2504_v43, %v2546_v45  ;;  %v2550_v60 = vsel %vm2549_vm4, %v5263_v7, %v2548_v54  ;;  %v2517_v7 = vand.u32 2147483648, %v5184_v5  ;;  %v2559_v36 = vand.u32 2147483648, %v2476_v25 }
 0x27c   :  { %v2611_v35 = vmul.f32 %v2599_v63, %v2599_v63  ;;  %v2553_v62 = vsel %vm2551_vm5, %v2552_v52, %v2550_v60  ;;  %vm2516_vm8 = vcmp.eq.f32.partialorder %v5184_v5, 0.0  ;;  %vm2558_vm9 = vcmp.eq.f32.partialorder %v2476_v25, 0.0 }
 0x27d   :  { %v2612_v51 = vmul.f32 %v2600_v46, %v2600_v46  ;;  %v2571_v2 = vsel %vm2427_vm0, %v2439_v57, %v2553_v62  ;;  %v2518_v44 = vsel %vm2516_vm8, %v2517_v7, %v2515_v6  ;;  %v3607_v15 = vmov 1966171168  }
 0x27e   :  { %v2623_v55 = vadd.f32 %v2617_v39, %v2611_v35  ;;  %v2601_v3 = vsub.f32 %v2565_v21, %v2571_v2  ;;  %v2647_v16 = vunpack.c.l.s4 %v3607_v15  ;;  %v2650_v22 = vshrl.u32 %v2424_v38, 7 }
 0x27f   :  { %v2635_v9 = vadd.f32 %v2612_v51, %v2610_v1  ;;  %vm2663_vm0 = vcmp.lt.s32.totalorder %v2424_v38, 256 }
 0x280   :  { %v2627_v61 = vadd.f32 %v2623_v55, %v2621_v20  ;;  %v2613_v4 = vmul.f32 %v2601_v3, %v2601_v3  ;;  %v2648_v5 = vunpack.c.0.s8 %v2647_v16 }
 0x281   :  { %v3582_v37 = vpop.eup %3581 }
 0x282   :  { %v2555_v58 = vmul.f32 %v3582_v37, %v2476_v25  ;;  %v2625_v59 = vadd.f32 %v2619_v19, %v2613_v4  ;;  %v2651_v20 = vsub.s32 %v2648_v5, %v2650_v22 }
 0x284   :  { %v2557_v26 = vsel %vm2556_vm7, %v2476_v25, %v2555_v58  ;;  %v2628_v10 = vadd.f32 %v2627_v61, %v2625_v59 }
 0x285   :  { %v2560_v30 = vsel %vm2558_vm9, %v2559_v36, %v2557_v26 }
 0x286   :  { %v2602_v31 = vsub.f32 %v2518_v44, %v2560_v30  ;;  %v2629_v47 = vrot.slane %v2628_v10, 4 }
 0x288   :  { %v2614_v11 = vmul.f32 %v2602_v31, %v2602_v31  ;;  %v2630_v42 = vadd.f32 %v2629_v47, %v2628_v10 }
 0x28a   :  { %v2636_v8 = vadd.f32 %v2635_v9, %v2614_v11  ;;  %v2631_v48 = vrot.slane %v2630_v42, 2 }
 0x28c   :  { %v2637_v56 = vrot.slane %v2636_v8, 4  ;;  %v2632_v13 = vadd.f32 %v2631_v48, %v2630_v42 }
 0x28e   :  { %v2638_v14 = vadd.f32 %v2637_v56, %v2636_v8  ;;  %v2633_v17 = vrot.slane %v2632_v13, 1 }
 0x290   :  { %v2639_v18 = vrot.slane %v2638_v14, 2  ;;  %v2634_v29 = vadd.f32 %v2633_v17, %v2632_v13 }
 0x292   :  { %v2640_v21 = vadd.f32 %v2639_v18, %v2638_v14 }
 0x294   :  { %v2641_v12 = vrot.slane %v2640_v21, 1 }
 0x296   :  { %v2642_v32 = vadd.f32 %v2641_v12, %v2640_v21 }
 0x298   :  { %v2645_v24 = vcombine.low %v2634_v29, %v2642_v32 }
 0x29a   :  { %v2652_v41 = vrot.slane %v2645_v24, %v2651_v20 }
 0x29c   :  { %v2659_v49 = vrot.slane %v2652_v41, %v2651_v20 }
 0x29e   :  { %2665 = vst.msk [vmem:[%s5329_s2] sm:$0x3] %vm2663_vm0, %v2659_v49 }

</bundles_post_ra>
